<compile_context>
chip_gen: v5e
topology: v5e:2x2
jax: 0.10.0
libtpu: 0.0.40
codegen_flags: <defaults>
</compile_context>

<pallas_src>
import math
from functools import partial

import jax
import jax.numpy as jnp
from jax import lax
from jax.experimental import pallas as pl
from jax.experimental.pallas import tpu as pltpu

# ----------------------- scaled-down configuration -----------------------
B = 1              # batch
T_STEPS = 2        # temporal frames
C_IN = 4           # spectral channels (= len(wavelengths))
H_IN = W_IN = 16   # input spatial size
IMG = 8            # backbone input resolution (224 in the original)
PATCH = 4          # patch size / dynamic conv kernel (16 in the original)
HW = IMG // PATCH
N_TOK = HW * HW
SEQ = N_TOK + 1    # tokens per sequence incl. cls
EMBED_DIM = 32     # 768 in the original
DEPTH = 2          # 12 in the original
NUM_HEADS = 4
HEAD_DIM = EMBED_DIM // NUM_HEADS
MLP_HIDDEN = EMBED_DIM * 4
WV_PLANES = 16     # 128 in the original
WG_HEADS = 4
WG_HDIM = WV_PLANES // WG_HEADS
WG_FFN = 32
WT_NUM = 8         # 128 in the original
S_TOKENS = WT_NUM + C_IN + 1
NUM_CLASSES = 3
LTAE_HEADS = 4
LTAE_DK = 4
LTAE_T = 1000.0
LTAE_OFFSET = 10.0
PAD_VALUE = 0.0
WAVELENGTHS = (0.665, 0.56, 0.49, 0.842)

F32 = jnp.float32
MXU_DTYPE = jnp.bfloat16   # MXU operand dtype for x@W projections (f32 accumulate)
NEG_INF = -1e9             # additive pad-mask bias
MASK_VAL = -1e30           # block-diagonal group mask (strictly dominates the pad bias)


# ------------------------- in-kernel helper functions -------------------------
def _mm(a, b):
    """MXU matmul with bf16 operands, f32 accumulation (weights are pre-cast to bf16
    in the wrappers; activations are cast here)."""
    return jnp.dot(a.astype(MXU_DTYPE), b.astype(MXU_DTYPE),
                   preferred_element_type=jnp.float32)


def _erf(x):
    # Abramowitz-Stegun 7.1.26 rational approximation (|err| < 1.5e-7, f32-exact).
    a1, a2, a3, a4, a5 = 0.254829592, -0.284496736, 1.421413741, -1.453152027, 1.061405429
    p = 0.3275911
    s = jnp.where(x < 0.0, -1.0, 1.0)
    ax = jnp.abs(x)
    t = 1.0 / (1.0 + p * ax)
    poly = ((((a5 * t + a4) * t + a3) * t + a2) * t + a1) * t
    return s * (1.0 - poly * jnp.exp(-ax * ax))


def _gelu(x):
    # exact-erf GELU (PyTorch nn.GELU default)
    return 0.5 * x * (1.0 + _erf(x * 0.7071067811865476))


def _layernorm(x, g, b, eps):
    mu = jnp.mean(x, axis=-1, keepdims=True)
    xc = x - mu
    var = jnp.mean(xc * xc, axis=-1, keepdims=True)
    return xc * lax.rsqrt(var + eps) * g + b


def _softmax_lastdim(s):
    s = s - jnp.max(s, axis=-1, keepdims=True)
    p = jnp.exp(s)
    return p * pl.reciprocal(jnp.sum(p, axis=-1, keepdims=True), approx=True)


def _pack_heads(dst_ref, src, nheads, d, offset=0):
    """Scatter per-head lane slices of src (R, *) onto the sublane axis of dst_ref
    ((nheads*R, d)); packed rows are ordered (head, original row)."""
    r = src.shape[0]
    for h in range(nheads):
        dst_ref[h * r:(h + 1) * r, :] = src[:, offset + h * d: offset + (h + 1) * d]


def _unpack_heads(dst_ref, src, nheads, d):
    """Inverse of _pack_heads: gather the packed (nheads*R, d) rows back to a lane-contiguous
    (R, nheads*d) layout so a single (R, D) @ (D, D) projection can follow."""
    r = dst_ref.shape[0]
    for h in range(nheads):
        dst_ref[:, h * d:(h + 1) * d] = src[h * r:(h + 1) * r, :]


def _same_group_mask(nrows, seq):
    """(nrows, nrows) boolean mask, True where rows/cols fall in the same length-`seq` group.
    Built from iota + threshold sums (no vector integer division)."""
    ri = lax.broadcasted_iota(jnp.int32, (nrows, 1), 0)
    ci = lax.broadcasted_iota(jnp.int32, (1, nrows), 1)
    rg = jnp.zeros((nrows, 1), jnp.int32)
    cg = jnp.zeros((1, nrows), jnp.int32)
    for j in range(1, nrows // seq):
        rg = rg + (ri >= j * seq).astype(jnp.int32)
        cg = cg + (ci >= j * seq).astype(jnp.int32)
    return rg == cg


def _block_attention(q_p, k_p, v_p, *, seq, scale, key_bias=None):
    """All-heads / all-sequences attention in one q@k^T and one p@v MXU op.  Heads (and batch)
    are packed on the sublane axis; independence is enforced with a block-diagonal mask
    (group = row // seq).  q_p/k_p: (HR, dk), v_p: (HR, dv) -> (HR, dv).  No explicit k.T."""
    hr = q_p.shape[0]
    s = lax.dot_general(q_p, k_p, (((1,), (1,)), ((), ())),
                        preferred_element_type=jnp.float32) * scale
    if key_bias is not None:
        s = s + key_bias
    s = jnp.where(_same_group_mask(hr, seq), s, MASK_VAL)
    p = _softmax_lastdim(s)
    return jnp.dot(p, v_p, preferred_element_type=jnp.float32)


def _bcast_spec(a):
    """Full-array block that is identical for every grid step (1-D grid)."""
    zeros = (0,) * a.ndim
    return pl.BlockSpec(a.shape, lambda g, _z=zeros: _z)


# ----------------------------- Pallas kernels -----------------------------
def _weightgen_kernel(x0_ref, fc1w, fc1b, fc2w, fc2b,
                      qkvw, qkvb, wo, bo, ln1g, ln1b, ln2g, ln2b,
                      ff1w, ff1b, ff2w, ff2b,
                      fcww, fcwb, fcbw, fcbb,
                      w_out, b_out,
                      q_scr, k_scr, v_scr, attn_scr):
    """Fused TransformerWeightGenerator: FCResLayer + post-norm encoder layer (fused q|k|v,
    all heads in one attention) + fc_weight / fc_bias heads."""
    x0 = x0_ref[...]                                     # (S, WV): [weight_tokens; waves; bias]
    # FCResLayer (row-wise MLP), residual applied to the wave rows only.
    y = jnp.maximum(_mm(x0, fc1w[...]) + fc1b[...], 0.0)
    y = jnp.maximum(_mm(y, fc2w[...]) + fc2b[...], 0.0)
    ridx = lax.broadcasted_iota(jnp.int32, (S_TOKENS, 1), 0)
    rmask = jnp.where((ridx >= WT_NUM) & (ridx < WT_NUM + C_IN), 1.0, 0.0)
    x = x0 + rmask * y
    waves = x[WT_NUM:WT_NUM + C_IN, :]                   # FCResLayer output (pos_wave)

    # post-norm nn.TransformerEncoderLayer (activation='gelu', no dropout)
    qkv = _mm(x, qkvw[...]) + qkvb[...]
    _pack_heads(q_scr, qkv, WG_HEADS, WG_HDIM, 0)
    _pack_heads(k_scr, qkv, WG_HEADS, WG_HDIM, WV_PLANES)
    _pack_heads(v_scr, qkv, WG_HEADS, WG_HDIM, 2 * WV_PLANES)
    o_p = _block_attention(q_scr[...], k_scr[...], v_scr[...],
                           seq=S_TOKENS, scale=WG_HDIM ** -0.5)
    _unpack_heads(attn_scr, o_p, WG_HEADS, WG_HDIM)
    sa = _mm(attn_scr[...], wo[...]) + bo[...]
    x = _layernorm(x + sa, ln1g[...], ln1b[...], 1e-5)
    ff = _gelu(_mm(x, ff1w[...]) + ff1b[...])
    ff = _mm(ff, ff2w[...]) + ff2b[...]
    x = _layernorm(x + ff, ln2g[...], ln2b[...], 1e-5)

    # output heads
    w_tok = x[WT_NUM:WT_NUM + C_IN, :] + waves
    w_out[...] = _mm(w_tok, fcww[...]) + fcwb[...]
    b_out[...] = _mm(x[S_TOKENS - 1:S_TOKENS, :], fcbw[...]) + fcbb[...]


def weight_generator(patch_p, waves_embed):
    wg = patch_p['wg']
    bf = lambda a: a.astype(MXU_DTYPE)
    row = lambda a: a.reshape(1, -1).astype(F32)
    x0 = jnp.concatenate([wg['weight_tokens'], waves_embed, wg['bias_token']], axis=0)
    args = [
        x0.astype(F32),
        bf(patch_p['fc_w1']), row(patch_p['fc_b1']),
        bf(patch_p['fc_w2']), row(patch_p['fc_b2']),
        bf(wg['qkv_w']), row(wg['qkv_b']),
        bf(wg['wo']), row(wg['bo']),
        row(wg['ln1_g']), row(wg['ln1_b']),
        row(wg['ln2_g']), row(wg['ln2_b']),
        bf(wg['ff1_w']), row(wg['ff1_b']),
        bf(wg['ff2_w']), row(wg['ff2_b']),
        bf(wg['fcw_w']), row(wg['fcw_b']),
        bf(wg['fcb_w']), row(wg['fcb_b']),
    ]
    # TODO(synk): whole WG is one grid step (sequential dependencies); on v7x the second
    # TensorCore is idle during this (small) kernel.
    w_out, b_out = pl.pallas_call(
        _weightgen_kernel,
        out_shape=(jax.ShapeDtypeStruct((C_IN, PATCH * PATCH * EMBED_DIM), F32),
                   jax.ShapeDtypeStruct((1, EMBED_DIM), F32)),
        grid=(1,),
        in_specs=[_bcast_spec(a) for a in args],
        out_specs=(pl.BlockSpec((C_IN, PATCH * PATCH * EMBED_DIM), lambda i: (0, 0)),
                   pl.BlockSpec((1, EMBED_DIM), lambda i: (0, 0))),
        scratch_shapes=[pltpu.VMEM((WG_HEADS * S_TOKENS, WG_HDIM), F32),
                        pltpu.VMEM((WG_HEADS * S_TOKENS, WG_HDIM), F32),
                        pltpu.VMEM((WG_HEADS * S_TOKENS, WG_HDIM), F32),
                        pltpu.VMEM((S_TOKENS, WV_PLANES), F32)],
    )(*args)
    return w_out, b_out[0]


def _vit_depth_kernel(patches_ref, pos_ref, cls_ref, dynw_ref, dynb_ref,
                      ln1g, ln1b, qkvw, qkvb, projw, projb,
                      ln2g, ln2b, fc1w, fc1b, fc2w, fc2b,
                      o_ref, q_scr, k_scr, v_scr, attn_scr, *, bt):
    """Whole ViT trunk.  grid=(DEPTH,) 'arbitrary'; per-depth weights stream in while the
    (Bt*SEQ, D) activation stays resident in the VMEM output block.  At depth step 0 the
    dynamic patch-embed projection + pos-embed + cls assembly is fused in."""
    d = pl.program_id(0)
    D = EMBED_DIM

    @pl.when(d == 0)
    def _():
        tok = _mm(patches_ref[...], dynw_ref[...]) + dynb_ref[...] + pos_ref[...]
        for b in range(bt):
            o_ref[b * SEQ:b * SEQ + 1, :] = cls_ref[...]
            o_ref[b * SEQ + 1:(b + 1) * SEQ, :] = tok[b * N_TOK:(b + 1) * N_TOK, :]

    x = o_ref[...]                                                    # (bt*SEQ, D)
    h1 = _layernorm(x, ln1g[0], ln1b[0], 1e-6)
    qkv = _mm(h1, qkvw[0]) + qkvb[0]                                  # (R, 3D), one matmul
    _pack_heads(q_scr, qkv, NUM_HEADS, HEAD_DIM, 0)
    _pack_heads(k_scr, qkv, NUM_HEADS, HEAD_DIM, D)
    _pack_heads(v_scr, qkv, NUM_HEADS, HEAD_DIM, 2 * D)
    o_p = _block_attention(q_scr[...], k_scr[...], v_scr[...],
                           seq=SEQ, scale=HEAD_DIM ** -0.5)
    _unpack_heads(attn_scr, o_p, NUM_HEADS, HEAD_DIM)
    x = x + _mm(attn_scr[...], projw[0]) + projb[0]
    h2 = _layernorm(x, ln2g[0], ln2b[0], 1e-6)
    m = _gelu(_mm(h2, fc1w[0]) + fc1b[0])
    x = x + _mm(m, fc2w[0]) + fc2b[0]
    o_ref[...] = x


def sincos_1d(embed_dim, pos):
    omega = jnp.arange(embed_dim // 2, dtype=F32) / (embed_dim / 2.0)
    omega = 1.0 / (10000.0 ** omega)
    out = pos.reshape(-1)[:, None] * omega[None, :]
    return jnp.concatenate([jnp.sin(out), jnp.cos(out)], axis=1)


def vit_backbone(params, x_img, wavelist):
    """Dynamic patch embed + all ViT blocks.  x_img: (Bt, c, IMG, IMG) -> (Bt, HW, HW, D)."""
    Bt = x_img.shape[0]
    waves_embed = sincos_1d(WV_PLANES, wavelist * 1000.0)               # (c, WV)
    weight, bias = weight_generator(params['patch'], waves_embed)       # fused WG kernel
    # raw memory view, exactly as torch's weight.view(embed_dim, inplanes, k, k)
    dyn_w = weight.reshape(EMBED_DIM, C_IN, PATCH, PATCH) * 0.01
    wmat = dyn_w.reshape(EMBED_DIM, C_IN * PATCH * PATCH).T              # (c*P*P, E)
    dyn_b = (bias * 0.01).reshape(1, EMBED_DIM)

    # conv2d(stride=PATCH, padding=1) via im2col (windows start at multiples of PATCH)
    padded = jnp.pad(x_img, ((0, 0), (0, 0), (1, 1), (1, 1)))[:, :, :HW * PATCH, :HW * PATCH]
    patches = padded.reshape(Bt, C_IN, HW, PATCH, HW, PATCH)
    patches = patches.transpose(0, 2, 4, 1, 3, 5).reshape(Bt * N_TOK, C_IN * PATCH * PATCH)

    pos_body = jnp.tile(params['pos_embed'][0, 1:, :], (Bt, 1))          # (Bt*N_TOK, D)
    cls_row = params['cls_token'][0] + params['pos_embed'][0, :1, :]     # (1, D)

    blocks = params['blocks']
    stk = lambda k: jnp.stack([blk[k] for blk in blocks], axis=0)
    stkb = lambda k: jnp.stack([blk[k] for blk in blocks], axis=0)[:, None, :]
    wargs = [
        stkb('ln1_g'), stkb('ln1_b'),
        stk('qkv_w').astype(MXU_DTYPE), stkb('qkv_b'),
        stk('proj_w').astype(MXU_DTYPE), stkb('proj_b'),
        stkb('ln2_g'), stkb('ln2_b'),
        stk('fc1_w').astype(MXU_DTYPE), stkb('fc1_b'),
        stk('fc2_w').astype(MXU_DTYPE), stkb('fc2_b'),
    ]
    embed_args = [patches.astype(F32), pos_body.astype(F32), cls_row.astype(F32),
                  wmat.astype(F32), dyn_b.astype(F32)]

    R = Bt * SEQ
    in_specs = ([_bcast_spec(a) for a in embed_args] +
                [pl.BlockSpec((1,) + a.shape[1:], lambda d: (d, 0, 0)) for a in wargs])
    out = pl.pallas_call(
        partial(_vit_depth_kernel, bt=Bt),
        out_shape=jax.ShapeDtypeStruct((R, EMBED_DIM), F32),
        grid=(DEPTH,),
        in_specs=in_specs,
        out_specs=pl.BlockSpec((R, EMBED_DIM), lambda d: (0, 0)),   # resident across depth
        scratch_shapes=[pltpu.VMEM((NUM_HEADS * R, HEAD_DIM), F32),
                        pltpu.VMEM((NUM_HEADS * R, HEAD_DIM), F32),
                        pltpu.VMEM((NUM_HEADS * R, HEAD_DIM), F32),
                        pltpu.VMEM((R, EMBED_DIM), F32)],
        compiler_params=pltpu.CompilerParams(dimension_semantics=("arbitrary",)),
    )(*embed_args, *wargs)
    feats = out.reshape(Bt, SEQ, EMBED_DIM)[:, 1:, :].reshape(Bt, HW, HW, EMBED_DIM)
    return feats


def _ltae_kernel(x_ref, bias_ref, qkw, qkb, outw, outb, o_ref,
                 q_scr, k_scr, v_scr, attn_scr, *, t):
    """Per-pixel temporal attention for one block of pixels: all (head, pixel, time) rows are
    packed on the sublane axis; a block-diagonal iota mask keeps pixels/heads independent and a
    linear per-key bias row carries the temporal pad mask.  Output projection fused."""
    x = x_ref[0]                                          # (pb*t, C), rows ordered (pixel, time)
    qk = _mm(x, qkw[...]) + qkb[...]                      # fused q|k projection
    hk = LTAE_HEADS * LTAE_DK
    dv = x.shape[1] // LTAE_HEADS
    _pack_heads(q_scr, qk, LTAE_HEADS, LTAE_DK, 0)
    _pack_heads(k_scr, qk, LTAE_HEADS, LTAE_DK, hk)
    _pack_heads(v_scr, x, LTAE_HEADS, dv, 0)
    o_p = _block_attention(q_scr[...], k_scr[...], v_scr[...],
                           seq=t, scale=LTAE_DK ** -0.5, key_bias=bias_ref[0])
    _unpack_heads(attn_scr, o_p, LTAE_HEADS, dv)
    o_ref[0] = _mm(attn_scr[...], outw[...]) + outb[...]


# TODO(synk): MultiLTAE class was not provided in the reference; implemented as per-pixel
# multi-head temporal self-attention with sinusoidal day encoding (period T, offset) + pad mask.
def multi_ltae(p, feats_nhwc, positions, pad_mask, b, t):
    hh = ww = HW
    C = EMBED_DIM
    # sinusoidal day encoding
    i = jnp.arange(C, dtype=F32)
    denom = LTAE_T ** (2.0 * jnp.floor(i / 2.0) / C)
    ang = (positions.astype(F32) + LTAE_OFFSET)[..., None] / denom          # (b, t, C)
    pe = jnp.where((jnp.arange(C) % 2) == 0, jnp.sin(ang), jnp.cos(ang))
    x = feats_nhwc.reshape(b, t, hh, ww, C) + pe[:, :, None, None, :]
    xp = x.transpose(0, 2, 3, 1, 4).reshape(b * hh * ww * t, C)             # rows (b, y, x, t)

    npix = b * hh * ww
    pb = npix // 2 if npix % 2 == 0 else npix        # >=2 parallel blocks (v7x) when possible
    while LTAE_HEADS * pb * t > 256 and pb % 2 == 0:  # keep packed rows small at real sizes
        pb //= 2
    nblk = npix // pb
    hr = LTAE_HEADS * pb * t
    xb = xp.reshape(nblk, pb * t, C)

    # linear per-key pad bias, column order (head, pixel, time); quadratic mask built in-kernel
    pix_batch = jnp.repeat(jnp.arange(b), hh * ww)
    pad_pt = jnp.where(pad_mask[pix_batch], NEG_INF, 0.0).astype(F32)        # (npix, t)
    pad_bias = jnp.tile(pad_pt.reshape(nblk, pb * t), (1, LTAE_HEADS)).reshape(nblk, 1, hr)

    dv = C // LTAE_HEADS
    qkw = p['qk_w'].astype(MXU_DTYPE)
    qkb = p['qk_b'].reshape(1, -1).astype(F32)
    outw = p['out_w'].astype(MXU_DTYPE)
    outb = p['out_b'].reshape(1, -1).astype(F32)
    out = pl.pallas_call(
        partial(_ltae_kernel, t=t),
        out_shape=jax.ShapeDtypeStruct((nblk, pb * t, C), F32),
        grid=(nblk,),
        in_specs=[pl.BlockSpec((1, pb * t, C), lambda g: (g, 0, 0)),
                  pl.BlockSpec((1, 1, hr), lambda g: (g, 0, 0)),
                  _bcast_spec(qkw), _bcast_spec(qkb),
                  _bcast_spec(outw), _bcast_spec(outb)],
        out_specs=pl.BlockSpec((1, pb * t, C), lambda g: (g, 0, 0)),
        scratch_shapes=[pltpu.VMEM((hr, LTAE_DK), F32),
                        pltpu.VMEM((hr, LTAE_DK), F32),
                        pltpu.VMEM((hr, dv), F32),
                        pltpu.VMEM((pb * t, C), F32)],
        compiler_params=pltpu.CompilerParams(dimension_semantics=("parallel",)),
    )(xb.astype(F32), pad_bias, qkw, qkb, outw, outb)
    # rows back to (b, t, pixel) frame ordering for the seg head
    rows = out.reshape(b, hh, ww, t, C).transpose(0, 3, 1, 2, 4).reshape(b * t, hh * ww, C)
    return rows, None


def _seghead_kernel(x_ref, w1, a1, c1, w3, a2, c2, w2, b2, tapm,
                    o_ref, pad_scr, col_scr, *, hw, half):
    """Fused segmentation head for one frame: ConvTranspose(2,2)+BN+GELU (as a matmul with the
    pixel shuffle done into VMEM scratch), Conv3x3+BN+GELU (im2col built in VMEM -> one matmul),
    final ConvTranspose(2,2) (matmul; pixel shuffle finished in the wrapper)."""
    H2 = 2 * hw
    P = H2 * H2
    PADR = H2 + 1
    x = x_ref[0]                                                      # (hw*hw, C)
    # ConvTranspose2d(C -> C/2, 2, stride 2) + BN + GELU; columns ordered (dy, dx, co)
    t1 = _gelu(_mm(x, w1[...]) * a1[...] + c1[...])                   # (hw*hw, 4*half)
    # pixel-shuffle into a row-major (P, half) image held in VMEM scratch (with row padding)
    pad_scr[...] = jnp.zeros((P + 2 * PADR, half), F32)
    for r in range(P):
        Y, X = r // H2, r % H2
        y, dy, xc, dx = Y // 2, Y % 2, X // 2, X % 2
        src = y * hw + xc
        c0 = (dy * 2 + dx) * half
        pad_scr[PADR + r:PADR + r + 1, :] = t1[src:src + 1, c0:c0 + half]
    # Conv2d(3x3, 'same') + BN + GELU via an im2col built in VMEM -> ONE (P, 9*half) matmul
    tp = 0
    for di in (-1, 0, 1):
        for dj in (-1, 0, 1):
            k = di * H2 + dj
            col_scr[:, tp * half:(tp + 1) * half] = \
                pad_scr[PADR + k:PADR + k + P, :] * tapm[tp]
            tp += 1
    y2 = _gelu(_mm(col_scr[...], w3[...]) * a2[...] + c2[...])        # (P, half)
    # final ConvTranspose2d(C/2 -> num_classes, 2, stride 2); shuffle finished in the wrapper
    o_ref[0] = _mm(y2, w2[...]) + b2[...]                             # (P, 4*num_classes)


def seg_head(p, rows, bt):
    # rows: (bt, hh*ww, C) NHWC pixel rows per frame
    C = EMBED_DIM
    half = C // 2
    eps = 1e-5
    H2 = 2 * HW
    # fold inference BatchNorm into per-output-channel affines
    s1 = p['bn1_g'] * lax.rsqrt(p['bn1_v'] + eps)
    sh1 = p['bn1_b'] - p['bn1_m'] * s1
    s2 = p['bn2_g'] * lax.rsqrt(p['bn2_v'] + eps)
    sh2 = p['bn2_b'] - p['bn2_m'] * s2
    # ConvTranspose weights with columns ordered (dy, dx, out_channel)
    w1 = p['ct1_w'].transpose(0, 2, 3, 1).reshape(C, 4 * half).astype(MXU_DTYPE)
    a1 = jnp.tile(s1, 4).reshape(1, -1)
    c1 = jnp.tile(p['ct1_b'] * s1 + sh1, 4).reshape(1, -1)
    # Conv3x3 weight with rows ordered (tap, in_channel)
    w3 = p['c3_w'].transpose(2, 3, 1, 0).reshape(9 * half, half).astype(MXU_DTYPE)
    a2 = s2.reshape(1, -1)
    c2 = (p['c3_b'] * s2 + sh2).reshape(1, -1)
    w2 = p['ct2_w'].transpose(0, 2, 3, 1).reshape(half, 4 * NUM_CLASSES).astype(MXU_DTYPE)
    b2 = jnp.tile(p['ct2_b'], 4).reshape(1, -1)
    # per-tap X-validity mask (static), so no vector int div/mod is needed in-kernel
    tm = []
    for di in (-1, 0, 1):
        for dj in (-1, 0, 1):
            tm.append([1.0 if 0 <= (r % H2) + dj <= H2 - 1 else 0.0 for r in range(H2 * H2)])
    tap_mask = jnp.asarray(tm, F32).reshape(9, H2 * H2, 1)

    args = [rows.astype(F32), w1, a1, c1, w3, a2, c2, w2, b2, tap_mask]
    in_specs = [pl.BlockSpec((1, HW * HW, C), lambda i: (i, 0, 0))] + \
               [_bcast_spec(a) for a in args[1:]]
    z = pl.pallas_call(
        partial(_seghead_kernel, hw=HW, half=half),
        out_shape=jax.ShapeDtypeStruct((bt, H2 * H2, 4 * NUM_CLASSES), F32),
        grid=(bt,),
        in_specs=in_specs,
        out_specs=pl.BlockSpec((1, H2 * H2, 4 * NUM_CLASSES), lambda i: (i, 0, 0)),
        scratch_shapes=[pltpu.VMEM((H2 * H2 + 2 * (H2 + 1), half), F32),
                        pltpu.VMEM((H2 * H2, 9 * half), F32)],
        compiler_params=pltpu.CompilerParams(dimension_semantics=("parallel",)),
    )(*args)
    # final pixel shuffle + NCHW (tiny; done in XLA)
    z = z.reshape(bt, H2, H2, 2, 2, NUM_CLASSES).transpose(0, 1, 3, 2, 4, 5)
    z = z.reshape(bt, 2 * H2, 2 * H2, NUM_CLASSES).transpose(0, 3, 1, 2)
    return z


# ----------------------------- full forward -----------------------------
def dofa_forward(params, data, positions):
    # data: (b, t, c, h, w), positions: (b, t)
    b, t, c, h, w = data.shape
    pad_mask = jnp.all(data == PAD_VALUE, axis=(-1, -2, -3))           # (b, t)
    x = data.reshape(b * t, c, h, w)
    # TODO(synk): torchvision resize antialias behaviour not reproduced; plain bilinear used.
    x = jax.image.resize(x, (b * t, c, IMG, IMG), method='bilinear')
    feats = vit_backbone(params, x, jnp.asarray(WAVELENGTHS, F32))     # (b*t, HW, HW, E)
    rows, _ = multi_ltae(params['ltae'], feats, positions, pad_mask, b, t)
    out = seg_head(params['head'], rows, b * t)                         # (b*t, NC, 2*H2, 2*H2)
    out = jax.image.resize(out, (b * t, NUM_CLASSES, h, w), method='bilinear')
    return {'logits': out.reshape(b, t, NUM_CLASSES, h, w)}


# ----------------------------- deterministic init -----------------------------
def _xavier(key, din, dout):
    lim = math.sqrt(6.0 / (din + dout))
    return jax.random.uniform(key, (din, dout), F32, -lim, lim)


def _dense(key, din, dout):
    kw, kb = jax.random.split(key)
    return _xavier(kw, din, dout), 0.02 * jax.random.normal(kb, (dout,), F32)


def init_params(key):
    kit = iter(jax.random.split(key, 80))
    patch = {}
    patch['fc_w1'], patch['fc_b1'] = _dense(next(kit), WV_PLANES, WV_PLANES)
    patch['fc_w2'], patch['fc_b2'] = _dense(next(kit), WV_PLANES, WV_PLANES)
    wg = {
        'weight_tokens': 0.02 * jax.random.normal(next(kit), (WT_NUM, WV_PLANES), F32),
        'bias_token': 0.02 * jax.random.normal(next(kit), (1, WV_PLANES), F32),
        'ln1_g': jnp.ones((WV_PLANES,), F32), 'ln1_b': jnp.zeros((WV_PLANES,), F32),
        'ln2_g': jnp.ones((WV_PLANES,), F32), 'ln2_b': jnp.zeros((WV_PLANES,), F32),
    }
    qw, qb = _dense(next(kit), WV_PLANES, WV_PLANES)
    kw, kb = _dense(next(kit), WV_PLANES, WV_PLANES)
    vw, vb = _dense(next(kit), WV_PLANES, WV_PLANES)
    wg['qkv_w'] = jnp.concatenate([qw, kw, vw], axis=1)               # fused q|k|v projection
    wg['qkv_b'] = jnp.concatenate([qb, kb, vb], axis=0)
    wg['wo'], wg['bo'] = _dense(next(kit), WV_PLANES, WV_PLANES)
    wg['ff1_w'], wg['ff1_b'] = _dense(next(kit), WV_PLANES, WG_FFN)
    wg['ff2_w'], wg['ff2_b'] = _dense(next(kit), WG_FFN, WV_PLANES)
    wg['fcw_w'], wg['fcw_b'] = _dense(next(kit), WV_PLANES, PATCH * PATCH * EMBED_DIM)
    wg['fcb_w'], wg['fcb_b'] = _dense(next(kit), WV_PLANES, EMBED_DIM)
    patch['wg'] = wg

    blocks = []
    for _ in range(DEPTH):
        p = {
            'ln1_g': jnp.ones((EMBED_DIM,), F32), 'ln1_b': jnp.zeros((EMBED_DIM,), F32),
            'ln2_g': jnp.ones((EMBED_DIM,), F32), 'ln2_b': jnp.zeros((EMBED_DIM,), F32),
        }
        p['qkv_w'], p['qkv_b'] = _dense(next(kit), EMBED_DIM, 3 * EMBED_DIM)
        p['proj_w'], p['proj_b'] = _dense(next(kit), EMBED_DIM, EMBED_DIM)
        p['fc1_w'], p['fc1_b'] = _dense(next(kit), EMBED_DIM, MLP_HIDDEN)
        p['fc2_w'], p['fc2_b'] = _dense(next(kit), MLP_HIDDEN, EMBED_DIM)
        blocks.append(p)

    ltae = {}
    qw, qb = _dense(next(kit), EMBED_DIM, LTAE_HEADS * LTAE_DK)
    kw, kb = _dense(next(kit), EMBED_DIM, LTAE_HEADS * LTAE_DK)
    ltae['qk_w'] = jnp.concatenate([qw, kw], axis=1)                  # fused q|k projection
    ltae['qk_b'] = jnp.concatenate([qb, kb], axis=0)
    ltae['out_w'], ltae['out_b'] = _dense(next(kit), EMBED_DIM, EMBED_DIM)

    half = EMBED_DIM // 2
    head = {
        'ct1_w': 0.05 * jax.random.normal(next(kit), (EMBED_DIM, half, 2, 2), F32),
        'ct1_b': 0.02 * jax.random.normal(next(kit), (half,), F32),
        'bn1_g': 1.0 + 0.1 * jax.random.normal(next(kit), (half,), F32),
        'bn1_b': 0.1 * jax.random.normal(next(kit), (half,), F32),
        'bn1_m': 0.1 * jax.random.normal(next(kit), (half,), F32),
        'bn1_v': 0.5 + jnp.abs(jax.random.normal(next(kit), (half,), F32)),
        'c3_w': 0.05 * jax.random.normal(next(kit), (half, half, 3, 3), F32),
        'c3_b': 0.02 * jax.random.normal(next(kit), (half,), F32),
        'bn2_g': 1.0 + 0.1 * jax.random.normal(next(kit), (half,), F32),
        'bn2_b': 0.1 * jax.random.normal(next(kit), (half,), F32),
        'bn2_m': 0.1 * jax.random.normal(next(kit), (half,), F32),
        'bn2_v': 0.5 + jnp.abs(jax.random.normal(next(kit), (half,), F32)),
        'ct2_w': 0.05 * jax.random.normal(next(kit), (half, NUM_CLASSES, 2, 2), F32),
        'ct2_b': 0.02 * jax.random.normal(next(kit), (NUM_CLASSES,), F32),
    }

    return {
        'patch': patch,
        'blocks': blocks,
        'ltae': ltae,
        'head': head,
        'pos_embed': jnp.zeros((1, N_TOK + 1, EMBED_DIM), F32),   # zeros, as in __init__
        'cls_token': jnp.zeros((1, 1, EMBED_DIM), F32),
    }


if __name__ == "__main__":
    key = jax.random.PRNGKey(0)
    kp, kd = jax.random.split(key)
    params = init_params(kp)
    data = jax.random.normal(kd, (B, T_STEPS, C_IN, H_IN, W_IN), F32)
    positions = jnp.broadcast_to(jnp.arange(T_STEPS, dtype=F32)[None, :] * 15.0, (B, T_STEPS))

    fwd = jax.jit(dofa_forward)
    out = fwd(params, data, positions)
    logits = jax.block_until_ready(out['logits'])
    assert logits.shape == (B, T_STEPS, NUM_CLASSES, H_IN, W_IN), logits.shape
    assert bool(jnp.all(jnp.isfinite(logits)))
    print("KERNEL_OK")
</pallas_src>

<mosaic_0001>
module attributes {stable_mosaic.version = 11 : i64} {
  func.func @_weightgen_kernel(%arg0: i32, %arg1: memref<13x16xf32, #tpu.memory_space<vmem>>, %arg2: memref<16x16xbf16, #tpu.memory_space<vmem>>, %arg3: memref<1x16xf32, #tpu.memory_space<vmem>>, %arg4: memref<16x16xbf16, #tpu.memory_space<vmem>>, %arg5: memref<1x16xf32, #tpu.memory_space<vmem>>, %arg6: memref<16x48xbf16, #tpu.memory_space<vmem>>, %arg7: memref<1x48xf32, #tpu.memory_space<vmem>>, %arg8: memref<16x16xbf16, #tpu.memory_space<vmem>>, %arg9: memref<1x16xf32, #tpu.memory_space<vmem>>, %arg10: memref<1x16xf32, #tpu.memory_space<vmem>>, %arg11: memref<1x16xf32, #tpu.memory_space<vmem>>, %arg12: memref<1x16xf32, #tpu.memory_space<vmem>>, %arg13: memref<1x16xf32, #tpu.memory_space<vmem>>, %arg14: memref<16x32xbf16, #tpu.memory_space<vmem>>, %arg15: memref<1x32xf32, #tpu.memory_space<vmem>>, %arg16: memref<32x16xbf16, #tpu.memory_space<vmem>>, %arg17: memref<1x16xf32, #tpu.memory_space<vmem>>, %arg18: memref<16x512xbf16, #tpu.memory_space<vmem>>, %arg19: memref<1x512xf32, #tpu.memory_space<vmem>>, %arg20: memref<16x32xbf16, #tpu.memory_space<vmem>>, %arg21: memref<1x32xf32, #tpu.memory_space<vmem>>, %arg22: memref<4x512xf32, #tpu.memory_space<vmem>>, %arg23: memref<1x32xf32, #tpu.memory_space<vmem>>, %arg24: memref<52x4xf32, #tpu.memory_space<vmem>>, %arg25: memref<52x4xf32, #tpu.memory_space<vmem>>, %arg26: memref<52x4xf32, #tpu.memory_space<vmem>>, %arg27: memref<13x16xf32, #tpu.memory_space<vmem>>) attributes {dimension_semantics = [#tpu.dimension_semantics<arbitrary>], iteration_bounds = array<i64: 1>, scalar_prefetch = 0 : i64, scratch_operands = 4 : i64, tpu.core_type = #tpu.core_type<tc>, window_params = [{pipeline_mode = #tpu.pipeline_mode<synchronous>, transform_indices = @transform_0, window_bounds = array<i64: 13, 16>}, {pipeline_mode = #tpu.pipeline_mode<synchronous>, transform_indices = @transform_1, window_bounds = array<i64: 16, 16>}, {pipeline_mode = #tpu.pipeline_mode<synchronous>, transform_indices = @transform_2, window_bounds = array<i64: 1, 16>}, {pipeline_mode = #tpu.pipeline_mode<synchronous>, transform_indices = @transform_3, window_bounds = array<i64: 16, 16>}, {pipeline_mode = #tpu.pipeline_mode<synchronous>, transform_indices = @transform_4, window_bounds = array<i64: 1, 16>}, {pipeline_mode = #tpu.pipeline_mode<synchronous>, transform_indices = @transform_5, window_bounds = array<i64: 16, 48>}, {pipeline_mode = #tpu.pipeline_mode<synchronous>, transform_indices = @transform_6, window_bounds = array<i64: 1, 48>}, {pipeline_mode = #tpu.pipeline_mode<synchronous>, transform_indices = @transform_7, window_bounds = array<i64: 16, 16>}, {pipeline_mode = #tpu.pipeline_mode<synchronous>, transform_indices = @transform_8, window_bounds = array<i64: 1, 16>}, {pipeline_mode = #tpu.pipeline_mode<synchronous>, transform_indices = @transform_9, window_bounds = array<i64: 1, 16>}, {pipeline_mode = #tpu.pipeline_mode<synchronous>, transform_indices = @transform_10, window_bounds = array<i64: 1, 16>}, {pipeline_mode = #tpu.pipeline_mode<synchronous>, transform_indices = @transform_11, window_bounds = array<i64: 1, 16>}, {pipeline_mode = #tpu.pipeline_mode<synchronous>, transform_indices = @transform_12, window_bounds = array<i64: 1, 16>}, {pipeline_mode = #tpu.pipeline_mode<synchronous>, transform_indices = @transform_13, window_bounds = array<i64: 16, 32>}, {pipeline_mode = #tpu.pipeline_mode<synchronous>, transform_indices = @transform_14, window_bounds = array<i64: 1, 32>}, {pipeline_mode = #tpu.pipeline_mode<synchronous>, transform_indices = @transform_15, window_bounds = array<i64: 32, 16>}, {pipeline_mode = #tpu.pipeline_mode<synchronous>, transform_indices = @transform_16, window_bounds = array<i64: 1, 16>}, {pipeline_mode = #tpu.pipeline_mode<synchronous>, transform_indices = @transform_17, window_bounds = array<i64: 16, 512>}, {pipeline_mode = #tpu.pipeline_mode<synchronous>, transform_indices = @transform_18, window_bounds = array<i64: 1, 512>}, {pipeline_mode = #tpu.pipeline_mode<synchronous>, transform_indices = @transform_19, window_bounds = array<i64: 16, 32>}, {pipeline_mode = #tpu.pipeline_mode<synchronous>, transform_indices = @transform_20, window_bounds = array<i64: 1, 32>}, {pipeline_mode = #tpu.pipeline_mode<synchronous>, transform_indices = @transform_21, window_bounds = array<i64: 4, 512>}, {pipeline_mode = #tpu.pipeline_mode<synchronous>, transform_indices = @transform_22, window_bounds = array<i64: 1, 32>}]} {
    %c0 = arith.constant 0 : index
    %c0_0 = arith.constant 0 : index
    %0 = vector.load %arg1[%c0, %c0_0] : memref<13x16xf32, #tpu.memory_space<vmem>>, vector<13x16xf32>
    %c0_1 = arith.constant 0 : index
    %c0_2 = arith.constant 0 : index
    %1 = vector.load %arg2[%c0_1, %c0_2] : memref<16x16xbf16, #tpu.memory_space<vmem>>, vector<16x16xbf16>
    %2 = arith.truncf %0 : vector<13x16xf32> to vector<13x16xbf16>
    %cst = arith.constant dense<0.000000e+00> : vector<13x16xf32>
    %3 = tpu.matmul %2, %1, %cst {dimension_numbers = #tpu.dot_dimension_numbers<[1], [0], [0], [1], [0, 0, 1, 1], [], []>} : vector<13x16xbf16>, vector<16x16xbf16>, vector<13x16xf32> -> vector<13x16xf32>
    %c0_3 = arith.constant 0 : index
    %c0_4 = arith.constant 0 : index
    %4 = vector.load %arg3[%c0_3, %c0_4] : memref<1x16xf32, #tpu.memory_space<vmem>>, vector<1x16xf32>
    %5 = vector.broadcast %4 : vector<1x16xf32> to vector<13x16xf32>
    %6 = arith.addf %3, %5 : vector<13x16xf32>
    %cst_5 = arith.constant 0.000000e+00 : f32
    %7 = vector.broadcast %cst_5 : f32 to vector<13x16xf32>
    %8 = arith.maximumf %6, %7 : vector<13x16xf32>
    %c0_6 = arith.constant 0 : index
    %c0_7 = arith.constant 0 : index
    %9 = vector.load %arg4[%c0_6, %c0_7] : memref<16x16xbf16, #tpu.memory_space<vmem>>, vector<16x16xbf16>
    %10 = arith.truncf %8 : vector<13x16xf32> to vector<13x16xbf16>
    %cst_8 = arith.constant dense<0.000000e+00> : vector<13x16xf32>
    %11 = tpu.matmul %10, %9, %cst_8 {dimension_numbers = #tpu.dot_dimension_numbers<[1], [0], [0], [1], [0, 0, 1, 1], [], []>} : vector<13x16xbf16>, vector<16x16xbf16>, vector<13x16xf32> -> vector<13x16xf32>
    %c0_9 = arith.constant 0 : index
    %c0_10 = arith.constant 0 : index
    %12 = vector.load %arg5[%c0_9, %c0_10] : memref<1x16xf32, #tpu.memory_space<vmem>>, vector<1x16xf32>
    %13 = vector.broadcast %12 : vector<1x16xf32> to vector<13x16xf32>
    %14 = arith.addf %11, %13 : vector<13x16xf32>
    %cst_11 = arith.constant 0.000000e+00 : f32
    %15 = vector.broadcast %cst_11 : f32 to vector<13x16xf32>
    %16 = arith.maximumf %14, %15 : vector<13x16xf32>
    %17 = tpu.iota {dimensions = array<i32: 0>} : vector<13x1xi32>
    %c8_i32 = arith.constant 8 : i32
    %18 = vector.broadcast %c8_i32 : i32 to vector<13x1xi32>
    %19 = arith.cmpi sge, %17, %18 : vector<13x1xi32>
    %c12_i32 = arith.constant 12 : i32
    %20 = vector.broadcast %c12_i32 : i32 to vector<13x1xi32>
    %21 = arith.cmpi slt, %17, %20 : vector<13x1xi32>
    %22 = arith.andi %19, %21 : vector<13x1xi1>
    %cst_12 = arith.constant 1.000000e+00 : f32
    %cst_13 = arith.constant 0.000000e+00 : f32
    %23 = vector.broadcast %cst_12 : f32 to vector<13x1xf32>
    %24 = vector.broadcast %cst_13 : f32 to vector<13x1xf32>
    %25 = arith.select %22, %23, %24 : vector<13x1xi1>, vector<13x1xf32>
    %26 = vector.broadcast %25 : vector<13x1xf32> to vector<13x16xf32>
    %27 = arith.mulf %26, %16 : vector<13x16xf32>
    %28 = arith.addf %0, %27 : vector<13x16xf32>
    %29 = vector.extract_strided_slice %28 {offsets = [8, 0], sizes = [4, 16], strides = [1, 1]} : vector<13x16xf32> to vector<4x16xf32>
    %c0_14 = arith.constant 0 : index
    %c0_15 = arith.constant 0 : index
    %30 = vector.load %arg6[%c0_14, %c0_15] : memref<16x48xbf16, #tpu.memory_space<vmem>>, vector<16x48xbf16>
    %31 = arith.truncf %28 : vector<13x16xf32> to vector<13x16xbf16>
    %cst_16 = arith.constant dense<0.000000e+00> : vector<13x48xf32>
    %32 = tpu.matmul %31, %30, %cst_16 {dimension_numbers = #tpu.dot_dimension_numbers<[1], [0], [0], [1], [0, 0, 1, 1], [], []>} : vector<13x16xbf16>, vector<16x48xbf16>, vector<13x48xf32> -> vector<13x48xf32>
    %c0_17 = arith.constant 0 : index
    %c0_18 = arith.constant 0 : index
    %33 = vector.load %arg7[%c0_17, %c0_18] : memref<1x48xf32, #tpu.memory_space<vmem>>, vector<1x48xf32>
    %34 = vector.broadcast %33 : vector<1x48xf32> to vector<13x48xf32>
    %35 = arith.addf %32, %34 : vector<13x48xf32>
    %36 = vector.extract_strided_slice %35 {offsets = [0, 0], sizes = [13, 4], strides = [1, 1]} : vector<13x48xf32> to vector<13x4xf32>
    %c0_19 = arith.constant 0 : index
    %c0_20 = arith.constant 0 : index
    %37 = vector.load %arg24[%c0_19, %c0_20] : memref<52x4xf32, #tpu.memory_space<vmem>>, vector<13x4xf32>
    tpu.vector_store %arg24[%c0_19, %c0_20], %36 {strides = array<i32>} : memref<52x4xf32, #tpu.memory_space<vmem>>, vector<13x4xf32>,
    %38 = vector.extract_strided_slice %35 {offsets = [0, 4], sizes = [13, 4], strides = [1, 1]} : vector<13x48xf32> to vector<13x4xf32>
    %c13 = arith.constant 13 : index
    %c0_21 = arith.constant 0 : index
    %39 = vector.load %arg24[%c13, %c0_21] : memref<52x4xf32, #tpu.memory_space<vmem>>, vector<13x4xf32>
    tpu.vector_store %arg24[%c13, %c0_21], %38 {strides = array<i32>} : memref<52x4xf32, #tpu.memory_space<vmem>>, vector<13x4xf32>,
    %40 = vector.extract_strided_slice %35 {offsets = [0, 8], sizes = [13, 4], strides = [1, 1]} : vector<13x48xf32> to vector<13x4xf32>
    %c26 = arith.constant 26 : index
    %c0_22 = arith.constant 0 : index
    %41 = vector.load %arg24[%c26, %c0_22] : memref<52x4xf32, #tpu.memory_space<vmem>>, vector<13x4xf32>
    tpu.vector_store %arg24[%c26, %c0_22], %40 {strides = array<i32>} : memref<52x4xf32, #tpu.memory_space<vmem>>, vector<13x4xf32>,
    %42 = vector.extract_strided_slice %35 {offsets = [0, 12], sizes = [13, 4], strides = [1, 1]} : vector<13x48xf32> to vector<13x4xf32>
    %c39 = arith.constant 39 : index
    %c0_23 = arith.constant 0 : index
    %43 = vector.load %arg24[%c39, %c0_23] : memref<52x4xf32, #tpu.memory_space<vmem>>, vector<13x4xf32>
    tpu.vector_store %arg24[%c39, %c0_23], %42 {strides = array<i32>} : memref<52x4xf32, #tpu.memory_space<vmem>>, vector<13x4xf32>,
    %44 = vector.extract_strided_slice %35 {offsets = [0, 16], sizes = [13, 4], strides = [1, 1]} : vector<13x48xf32> to vector<13x4xf32>
    %c0_24 = arith.constant 0 : index
    %c0_25 = arith.constant 0 : index
    %45 = vector.load %arg25[%c0_24, %c0_25] : memref<52x4xf32, #tpu.memory_space<vmem>>, vector<13x4xf32>
    tpu.vector_store %arg25[%c0_24, %c0_25], %44 {strides = array<i32>} : memref<52x4xf32, #tpu.memory_space<vmem>>, vector<13x4xf32>,
    %46 = vector.extract_strided_slice %35 {offsets = [0, 20], sizes = [13, 4], strides = [1, 1]} : vector<13x48xf32> to vector<13x4xf32>
    %c13_26 = arith.constant 13 : index
    %c0_27 = arith.constant 0 : index
    %47 = vector.load %arg25[%c13_26, %c0_27] : memref<52x4xf32, #tpu.memory_space<vmem>>, vector<13x4xf32>
    tpu.vector_store %arg25[%c13_26, %c0_27], %46 {strides = array<i32>} : memref<52x4xf32, #tpu.memory_space<vmem>>, vector<13x4xf32>,
    %48 = vector.extract_strided_slice %35 {offsets = [0, 24], sizes = [13, 4], strides = [1, 1]} : vector<13x48xf32> to vector<13x4xf32>
    %c26_28 = arith.constant 26 : index
    %c0_29 = arith.constant 0 : index
    %49 = vector.load %arg25[%c26_28, %c0_29] : memref<52x4xf32, #tpu.memory_space<vmem>>, vector<13x4xf32>
    tpu.vector_store %arg25[%c26_28, %c0_29], %48 {strides = array<i32>} : memref<52x4xf32, #tpu.memory_space<vmem>>, vector<13x4xf32>,
    %50 = vector.extract_strided_slice %35 {offsets = [0, 28], sizes = [13, 4], strides = [1, 1]} : vector<13x48xf32> to vector<13x4xf32>
    %c39_30 = arith.constant 39 : index
    %c0_31 = arith.constant 0 : index
    %51 = vector.load %arg25[%c39_30, %c0_31] : memref<52x4xf32, #tpu.memory_space<vmem>>, vector<13x4xf32>
    tpu.vector_store %arg25[%c39_30, %c0_31], %50 {strides = array<i32>} : memref<52x4xf32, #tpu.memory_space<vmem>>, vector<13x4xf32>,
    %52 = vector.extract_strided_slice %35 {offsets = [0, 32], sizes = [13, 4], strides = [1, 1]} : vector<13x48xf32> to vector<13x4xf32>
    %c0_32 = arith.constant 0 : index
    %c0_33 = arith.constant 0 : index
    %53 = vector.load %arg26[%c0_32, %c0_33] : memref<52x4xf32, #tpu.memory_space<vmem>>, vector<13x4xf32>
    tpu.vector_store %arg26[%c0_32, %c0_33], %52 {strides = array<i32>} : memref<52x4xf32, #tpu.memory_space<vmem>>, vector<13x4xf32>,
    %54 = vector.extract_strided_slice %35 {offsets = [0, 36], sizes = [13, 4], strides = [1, 1]} : vector<13x48xf32> to vector<13x4xf32>
    %c13_34 = arith.constant 13 : index
    %c0_35 = arith.constant 0 : index
    %55 = vector.load %arg26[%c13_34, %c0_35] : memref<52x4xf32, #tpu.memory_space<vmem>>, vector<13x4xf32>
    tpu.vector_store %arg26[%c13_34, %c0_35], %54 {strides = array<i32>} : memref<52x4xf32, #tpu.memory_space<vmem>>, vector<13x4xf32>,
    %56 = vector.extract_strided_slice %35 {offsets = [0, 40], sizes = [13, 4], strides = [1, 1]} : vector<13x48xf32> to vector<13x4xf32>
    %c26_36 = arith.constant 26 : index
    %c0_37 = arith.constant 0 : index
    %57 = vector.load %arg26[%c26_36, %c0_37] : memref<52x4xf32, #tpu.memory_space<vmem>>, vector<13x4xf32>
    tpu.vector_store %arg26[%c26_36, %c0_37], %56 {strides = array<i32>} : memref<52x4xf32, #tpu.memory_space<vmem>>, vector<13x4xf32>,
    %58 = vector.extract_strided_slice %35 {offsets = [0, 44], sizes = [13, 4], strides = [1, 1]} : vector<13x48xf32> to vector<13x4xf32>
    %c39_38 = arith.constant 39 : index
    %c0_39 = arith.constant 0 : index
    %59 = vector.load %arg26[%c39_38, %c0_39] : memref<52x4xf32, #tpu.memory_space<vmem>>, vector<13x4xf32>
    tpu.vector_store %arg26[%c39_38, %c0_39], %58 {strides = array<i32>} : memref<52x4xf32, #tpu.memory_space<vmem>>, vector<13x4xf32>,
    %c0_40 = arith.constant 0 : index
    %c0_41 = arith.constant 0 : index
    %60 = vector.load %arg24[%c0_40, %c0_41] : memref<52x4xf32, #tpu.memory_space<vmem>>, vector<52x4xf32>
    %c0_42 = arith.constant 0 : index
    %c0_43 = arith.constant 0 : index
    %61 = vector.load %arg25[%c0_42, %c0_43] : memref<52x4xf32, #tpu.memory_space<vmem>>, vector<52x4xf32>
    %c0_44 = arith.constant 0 : index
    %c0_45 = arith.constant 0 : index
    %62 = vector.load %arg26[%c0_44, %c0_45] : memref<52x4xf32, #tpu.memory_space<vmem>>, vector<52x4xf32>
    %cst_46 = arith.constant dense<0.000000e+00> : vector<52x52xf32>
    %63 = tpu.matmul %60, %61, %cst_46 {dimension_numbers = #tpu.dot_dimension_numbers<[1], [1], [0], [0], [0, 0, 1, 0], [], []>} : vector<52x4xf32>, vector<52x4xf32>, vector<52x52xf32> -> vector<52x52xf32>
    %cst_47 = arith.constant 5.000000e-01 : f32
    %64 = vector.broadcast %cst_47 : f32 to vector<52x52xf32>
    %65 = arith.mulf %63, %64 : vector<52x52xf32>
    %66 = tpu.iota {dimensions = array<i32: 0>} : vector<52x1xi32>
    %67 = tpu.iota {dimensions = array<i32: 1>} : vector<1x52xi32>
    %c0_i32 = arith.constant 0 : i32
    %68 = vector.broadcast %c0_i32 : i32 to vector<52x1xi32>
    %c0_i32_48 = arith.constant 0 : i32
    %69 = vector.broadcast %c0_i32_48 : i32 to vector<1x52xi32>
    %c13_i32 = arith.constant 13 : i32
    %70 = vector.broadcast %c13_i32 : i32 to vector<52x1xi32>
    %71 = arith.cmpi sge, %66, %70 : vector<52x1xi32>
    %72 = arith.extui %71 : vector<52x1xi1> to vector<52x1xi32>
    %73 = arith.addi %68, %72 : vector<52x1xi32>
    %c13_i32_49 = arith.constant 13 : i32
    %74 = vector.broadcast %c13_i32_49 : i32 to vector<1x52xi32>
    %75 = arith.cmpi sge, %67, %74 : vector<1x52xi32>
    %76 = arith.extui %75 : vector<1x52xi1> to vector<1x52xi32>
    %77 = arith.addi %69, %76 : vector<1x52xi32>
    %c26_i32 = arith.constant 26 : i32
    %78 = vector.broadcast %c26_i32 : i32 to vector<52x1xi32>
    %79 = arith.cmpi sge, %66, %78 : vector<52x1xi32>
    %80 = arith.extui %79 : vector<52x1xi1> to vector<52x1xi32>
    %81 = arith.addi %73, %80 : vector<52x1xi32>
    %c26_i32_50 = arith.constant 26 : i32
    %82 = vector.broadcast %c26_i32_50 : i32 to vector<1x52xi32>
    %83 = arith.cmpi sge, %67, %82 : vector<1x52xi32>
    %84 = arith.extui %83 : vector<1x52xi1> to vector<1x52xi32>
    %85 = arith.addi %77, %84 : vector<1x52xi32>
    %c39_i32 = arith.constant 39 : i32
    %86 = vector.broadcast %c39_i32 : i32 to vector<52x1xi32>
    %87 = arith.cmpi sge, %66, %86 : vector<52x1xi32>
    %88 = arith.extui %87 : vector<52x1xi1> to vector<52x1xi32>
    %89 = arith.addi %81, %88 : vector<52x1xi32>
    %c39_i32_51 = arith.constant 39 : i32
    %90 = vector.broadcast %c39_i32_51 : i32 to vector<1x52xi32>
    %91 = arith.cmpi sge, %67, %90 : vector<1x52xi32>
    %92 = arith.extui %91 : vector<1x52xi1> to vector<1x52xi32>
    %93 = arith.addi %85, %92 : vector<1x52xi32>
    %94 = vector.broadcast %89 : vector<52x1xi32> to vector<52x52xi32>
    %95 = vector.broadcast %93 : vector<1x52xi32> to vector<52x52xi32>
    %96 = arith.cmpi eq, %94, %95 : vector<52x52xi32>
    %cst_52 = arith.constant -1.000000e+30 : f32
    %97 = vector.broadcast %cst_52 : f32 to vector<52x52xf32>
    %98 = arith.select %96, %65, %97 : vector<52x52xi1>, vector<52x52xf32>
    %cst_53 = arith.constant dense<0xFF800000> : vector<52xf32>
    %99 = vector.multi_reduction <maximumf>, %98, %cst_53 [1] : vector<52x52xf32> to vector<52xf32>
    %100 = vector.shape_cast %99 : vector<52xf32> to vector<52x1xf32>
    %101 = vector.broadcast %100 : vector<52x1xf32> to vector<52x52xf32>
    %102 = arith.subf %98, %101 : vector<52x52xf32>
    %103 = math.exp %102 : vector<52x52xf32>
    %cst_54 = arith.constant dense<0.000000e+00> : vector<52xf32>
    %104 = vector.multi_reduction <add>, %103, %cst_54 [1] : vector<52x52xf32> to vector<52xf32>
    %105 = vector.shape_cast %104 : vector<52xf32> to vector<52x1xf32>
    %106 = tpu.reciprocal %105 {approx = true} : vector<52x1xf32> -> vector<52x1xf32>
    %107 = vector.broadcast %106 : vector<52x1xf32> to vector<52x52xf32>
    %108 = arith.mulf %103, %107 : vector<52x52xf32>
    %cst_55 = arith.constant dense<0.000000e+00> : vector<52x4xf32>
    %109 = tpu.matmul %108, %62, %cst_55 {dimension_numbers = #tpu.dot_dimension_numbers<[1], [0], [0], [1], [0, 0, 1, 1], [], []>} : vector<52x52xf32>, vector<52x4xf32>, vector<52x4xf32> -> vector<52x4xf32>
    %110 = vector.extract_strided_slice %109 {offsets = [0, 0], sizes = [13, 4], strides = [1, 1]} : vector<52x4xf32> to vector<13x4xf32>
    %c0_56 = arith.constant 0 : index
    %c0_57 = arith.constant 0 : index
    %111 = vector.load %arg27[%c0_56, %c0_57] : memref<13x16xf32, #tpu.memory_space<vmem>>, vector<13x4xf32>
    tpu.vector_store %arg27[%c0_56, %c0_57], %110 {strides = array<i32>} : memref<13x16xf32, #tpu.memory_space<vmem>>, vector<13x4xf32>,
    %112 = vector.extract_strided_slice %109 {offsets = [13, 0], sizes = [13, 4], strides = [1, 1]} : vector<52x4xf32> to vector<13x4xf32>
    %c0_58 = arith.constant 0 : index
    %c4 = arith.constant 4 : index
    %113 = vector.load %arg27[%c0_58, %c4] : memref<13x16xf32, #tpu.memory_space<vmem>>, vector<13x4xf32>
    tpu.vector_store %arg27[%c0_58, %c4], %112 {strides = array<i32>} : memref<13x16xf32, #tpu.memory_space<vmem>>, vector<13x4xf32>,
    %114 = vector.extract_strided_slice %109 {offsets = [26, 0], sizes = [13, 4], strides = [1, 1]} : vector<52x4xf32> to vector<13x4xf32>
    %c0_59 = arith.constant 0 : index
    %c8 = arith.constant 8 : index
    %115 = vector.load %arg27[%c0_59, %c8] : memref<13x16xf32, #tpu.memory_space<vmem>>, vector<13x4xf32>
    tpu.vector_store %arg27[%c0_59, %c8], %114 {strides = array<i32>} : memref<13x16xf32, #tpu.memory_space<vmem>>, vector<13x4xf32>,
    %116 = vector.extract_strided_slice %109 {offsets = [39, 0], sizes = [13, 4], strides = [1, 1]} : vector<52x4xf32> to vector<13x4xf32>
    %c0_60 = arith.constant 0 : index
    %c12 = arith.constant 12 : index
    %117 = vector.load %arg27[%c0_60, %c12] : memref<13x16xf32, #tpu.memory_space<vmem>>, vector<13x4xf32>
    tpu.vector_store %arg27[%c0_60, %c12], %116 {strides = array<i32>} : memref<13x16xf32, #tpu.memory_space<vmem>>, vector<13x4xf32>,
    %c0_61 = arith.constant 0 : index
    %c0_62 = arith.constant 0 : index
    %118 = vector.load %arg27[%c0_61, %c0_62] : memref<13x16xf32, #tpu.memory_space<vmem>>, vector<13x16xf32>
    %c0_63 = arith.constant 0 : index
    %c0_64 = arith.constant 0 : index
    %119 = vector.load %arg8[%c0_63, %c0_64] : memref<16x16xbf16, #tpu.memory_space<vmem>>, vector<16x16xbf16>
    %120 = arith.truncf %118 : vector<13x16xf32> to vector<13x16xbf16>
    %cst_65 = arith.constant dense<0.000000e+00> : vector<13x16xf32>
    %121 = tpu.matmul %120, %119, %cst_65 {dimension_numbers = #tpu.dot_dimension_numbers<[1], [0], [0], [1], [0, 0, 1, 1], [], []>} : vector<13x16xbf16>, vector<16x16xbf16>, vector<13x16xf32> -> vector<13x16xf32>
    %c0_66 = arith.constant 0 : index
    %c0_67 = arith.constant 0 : index
    %122 = vector.load %arg9[%c0_66, %c0_67] : memref<1x16xf32, #tpu.memory_space<vmem>>, vector<1x16xf32>
    %123 = vector.broadcast %122 : vector<1x16xf32> to vector<13x16xf32>
    %124 = arith.addf %121, %123 : vector<13x16xf32>
    %125 = arith.addf %28, %124 : vector<13x16xf32>
    %c0_68 = arith.constant 0 : index
    %c0_69 = arith.constant 0 : index
    %126 = vector.load %arg10[%c0_68, %c0_69] : memref<1x16xf32, #tpu.memory_space<vmem>>, vector<1x16xf32>
    %c0_70 = arith.constant 0 : index
    %c0_71 = arith.constant 0 : index
    %127 = vector.load %arg11[%c0_70, %c0_71] : memref<1x16xf32, #tpu.memory_space<vmem>>, vector<1x16xf32>
    %cst_72 = arith.constant dense<0.000000e+00> : vector<13xf32>
    %128 = vector.multi_reduction <add>, %125, %cst_72 [1] : vector<13x16xf32> to vector<13xf32>
    %129 = vector.shape_cast %128 : vector<13xf32> to vector<13x1xf32>
    %cst_73 = arith.constant 1.600000e+01 : f32
    %130 = vector.broadcast %cst_73 : f32 to vector<13x1xf32>
    %131 = arith.divf %129, %130 : vector<13x1xf32>
    %132 = vector.broadcast %131 : vector<13x1xf32> to vector<13x16xf32>
    %133 = arith.subf %125, %132 : vector<13x16xf32>
    %134 = arith.mulf %133, %133 : vector<13x16xf32>
    %cst_74 = arith.constant dense<0.000000e+00> : vector<13xf32>
    %135 = vector.multi_reduction <add>, %134, %cst_74 [1] : vector<13x16xf32> to vector<13xf32>
    %136 = vector.shape_cast %135 : vector<13xf32> to vector<13x1xf32>
    %cst_75 = arith.constant 1.600000e+01 : f32
    %137 = vector.broadcast %cst_75 : f32 to vector<13x1xf32>
    %138 = arith.divf %136, %137 : vector<13x1xf32>
    %cst_76 = arith.constant 9.99999974E-6 : f32
    %139 = vector.broadcast %cst_76 : f32 to vector<13x1xf32>
    %140 = arith.addf %138, %139 : vector<13x1xf32>
    %141 = math.rsqrt %140 : vector<13x1xf32>
    %142 = vector.broadcast %141 : vector<13x1xf32> to vector<13x16xf32>
    %143 = arith.mulf %133, %142 : vector<13x16xf32>
    %144 = vector.broadcast %126 : vector<1x16xf32> to vector<13x16xf32>
    %145 = arith.mulf %143, %144 : vector<13x16xf32>
    %146 = vector.broadcast %127 : vector<1x16xf32> to vector<13x16xf32>
    %147 = arith.addf %145, %146 : vector<13x16xf32>
    %c0_77 = arith.constant 0 : index
    %c0_78 = arith.constant 0 : index
    %148 = vector.load %arg14[%c0_77, %c0_78] : memref<16x32xbf16, #tpu.memory_space<vmem>>, vector<16x32xbf16>
    %149 = arith.truncf %147 : vector<13x16xf32> to vector<13x16xbf16>
    %cst_79 = arith.constant dense<0.000000e+00> : vector<13x32xf32>
    %150 = tpu.matmul %149, %148, %cst_79 {dimension_numbers = #tpu.dot_dimension_numbers<[1], [0], [0], [1], [0, 0, 1, 1], [], []>} : vector<13x16xbf16>, vector<16x32xbf16>, vector<13x32xf32> -> vector<13x32xf32>
    %c0_80 = arith.constant 0 : index
    %c0_81 = arith.constant 0 : index
    %151 = vector.load %arg15[%c0_80, %c0_81] : memref<1x32xf32, #tpu.memory_space<vmem>>, vector<1x32xf32>
    %152 = vector.broadcast %151 : vector<1x32xf32> to vector<13x32xf32>
    %153 = arith.addf %150, %152 : vector<13x32xf32>
    %cst_82 = arith.constant 5.000000e-01 : f32
    %154 = vector.broadcast %cst_82 : f32 to vector<13x32xf32>
    %155 = arith.mulf %154, %153 : vector<13x32xf32>
    %cst_83 = arith.constant 0.707106769 : f32
    %156 = vector.broadcast %cst_83 : f32 to vector<13x32xf32>
    %157 = arith.mulf %153, %156 : vector<13x32xf32>
    %cst_84 = arith.constant 0.000000e+00 : f32
    %158 = vector.broadcast %cst_84 : f32 to vector<13x32xf32>
    %159 = arith.cmpf olt, %157, %158 : vector<13x32xf32>
    %cst_85 = arith.constant -1.000000e+00 : f32
    %cst_86 = arith.constant 1.000000e+00 : f32
    %160 = vector.broadcast %cst_85 : f32 to vector<13x32xf32>
    %161 = vector.broadcast %cst_86 : f32 to vector<13x32xf32>
    %162 = arith.select %159, %160, %161 : vector<13x32xi1>, vector<13x32xf32>
    %163 = math.absf %157 : vector<13x32xf32>
    %cst_87 = arith.constant 0.327591091 : f32
    %164 = vector.broadcast %cst_87 : f32 to vector<13x32xf32>
    %165 = arith.mulf %164, %163 : vector<13x32xf32>
    %cst_88 = arith.constant 1.000000e+00 : f32
    %166 = vector.broadcast %cst_88 : f32 to vector<13x32xf32>
    %167 = arith.addf %166, %165 : vector<13x32xf32>
    %cst_89 = arith.constant 1.000000e+00 : f32
    %168 = vector.broadcast %cst_89 : f32 to vector<13x32xf32>
    %169 = arith.divf %168, %167 : vector<13x32xf32>
    %cst_90 = arith.constant 1.06140542 : f32
    %170 = vector.broadcast %cst_90 : f32 to vector<13x32xf32>
    %171 = arith.mulf %170, %169 : vector<13x32xf32>
    %cst_91 = arith.constant -1.45315206 : f32
    %172 = vector.broadcast %cst_91 : f32 to vector<13x32xf32>
    %173 = arith.addf %171, %172 : vector<13x32xf32>
    %174 = arith.mulf %173, %169 : vector<13x32xf32>
    %cst_92 = arith.constant 1.42141378 : f32
    %175 = vector.broadcast %cst_92 : f32 to vector<13x32xf32>
    %176 = arith.addf %174, %175 : vector<13x32xf32>
    %177 = arith.mulf %176, %169 : vector<13x32xf32>
    %cst_93 = arith.constant -0.284496725 : f32
    %178 = vector.broadcast %cst_93 : f32 to vector<13x32xf32>
    %179 = arith.addf %177, %178 : vector<13x32xf32>
    %180 = arith.mulf %179, %169 : vector<13x32xf32>
    %cst_94 = arith.constant 0.254829586 : f32
    %181 = vector.broadcast %cst_94 : f32 to vector<13x32xf32>
    %182 = arith.addf %180, %181 : vector<13x32xf32>
    %183 = arith.mulf %182, %169 : vector<13x32xf32>
    %cst_95 = arith.constant 0.000000e+00 : f32
    %184 = vector.broadcast %cst_95 : f32 to vector<13x32xf32>
    %185 = arith.subf %184, %163 : vector<13x32xf32>
    %186 = arith.mulf %185, %163 : vector<13x32xf32>
    %187 = math.exp %186 : vector<13x32xf32>
    %188 = arith.mulf %183, %187 : vector<13x32xf32>
    %cst_96 = arith.constant 1.000000e+00 : f32
    %189 = vector.broadcast %cst_96 : f32 to vector<13x32xf32>
    %190 = arith.subf %189, %188 : vector<13x32xf32>
    %191 = arith.mulf %162, %190 : vector<13x32xf32>
    %cst_97 = arith.constant 1.000000e+00 : f32
    %192 = vector.broadcast %cst_97 : f32 to vector<13x32xf32>
    %193 = arith.addf %192, %191 : vector<13x32xf32>
    %194 = arith.mulf %155, %193 : vector<13x32xf32>
    %c0_98 = arith.constant 0 : index
    %c0_99 = arith.constant 0 : index
    %195 = vector.load %arg16[%c0_98, %c0_99] : memref<32x16xbf16, #tpu.memory_space<vmem>>, vector<32x16xbf16>
    %196 = arith.truncf %194 : vector<13x32xf32> to vector<13x32xbf16>
    %cst_100 = arith.constant dense<0.000000e+00> : vector<13x16xf32>
    %197 = tpu.matmul %196, %195, %cst_100 {dimension_numbers = #tpu.dot_dimension_numbers<[1], [0], [0], [1], [0, 0, 1, 1], [], []>} : vector<13x32xbf16>, vector<32x16xbf16>, vector<13x16xf32> -> vector<13x16xf32>
    %c0_101 = arith.constant 0 : index
    %c0_102 = arith.constant 0 : index
    %198 = vector.load %arg17[%c0_101, %c0_102] : memref<1x16xf32, #tpu.memory_space<vmem>>, vector<1x16xf32>
    %199 = vector.broadcast %198 : vector<1x16xf32> to vector<13x16xf32>
    %200 = arith.addf %197, %199 : vector<13x16xf32>
    %201 = arith.addf %147, %200 : vector<13x16xf32>
    %c0_103 = arith.constant 0 : index
    %c0_104 = arith.constant 0 : index
    %202 = vector.load %arg12[%c0_103, %c0_104] : memref<1x16xf32, #tpu.memory_space<vmem>>, vector<1x16xf32>
    %c0_105 = arith.constant 0 : index
    %c0_106 = arith.constant 0 : index
    %203 = vector.load %arg13[%c0_105, %c0_106] : memref<1x16xf32, #tpu.memory_space<vmem>>, vector<1x16xf32>
    %cst_107 = arith.constant dense<0.000000e+00> : vector<13xf32>
    %204 = vector.multi_reduction <add>, %201, %cst_107 [1] : vector<13x16xf32> to vector<13xf32>
    %205 = vector.shape_cast %204 : vector<13xf32> to vector<13x1xf32>
    %cst_108 = arith.constant 1.600000e+01 : f32
    %206 = vector.broadcast %cst_108 : f32 to vector<13x1xf32>
    %207 = arith.divf %205, %206 : vector<13x1xf32>
    %208 = vector.broadcast %207 : vector<13x1xf32> to vector<13x16xf32>
    %209 = arith.subf %201, %208 : vector<13x16xf32>
    %210 = arith.mulf %209, %209 : vector<13x16xf32>
    %cst_109 = arith.constant dense<0.000000e+00> : vector<13xf32>
    %211 = vector.multi_reduction <add>, %210, %cst_109 [1] : vector<13x16xf32> to vector<13xf32>
    %212 = vector.shape_cast %211 : vector<13xf32> to vector<13x1xf32>
    %cst_110 = arith.constant 1.600000e+01 : f32
    %213 = vector.broadcast %cst_110 : f32 to vector<13x1xf32>
    %214 = arith.divf %212, %213 : vector<13x1xf32>
    %cst_111 = arith.constant 9.99999974E-6 : f32
    %215 = vector.broadcast %cst_111 : f32 to vector<13x1xf32>
    %216 = arith.addf %214, %215 : vector<13x1xf32>
    %217 = math.rsqrt %216 : vector<13x1xf32>
    %218 = vector.broadcast %217 : vector<13x1xf32> to vector<13x16xf32>
    %219 = arith.mulf %209, %218 : vector<13x16xf32>
    %220 = vector.broadcast %202 : vector<1x16xf32> to vector<13x16xf32>
    %221 = arith.mulf %219, %220 : vector<13x16xf32>
    %222 = vector.broadcast %203 : vector<1x16xf32> to vector<13x16xf32>
    %223 = arith.addf %221, %222 : vector<13x16xf32>
    %224 = vector.extract_strided_slice %223 {offsets = [8, 0], sizes = [4, 16], strides = [1, 1]} : vector<13x16xf32> to vector<4x16xf32>
    %225 = arith.addf %224, %29 : vector<4x16xf32>
    %c0_112 = arith.constant 0 : index
    %c0_113 = arith.constant 0 : index
    %226 = vector.load %arg18[%c0_112, %c0_113] : memref<16x512xbf16, #tpu.memory_space<vmem>>, vector<16x512xbf16>
    %227 = arith.truncf %225 : vector<4x16xf32> to vector<4x16xbf16>
    %cst_114 = arith.constant dense<0.000000e+00> : vector<4x512xf32>
    %228 = tpu.matmul %227, %226, %cst_114 {dimension_numbers = #tpu.dot_dimension_numbers<[1], [0], [0], [1], [0, 0, 1, 1], [], []>} : vector<4x16xbf16>, vector<16x512xbf16>, vector<4x512xf32> -> vector<4x512xf32>
    %c0_115 = arith.constant 0 : index
    %c0_116 = arith.constant 0 : index
    %229 = vector.load %arg19[%c0_115, %c0_116] : memref<1x512xf32, #tpu.memory_space<vmem>>, vector<1x512xf32>
    %230 = vector.broadcast %229 : vector<1x512xf32> to vector<4x512xf32>
    %231 = arith.addf %228, %230 : vector<4x512xf32>
    %c0_117 = arith.constant 0 : index
    %c0_118 = arith.constant 0 : index
    %232 = vector.load %arg22[%c0_117, %c0_118] : memref<4x512xf32, #tpu.memory_space<vmem>>, vector<4x512xf32>
    tpu.vector_store %arg22[%c0_117, %c0_118], %231 {strides = array<i32>} : memref<4x512xf32, #tpu.memory_space<vmem>>, vector<4x512xf32>,
    %233 = vector.extract_strided_slice %223 {offsets = [12, 0], sizes = [1, 16], strides = [1, 1]} : vector<13x16xf32> to vector<1x16xf32>
    %c0_119 = arith.constant 0 : index
    %c0_120 = arith.constant 0 : index
    %234 = vector.load %arg20[%c0_119, %c0_120] : memref<16x32xbf16, #tpu.memory_space<vmem>>, vector<16x32xbf16>
    %235 = arith.truncf %233 : vector<1x16xf32> to vector<1x16xbf16>
    %cst_121 = arith.constant dense<0.000000e+00> : vector<1x32xf32>
    %236 = tpu.matmul %235, %234, %cst_121 {dimension_numbers = #tpu.dot_dimension_numbers<[1], [0], [0], [1], [0, 0, 1, 1], [], []>} : vector<1x16xbf16>, vector<16x32xbf16>, vector<1x32xf32> -> vector<1x32xf32>
    %c0_122 = arith.constant 0 : index
    %c0_123 = arith.constant 0 : index
    %237 = vector.load %arg21[%c0_122, %c0_123] : memref<1x32xf32, #tpu.memory_space<vmem>>, vector<1x32xf32>
    %238 = arith.addf %236, %237 : vector<1x32xf32>
    %c0_124 = arith.constant 0 : index
    %c0_125 = arith.constant 0 : index
    %239 = vector.load %arg23[%c0_124, %c0_125] : memref<1x32xf32, #tpu.memory_space<vmem>>, vector<1x32xf32>
    tpu.vector_store %arg23[%c0_124, %c0_125], %238 {strides = array<i32>} : memref<1x32xf32, #tpu.memory_space<vmem>>, vector<1x32xf32>,
    return
  }
  func.func @transform_0(%arg0: i32) -> (i32, i32) {
    %c0_i32 = arith.constant 0 : i32
    %c0_i32_0 = arith.constant 0 : i32
    %c0_i32_1 = arith.constant 0 : i32
    return %c0_i32, %c0_i32_0 : i32, i32
  }
  func.func @transform_1(%arg0: i32) -> (i32, i32) {
    %c0_i32 = arith.constant 0 : i32
    %c0_i32_0 = arith.constant 0 : i32
    %c0_i32_1 = arith.constant 0 : i32
    return %c0_i32, %c0_i32_0 : i32, i32
  }
  func.func @transform_2(%arg0: i32) -> (i32, i32) {
    %c0_i32 = arith.constant 0 : i32
    %c0_i32_0 = arith.constant 0 : i32
    %c0_i32_1 = arith.constant 0 : i32
    return %c0_i32, %c0_i32_0 : i32, i32
  }
  func.func @transform_3(%arg0: i32) -> (i32, i32) {
    %c0_i32 = arith.constant 0 : i32
    %c0_i32_0 = arith.constant 0 : i32
    %c0_i32_1 = arith.constant 0 : i32
    return %c0_i32, %c0_i32_0 : i32, i32
  }
  func.func @transform_4(%arg0: i32) -> (i32, i32) {
    %c0_i32 = arith.constant 0 : i32
    %c0_i32_0 = arith.constant 0 : i32
    %c0_i32_1 = arith.constant 0 : i32
    return %c0_i32, %c0_i32_0 : i32, i32
  }
  func.func @transform_5(%arg0: i32) -> (i32, i32) {
    %c0_i32 = arith.constant 0 : i32
    %c0_i32_0 = arith.constant 0 : i32
    %c0_i32_1 = arith.constant 0 : i32
    return %c0_i32, %c0_i32_0 : i32, i32
  }
  func.func @transform_6(%arg0: i32) -> (i32, i32) {
    %c0_i32 = arith.constant 0 : i32
    %c0_i32_0 = arith.constant 0 : i32
    %c0_i32_1 = arith.constant 0 : i32
    return %c0_i32, %c0_i32_0 : i32, i32
  }
  func.func @transform_7(%arg0: i32) -> (i32, i32) {
    %c0_i32 = arith.constant 0 : i32
    %c0_i32_0 = arith.constant 0 : i32
    %c0_i32_1 = arith.constant 0 : i32
    return %c0_i32, %c0_i32_0 : i32, i32
  }
  func.func @transform_8(%arg0: i32) -> (i32, i32) {
    %c0_i32 = arith.constant 0 : i32
    %c0_i32_0 = arith.constant 0 : i32
    %c0_i32_1 = arith.constant 0 : i32
    return %c0_i32, %c0_i32_0 : i32, i32
  }
  func.func @transform_9(%arg0: i32) -> (i32, i32) {
    %c0_i32 = arith.constant 0 : i32
    %c0_i32_0 = arith.constant 0 : i32
    %c0_i32_1 = arith.constant 0 : i32
    return %c0_i32, %c0_i32_0 : i32, i32
  }
  func.func @transform_10(%arg0: i32) -> (i32, i32) {
    %c0_i32 = arith.constant 0 : i32
    %c0_i32_0 = arith.constant 0 : i32
    %c0_i32_1 = arith.constant 0 : i32
    return %c0_i32, %c0_i32_0 : i32, i32
  }
  func.func @transform_11(%arg0: i32) -> (i32, i32) {
    %c0_i32 = arith.constant 0 : i32
    %c0_i32_0 = arith.constant 0 : i32
    %c0_i32_1 = arith.constant 0 : i32
    return %c0_i32, %c0_i32_0 : i32, i32
  }
  func.func @transform_12(%arg0: i32) -> (i32, i32) {
    %c0_i32 = arith.constant 0 : i32
    %c0_i32_0 = arith.constant 0 : i32
    %c0_i32_1 = arith.constant 0 : i32
    return %c0_i32, %c0_i32_0 : i32, i32
  }
  func.func @transform_13(%arg0: i32) -> (i32, i32) {
    %c0_i32 = arith.constant 0 : i32
    %c0_i32_0 = arith.constant 0 : i32
    %c0_i32_1 = arith.constant 0 : i32
    return %c0_i32, %c0_i32_0 : i32, i32
  }
  func.func @transform_14(%arg0: i32) -> (i32, i32) {
    %c0_i32 = arith.constant 0 : i32
    %c0_i32_0 = arith.constant 0 : i32
    %c0_i32_1 = arith.constant 0 : i32
    return %c0_i32, %c0_i32_0 : i32, i32
  }
  func.func @transform_15(%arg0: i32) -> (i32, i32) {
    %c0_i32 = arith.constant 0 : i32
    %c0_i32_0 = arith.constant 0 : i32
    %c0_i32_1 = arith.constant 0 : i32
    return %c0_i32, %c0_i32_0 : i32, i32
  }
  func.func @transform_16(%arg0: i32) -> (i32, i32) {
    %c0_i32 = arith.constant 0 : i32
    %c0_i32_0 = arith.constant 0 : i32
    %c0_i32_1 = arith.constant 0 : i32
    return %c0_i32, %c0_i32_0 : i32, i32
  }
  func.func @transform_17(%arg0: i32) -> (i32, i32) {
    %c0_i32 = arith.constant 0 : i32
    %c0_i32_0 = arith.constant 0 : i32
    %c0_i32_1 = arith.constant 0 : i32
    return %c0_i32, %c0_i32_0 : i32, i32
  }
  func.func @transform_18(%arg0: i32) -> (i32, i32) {
    %c0_i32 = arith.constant 0 : i32
    %c0_i32_0 = arith.constant 0 : i32
    %c0_i32_1 = arith.constant 0 : i32
    return %c0_i32, %c0_i32_0 : i32, i32
  }
  func.func @transform_19(%arg0: i32) -> (i32, i32) {
    %c0_i32 = arith.constant 0 : i32
    %c0_i32_0 = arith.constant 0 : i32
    %c0_i32_1 = arith.constant 0 : i32
    return %c0_i32, %c0_i32_0 : i32, i32
  }
  func.func @transform_20(%arg0: i32) -> (i32, i32) {
    %c0_i32 = arith.constant 0 : i32
    %c0_i32_0 = arith.constant 0 : i32
    %c0_i32_1 = arith.constant 0 : i32
    return %c0_i32, %c0_i32_0 : i32, i32
  }
  func.func @transform_21(%arg0: i32) -> (i32, i32) {
    %c0_i32 = arith.constant 0 : i32
    %c0_i32_0 = arith.constant 0 : i32
    %c0_i32_1 = arith.constant 0 : i32
    return %c0_i32, %c0_i32_0 : i32, i32
  }
  func.func @transform_22(%arg0: i32) -> (i32, i32) {
    %c0_i32 = arith.constant 0 : i32
    %c0_i32_0 = arith.constant 0 : i32
    %c0_i32_1 = arith.constant 0 : i32
    return %c0_i32, %c0_i32_0 : i32, i32
  }
}

module attributes {stable_mosaic.version = 11 : i64} {
  func.func @_vit_depth_kernel(%arg0: i32, %arg1: memref<8x64xf32, #tpu.memory_space<vmem>>, %arg2: memref<8x32xf32, #tpu.memory_space<vmem>>, %arg3: memref<1x32xf32, #tpu.memory_space<vmem>>, %arg4: memref<64x32xf32, #tpu.memory_space<vmem>>, %arg5: memref<1x32xf32, #tpu.memory_space<vmem>>, %arg6: memref<1x1x32xf32, #tpu.memory_space<vmem>>, %arg7: memref<1x1x32xf32, #tpu.memory_space<vmem>>, %arg8: memref<1x32x96xbf16, #tpu.memory_space<vmem>>, %arg9: memref<1x1x96xf32, #tpu.memory_space<vmem>>, %arg10: memref<1x32x32xbf16, #tpu.memory_space<vmem>>, %arg11: memref<1x1x32xf32, #tpu.memory_space<vmem>>, %arg12: memref<1x1x32xf32, #tpu.memory_space<vmem>>, %arg13: memref<1x1x32xf32, #tpu.memory_space<vmem>>, %arg14: memref<1x32x128xbf16, #tpu.memory_space<vmem>>, %arg15: memref<1x1x128xf32, #tpu.memory_space<vmem>>, %arg16: memref<1x128x32xbf16, #tpu.memory_space<vmem>>, %arg17: memref<1x1x32xf32, #tpu.memory_space<vmem>>, %arg18: memref<10x32xf32, #tpu.memory_space<vmem>>, %arg19: memref<40x8xf32, #tpu.memory_space<vmem>>, %arg20: memref<40x8xf32, #tpu.memory_space<vmem>>, %arg21: memref<40x8xf32, #tpu.memory_space<vmem>>, %arg22: memref<10x32xf32, #tpu.memory_space<vmem>>) attributes {dimension_semantics = [#tpu.dimension_semantics<arbitrary>], iteration_bounds = array<i64: 2>, scalar_prefetch = 0 : i64, scratch_operands = 4 : i64, tpu.core_type = #tpu.core_type<tc>, window_params = [{pipeline_mode = #tpu.pipeline_mode<synchronous>, transform_indices = @transform_0, window_bounds = array<i64: 8, 64>}, {pipeline_mode = #tpu.pipeline_mode<synchronous>, transform_indices = @transform_1, window_bounds = array<i64: 8, 32>}, {pipeline_mode = #tpu.pipeline_mode<synchronous>, transform_indices = @transform_2, window_bounds = array<i64: 1, 32>}, {pipeline_mode = #tpu.pipeline_mode<synchronous>, transform_indices = @transform_3, window_bounds = array<i64: 64, 32>}, {pipeline_mode = #tpu.pipeline_mode<synchronous>, transform_indices = @transform_4, window_bounds = array<i64: 1, 32>}, {transform_indices = @transform_5, window_bounds = array<i64: 1, 1, 32>}, {transform_indices = @transform_6, window_bounds = array<i64: 1, 1, 32>}, {transform_indices = @transform_7, window_bounds = array<i64: 1, 32, 96>}, {transform_indices = @transform_8, window_bounds = array<i64: 1, 1, 96>}, {transform_indices = @transform_9, window_bounds = array<i64: 1, 32, 32>}, {transform_indices = @transform_10, window_bounds = array<i64: 1, 1, 32>}, {transform_indices = @transform_11, window_bounds = array<i64: 1, 1, 32>}, {transform_indices = @transform_12, window_bounds = array<i64: 1, 1, 32>}, {transform_indices = @transform_13, window_bounds = array<i64: 1, 32, 128>}, {transform_indices = @transform_14, window_bounds = array<i64: 1, 1, 128>}, {transform_indices = @transform_15, window_bounds = array<i64: 1, 128, 32>}, {transform_indices = @transform_16, window_bounds = array<i64: 1, 1, 32>}, {pipeline_mode = #tpu.pipeline_mode<synchronous>, transform_indices = @transform_17, window_bounds = array<i64: 10, 32>}]} {
    %c0_i32 = arith.constant 0 : i32
    %0 = arith.cmpi eq, %arg0, %c0_i32 : i32
    %1 = arith.extui %0 : i1 to i32
    %c0_i32_0 = arith.constant 0 : i32
    %2 = arith.cmpi ne, %1, %c0_i32_0 : i32
    scf.if %2 {
      %c0_118 = arith.constant 0 : index
      %c0_119 = arith.constant 0 : index
      %243 = vector.load %arg1[%c0_118, %c0_119] : memref<8x64xf32, #tpu.memory_space<vmem>>, vector<8x64xf32>
      %c0_120 = arith.constant 0 : index
      %c0_121 = arith.constant 0 : index
      %244 = vector.load %arg4[%c0_120, %c0_121] : memref<64x32xf32, #tpu.memory_space<vmem>>, vector<64x32xf32>
      %245 = arith.truncf %243 : vector<8x64xf32> to vector<8x64xbf16>
      %246 = arith.truncf %244 : vector<64x32xf32> to vector<64x32xbf16>
      %cst_122 = arith.constant dense<0.000000e+00> : vector<8x32xf32>
      %247 = tpu.matmul %245, %246, %cst_122 {dimension_numbers = #tpu.dot_dimension_numbers<[1], [0], [0], [1], [0, 0, 1, 1], [], []>} : vector<8x64xbf16>, vector<64x32xbf16>, vector<8x32xf32> -> vector<8x32xf32>
      %c0_123 = arith.constant 0 : index
      %c0_124 = arith.constant 0 : index
      %248 = vector.load %arg5[%c0_123, %c0_124] : memref<1x32xf32, #tpu.memory_space<vmem>>, vector<1x32xf32>
      %249 = vector.broadcast %248 : vector<1x32xf32> to vector<8x32xf32>
      %250 = arith.addf %247, %249 : vector<8x32xf32>
      %c0_125 = arith.constant 0 : index
      %c0_126 = arith.constant 0 : index
      %251 = vector.load %arg2[%c0_125, %c0_126] : memref<8x32xf32, #tpu.memory_space<vmem>>, vector<8x32xf32>
      %252 = arith.addf %250, %251 : vector<8x32xf32>
      %c0_127 = arith.constant 0 : index
      %c0_128 = arith.constant 0 : index
      %253 = vector.load %arg3[%c0_127, %c0_128] : memref<1x32xf32, #tpu.memory_space<vmem>>, vector<1x32xf32>
      %c0_129 = arith.constant 0 : index
      %c0_130 = arith.constant 0 : index
      %254 = vector.load %arg18[%c0_129, %c0_130] : memref<10x32xf32, #tpu.memory_space<vmem>>, vector<1x32xf32>
      tpu.vector_store %arg18[%c0_129, %c0_130], %253 {strides = array<i32>} : memref<10x32xf32, #tpu.memory_space<vmem>>, vector<1x32xf32>,
      %255 = vector.extract_strided_slice %252 {offsets = [0, 0], sizes = [4, 32], strides = [1, 1]} : vector<8x32xf32> to vector<4x32xf32>
      %c1 = arith.constant 1 : index
      %c0_131 = arith.constant 0 : index
      %256 = vector.load %arg18[%c1, %c0_131] : memref<10x32xf32, #tpu.memory_space<vmem>>, vector<4x32xf32>
      tpu.vector_store %arg18[%c1, %c0_131], %255 {strides = array<i32>} : memref<10x32xf32, #tpu.memory_space<vmem>>, vector<4x32xf32>,
      %c0_132 = arith.constant 0 : index
      %c0_133 = arith.constant 0 : index
      %257 = vector.load %arg3[%c0_132, %c0_133] : memref<1x32xf32, #tpu.memory_space<vmem>>, vector<1x32xf32>
      %c5 = arith.constant 5 : index
      %c0_134 = arith.constant 0 : index
      %258 = vector.load %arg18[%c5, %c0_134] : memref<10x32xf32, #tpu.memory_space<vmem>>, vector<1x32xf32>
      tpu.vector_store %arg18[%c5, %c0_134], %257 {strides = array<i32>} : memref<10x32xf32, #tpu.memory_space<vmem>>, vector<1x32xf32>,
      %259 = vector.extract_strided_slice %252 {offsets = [4, 0], sizes = [4, 32], strides = [1, 1]} : vector<8x32xf32> to vector<4x32xf32>
      %c6 = arith.constant 6 : index
      %c0_135 = arith.constant 0 : index
      %260 = vector.load %arg18[%c6, %c0_135] : memref<10x32xf32, #tpu.memory_space<vmem>>, vector<4x32xf32>
      tpu.vector_store %arg18[%c6, %c0_135], %259 {strides = array<i32>} : memref<10x32xf32, #tpu.memory_space<vmem>>, vector<4x32xf32>,
    } else {
    }
    %c0 = arith.constant 0 : index
    %c0_1 = arith.constant 0 : index
    %3 = vector.load %arg18[%c0, %c0_1] : memref<10x32xf32, #tpu.memory_space<vmem>>, vector<10x32xf32>
    %c0_2 = arith.constant 0 : index
    %c0_3 = arith.constant 0 : index
    %c0_4 = arith.constant 0 : index
    %4 = vector.load %arg6[%c0_2, %c0_3, %c0_4] : memref<1x1x32xf32, #tpu.memory_space<vmem>>, vector<1x1x32xf32>
    %5 = vector.shape_cast %4 : vector<1x1x32xf32> to vector<1x32xf32>
    %c0_5 = arith.constant 0 : index
    %c0_6 = arith.constant 0 : index
    %c0_7 = arith.constant 0 : index
    %6 = vector.load %arg7[%c0_5, %c0_6, %c0_7] : memref<1x1x32xf32, #tpu.memory_space<vmem>>, vector<1x1x32xf32>
    %7 = vector.shape_cast %6 : vector<1x1x32xf32> to vector<1x32xf32>
    %cst = arith.constant dense<0.000000e+00> : vector<10xf32>
    %8 = vector.multi_reduction <add>, %3, %cst [1] : vector<10x32xf32> to vector<10xf32>
    %9 = vector.shape_cast %8 : vector<10xf32> to vector<10x1xf32>
    %cst_8 = arith.constant 3.200000e+01 : f32
    %10 = vector.broadcast %cst_8 : f32 to vector<10x1xf32>
    %11 = arith.divf %9, %10 : vector<10x1xf32>
    %12 = vector.broadcast %11 : vector<10x1xf32> to vector<10x32xf32>
    %13 = arith.subf %3, %12 : vector<10x32xf32>
    %14 = arith.mulf %13, %13 : vector<10x32xf32>
    %cst_9 = arith.constant dense<0.000000e+00> : vector<10xf32>
    %15 = vector.multi_reduction <add>, %14, %cst_9 [1] : vector<10x32xf32> to vector<10xf32>
    %16 = vector.shape_cast %15 : vector<10xf32> to vector<10x1xf32>
    %cst_10 = arith.constant 3.200000e+01 : f32
    %17 = vector.broadcast %cst_10 : f32 to vector<10x1xf32>
    %18 = arith.divf %16, %17 : vector<10x1xf32>
    %cst_11 = arith.constant 9.99999997E-7 : f32
    %19 = vector.broadcast %cst_11 : f32 to vector<10x1xf32>
    %20 = arith.addf %18, %19 : vector<10x1xf32>
    %21 = math.rsqrt %20 : vector<10x1xf32>
    %22 = vector.broadcast %21 : vector<10x1xf32> to vector<10x32xf32>
    %23 = arith.mulf %13, %22 : vector<10x32xf32>
    %24 = vector.broadcast %5 : vector<1x32xf32> to vector<10x32xf32>
    %25 = arith.mulf %23, %24 : vector<10x32xf32>
    %26 = vector.broadcast %7 : vector<1x32xf32> to vector<10x32xf32>
    %27 = arith.addf %25, %26 : vector<10x32xf32>
    %c0_12 = arith.constant 0 : index
    %c0_13 = arith.constant 0 : index
    %c0_14 = arith.constant 0 : index
    %28 = vector.load %arg8[%c0_12, %c0_13, %c0_14] : memref<1x32x96xbf16, #tpu.memory_space<vmem>>, vector<1x32x96xbf16>
    %29 = vector.shape_cast %28 : vector<1x32x96xbf16> to vector<32x96xbf16>
    %30 = arith.truncf %27 : vector<10x32xf32> to vector<10x32xbf16>
    %cst_15 = arith.constant dense<0.000000e+00> : vector<10x96xf32>
    %31 = tpu.matmul %30, %29, %cst_15 {dimension_numbers = #tpu.dot_dimension_numbers<[1], [0], [0], [1], [0, 0, 1, 1], [], []>} : vector<10x32xbf16>, vector<32x96xbf16>, vector<10x96xf32> -> vector<10x96xf32>
    %c0_16 = arith.constant 0 : index
    %c0_17 = arith.constant 0 : index
    %c0_18 = arith.constant 0 : index
    %32 = vector.load %arg9[%c0_16, %c0_17, %c0_18] : memref<1x1x96xf32, #tpu.memory_space<vmem>>, vector<1x1x96xf32>
    %33 = vector.shape_cast %32 : vector<1x1x96xf32> to vector<1x96xf32>
    %34 = vector.broadcast %33 : vector<1x96xf32> to vector<10x96xf32>
    %35 = arith.addf %31, %34 : vector<10x96xf32>
    %36 = vector.extract_strided_slice %35 {offsets = [0, 0], sizes = [10, 8], strides = [1, 1]} : vector<10x96xf32> to vector<10x8xf32>
    %c0_19 = arith.constant 0 : index
    %c0_20 = arith.constant 0 : index
    %37 = vector.load %arg19[%c0_19, %c0_20] : memref<40x8xf32, #tpu.memory_space<vmem>>, vector<10x8xf32>
    tpu.vector_store %arg19[%c0_19, %c0_20], %36 {strides = array<i32>} : memref<40x8xf32, #tpu.memory_space<vmem>>, vector<10x8xf32>,
    %38 = vector.extract_strided_slice %35 {offsets = [0, 8], sizes = [10, 8], strides = [1, 1]} : vector<10x96xf32> to vector<10x8xf32>
    %c10 = arith.constant 10 : index
    %c0_21 = arith.constant 0 : index
    %39 = vector.load %arg19[%c10, %c0_21] : memref<40x8xf32, #tpu.memory_space<vmem>>, vector<10x8xf32>
    tpu.vector_store %arg19[%c10, %c0_21], %38 {strides = array<i32>} : memref<40x8xf32, #tpu.memory_space<vmem>>, vector<10x8xf32>,
    %40 = vector.extract_strided_slice %35 {offsets = [0, 16], sizes = [10, 8], strides = [1, 1]} : vector<10x96xf32> to vector<10x8xf32>
    %c20 = arith.constant 20 : index
    %c0_22 = arith.constant 0 : index
    %41 = vector.load %arg19[%c20, %c0_22] : memref<40x8xf32, #tpu.memory_space<vmem>>, vector<10x8xf32>
    tpu.vector_store %arg19[%c20, %c0_22], %40 {strides = array<i32>} : memref<40x8xf32, #tpu.memory_space<vmem>>, vector<10x8xf32>,
    %42 = vector.extract_strided_slice %35 {offsets = [0, 24], sizes = [10, 8], strides = [1, 1]} : vector<10x96xf32> to vector<10x8xf32>
    %c30 = arith.constant 30 : index
    %c0_23 = arith.constant 0 : index
    %43 = vector.load %arg19[%c30, %c0_23] : memref<40x8xf32, #tpu.memory_space<vmem>>, vector<10x8xf32>
    tpu.vector_store %arg19[%c30, %c0_23], %42 {strides = array<i32>} : memref<40x8xf32, #tpu.memory_space<vmem>>, vector<10x8xf32>,
    %44 = vector.extract_strided_slice %35 {offsets = [0, 32], sizes = [10, 8], strides = [1, 1]} : vector<10x96xf32> to vector<10x8xf32>
    %c0_24 = arith.constant 0 : index
    %c0_25 = arith.constant 0 : index
    %45 = vector.load %arg20[%c0_24, %c0_25] : memref<40x8xf32, #tpu.memory_space<vmem>>, vector<10x8xf32>
    tpu.vector_store %arg20[%c0_24, %c0_25], %44 {strides = array<i32>} : memref<40x8xf32, #tpu.memory_space<vmem>>, vector<10x8xf32>,
    %46 = vector.extract_strided_slice %35 {offsets = [0, 40], sizes = [10, 8], strides = [1, 1]} : vector<10x96xf32> to vector<10x8xf32>
    %c10_26 = arith.constant 10 : index
    %c0_27 = arith.constant 0 : index
    %47 = vector.load %arg20[%c10_26, %c0_27] : memref<40x8xf32, #tpu.memory_space<vmem>>, vector<10x8xf32>
    tpu.vector_store %arg20[%c10_26, %c0_27], %46 {strides = array<i32>} : memref<40x8xf32, #tpu.memory_space<vmem>>, vector<10x8xf32>,
    %48 = vector.extract_strided_slice %35 {offsets = [0, 48], sizes = [10, 8], strides = [1, 1]} : vector<10x96xf32> to vector<10x8xf32>
    %c20_28 = arith.constant 20 : index
    %c0_29 = arith.constant 0 : index
    %49 = vector.load %arg20[%c20_28, %c0_29] : memref<40x8xf32, #tpu.memory_space<vmem>>, vector<10x8xf32>
    tpu.vector_store %arg20[%c20_28, %c0_29], %48 {strides = array<i32>} : memref<40x8xf32, #tpu.memory_space<vmem>>, vector<10x8xf32>,
    %50 = vector.extract_strided_slice %35 {offsets = [0, 56], sizes = [10, 8], strides = [1, 1]} : vector<10x96xf32> to vector<10x8xf32>
    %c30_30 = arith.constant 30 : index
    %c0_31 = arith.constant 0 : index
    %51 = vector.load %arg20[%c30_30, %c0_31] : memref<40x8xf32, #tpu.memory_space<vmem>>, vector<10x8xf32>
    tpu.vector_store %arg20[%c30_30, %c0_31], %50 {strides = array<i32>} : memref<40x8xf32, #tpu.memory_space<vmem>>, vector<10x8xf32>,
    %52 = vector.extract_strided_slice %35 {offsets = [0, 64], sizes = [10, 8], strides = [1, 1]} : vector<10x96xf32> to vector<10x8xf32>
    %c0_32 = arith.constant 0 : index
    %c0_33 = arith.constant 0 : index
    %53 = vector.load %arg21[%c0_32, %c0_33] : memref<40x8xf32, #tpu.memory_space<vmem>>, vector<10x8xf32>
    tpu.vector_store %arg21[%c0_32, %c0_33], %52 {strides = array<i32>} : memref<40x8xf32, #tpu.memory_space<vmem>>, vector<10x8xf32>,
    %54 = vector.extract_strided_slice %35 {offsets = [0, 72], sizes = [10, 8], strides = [1, 1]} : vector<10x96xf32> to vector<10x8xf32>
    %c10_34 = arith.constant 10 : index
    %c0_35 = arith.constant 0 : index
    %55 = vector.load %arg21[%c10_34, %c0_35] : memref<40x8xf32, #tpu.memory_space<vmem>>, vector<10x8xf32>
    tpu.vector_store %arg21[%c10_34, %c0_35], %54 {strides = array<i32>} : memref<40x8xf32, #tpu.memory_space<vmem>>, vector<10x8xf32>,
    %56 = vector.extract_strided_slice %35 {offsets = [0, 80], sizes = [10, 8], strides = [1, 1]} : vector<10x96xf32> to vector<10x8xf32>
    %c20_36 = arith.constant 20 : index
    %c0_37 = arith.constant 0 : index
    %57 = vector.load %arg21[%c20_36, %c0_37] : memref<40x8xf32, #tpu.memory_space<vmem>>, vector<10x8xf32>
    tpu.vector_store %arg21[%c20_36, %c0_37], %56 {strides = array<i32>} : memref<40x8xf32, #tpu.memory_space<vmem>>, vector<10x8xf32>,
    %58 = vector.extract_strided_slice %35 {offsets = [0, 88], sizes = [10, 8], strides = [1, 1]} : vector<10x96xf32> to vector<10x8xf32>
    %c30_38 = arith.constant 30 : index
    %c0_39 = arith.constant 0 : index
    %59 = vector.load %arg21[%c30_38, %c0_39] : memref<40x8xf32, #tpu.memory_space<vmem>>, vector<10x8xf32>
    tpu.vector_store %arg21[%c30_38, %c0_39], %58 {strides = array<i32>} : memref<40x8xf32, #tpu.memory_space<vmem>>, vector<10x8xf32>,
    %c0_40 = arith.constant 0 : index
    %c0_41 = arith.constant 0 : index
    %60 = vector.load %arg19[%c0_40, %c0_41] : memref<40x8xf32, #tpu.memory_space<vmem>>, vector<40x8xf32>
    %c0_42 = arith.constant 0 : index
    %c0_43 = arith.constant 0 : index
    %61 = vector.load %arg20[%c0_42, %c0_43] : memref<40x8xf32, #tpu.memory_space<vmem>>, vector<40x8xf32>
    %c0_44 = arith.constant 0 : index
    %c0_45 = arith.constant 0 : index
    %62 = vector.load %arg21[%c0_44, %c0_45] : memref<40x8xf32, #tpu.memory_space<vmem>>, vector<40x8xf32>
    %cst_46 = arith.constant dense<0.000000e+00> : vector<40x40xf32>
    %63 = tpu.matmul %60, %61, %cst_46 {dimension_numbers = #tpu.dot_dimension_numbers<[1], [1], [0], [0], [0, 0, 1, 0], [], []>} : vector<40x8xf32>, vector<40x8xf32>, vector<40x40xf32> -> vector<40x40xf32>
    %cst_47 = arith.constant 0.353553385 : f32
    %64 = vector.broadcast %cst_47 : f32 to vector<40x40xf32>
    %65 = arith.mulf %63, %64 : vector<40x40xf32>
    %66 = tpu.iota {dimensions = array<i32: 0>} : vector<40x1xi32>
    %67 = tpu.iota {dimensions = array<i32: 1>} : vector<1x40xi32>
    %c0_i32_48 = arith.constant 0 : i32
    %68 = vector.broadcast %c0_i32_48 : i32 to vector<40x1xi32>
    %c0_i32_49 = arith.constant 0 : i32
    %69 = vector.broadcast %c0_i32_49 : i32 to vector<1x40xi32>
    %c5_i32 = arith.constant 5 : i32
    %70 = vector.broadcast %c5_i32 : i32 to vector<40x1xi32>
    %71 = arith.cmpi sge, %66, %70 : vector<40x1xi32>
    %72 = arith.extui %71 : vector<40x1xi1> to vector<40x1xi32>
    %73 = arith.addi %68, %72 : vector<40x1xi32>
    %c5_i32_50 = arith.constant 5 : i32
    %74 = vector.broadcast %c5_i32_50 : i32 to vector<1x40xi32>
    %75 = arith.cmpi sge, %67, %74 : vector<1x40xi32>
    %76 = arith.extui %75 : vector<1x40xi1> to vector<1x40xi32>
    %77 = arith.addi %69, %76 : vector<1x40xi32>
    %c10_i32 = arith.constant 10 : i32
    %78 = vector.broadcast %c10_i32 : i32 to vector<40x1xi32>
    %79 = arith.cmpi sge, %66, %78 : vector<40x1xi32>
    %80 = arith.extui %79 : vector<40x1xi1> to vector<40x1xi32>
    %81 = arith.addi %73, %80 : vector<40x1xi32>
    %c10_i32_51 = arith.constant 10 : i32
    %82 = vector.broadcast %c10_i32_51 : i32 to vector<1x40xi32>
    %83 = arith.cmpi sge, %67, %82 : vector<1x40xi32>
    %84 = arith.extui %83 : vector<1x40xi1> to vector<1x40xi32>
    %85 = arith.addi %77, %84 : vector<1x40xi32>
    %c15_i32 = arith.constant 15 : i32
    %86 = vector.broadcast %c15_i32 : i32 to vector<40x1xi32>
    %87 = arith.cmpi sge, %66, %86 : vector<40x1xi32>
    %88 = arith.extui %87 : vector<40x1xi1> to vector<40x1xi32>
    %89 = arith.addi %81, %88 : vector<40x1xi32>
    %c15_i32_52 = arith.constant 15 : i32
    %90 = vector.broadcast %c15_i32_52 : i32 to vector<1x40xi32>
    %91 = arith.cmpi sge, %67, %90 : vector<1x40xi32>
    %92 = arith.extui %91 : vector<1x40xi1> to vector<1x40xi32>
    %93 = arith.addi %85, %92 : vector<1x40xi32>
    %c20_i32 = arith.constant 20 : i32
    %94 = vector.broadcast %c20_i32 : i32 to vector<40x1xi32>
    %95 = arith.cmpi sge, %66, %94 : vector<40x1xi32>
    %96 = arith.extui %95 : vector<40x1xi1> to vector<40x1xi32>
    %97 = arith.addi %89, %96 : vector<40x1xi32>
    %c20_i32_53 = arith.constant 20 : i32
    %98 = vector.broadcast %c20_i32_53 : i32 to vector<1x40xi32>
    %99 = arith.cmpi sge, %67, %98 : vector<1x40xi32>
    %100 = arith.extui %99 : vector<1x40xi1> to vector<1x40xi32>
    %101 = arith.addi %93, %100 : vector<1x40xi32>
    %c25_i32 = arith.constant 25 : i32
    %102 = vector.broadcast %c25_i32 : i32 to vector<40x1xi32>
    %103 = arith.cmpi sge, %66, %102 : vector<40x1xi32>
    %104 = arith.extui %103 : vector<40x1xi1> to vector<40x1xi32>
    %105 = arith.addi %97, %104 : vector<40x1xi32>
    %c25_i32_54 = arith.constant 25 : i32
    %106 = vector.broadcast %c25_i32_54 : i32 to vector<1x40xi32>
    %107 = arith.cmpi sge, %67, %106 : vector<1x40xi32>
    %108 = arith.extui %107 : vector<1x40xi1> to vector<1x40xi32>
    %109 = arith.addi %101, %108 : vector<1x40xi32>
    %c30_i32 = arith.constant 30 : i32
    %110 = vector.broadcast %c30_i32 : i32 to vector<40x1xi32>
    %111 = arith.cmpi sge, %66, %110 : vector<40x1xi32>
    %112 = arith.extui %111 : vector<40x1xi1> to vector<40x1xi32>
    %113 = arith.addi %105, %112 : vector<40x1xi32>
    %c30_i32_55 = arith.constant 30 : i32
    %114 = vector.broadcast %c30_i32_55 : i32 to vector<1x40xi32>
    %115 = arith.cmpi sge, %67, %114 : vector<1x40xi32>
    %116 = arith.extui %115 : vector<1x40xi1> to vector<1x40xi32>
    %117 = arith.addi %109, %116 : vector<1x40xi32>
    %c35_i32 = arith.constant 35 : i32
    %118 = vector.broadcast %c35_i32 : i32 to vector<40x1xi32>
    %119 = arith.cmpi sge, %66, %118 : vector<40x1xi32>
    %120 = arith.extui %119 : vector<40x1xi1> to vector<40x1xi32>
    %121 = arith.addi %113, %120 : vector<40x1xi32>
    %c35_i32_56 = arith.constant 35 : i32
    %122 = vector.broadcast %c35_i32_56 : i32 to vector<1x40xi32>
    %123 = arith.cmpi sge, %67, %122 : vector<1x40xi32>
    %124 = arith.extui %123 : vector<1x40xi1> to vector<1x40xi32>
    %125 = arith.addi %117, %124 : vector<1x40xi32>
    %126 = vector.broadcast %121 : vector<40x1xi32> to vector<40x40xi32>
    %127 = vector.broadcast %125 : vector<1x40xi32> to vector<40x40xi32>
    %128 = arith.cmpi eq, %126, %127 : vector<40x40xi32>
    %cst_57 = arith.constant -1.000000e+30 : f32
    %129 = vector.broadcast %cst_57 : f32 to vector<40x40xf32>
    %130 = arith.select %128, %65, %129 : vector<40x40xi1>, vector<40x40xf32>
    %cst_58 = arith.constant dense<0xFF800000> : vector<40xf32>
    %131 = vector.multi_reduction <maximumf>, %130, %cst_58 [1] : vector<40x40xf32> to vector<40xf32>
    %132 = vector.shape_cast %131 : vector<40xf32> to vector<40x1xf32>
    %133 = vector.broadcast %132 : vector<40x1xf32> to vector<40x40xf32>
    %134 = arith.subf %130, %133 : vector<40x40xf32>
    %135 = math.exp %134 : vector<40x40xf32>
    %cst_59 = arith.constant dense<0.000000e+00> : vector<40xf32>
    %136 = vector.multi_reduction <add>, %135, %cst_59 [1] : vector<40x40xf32> to vector<40xf32>
    %137 = vector.shape_cast %136 : vector<40xf32> to vector<40x1xf32>
    %138 = tpu.reciprocal %137 {approx = true} : vector<40x1xf32> -> vector<40x1xf32>
    %139 = vector.broadcast %138 : vector<40x1xf32> to vector<40x40xf32>
    %140 = arith.mulf %135, %139 : vector<40x40xf32>
    %cst_60 = arith.constant dense<0.000000e+00> : vector<40x8xf32>
    %141 = tpu.matmul %140, %62, %cst_60 {dimension_numbers = #tpu.dot_dimension_numbers<[1], [0], [0], [1], [0, 0, 1, 1], [], []>} : vector<40x40xf32>, vector<40x8xf32>, vector<40x8xf32> -> vector<40x8xf32>
    %142 = vector.extract_strided_slice %141 {offsets = [0, 0], sizes = [10, 8], strides = [1, 1]} : vector<40x8xf32> to vector<10x8xf32>
    %c0_61 = arith.constant 0 : index
    %c0_62 = arith.constant 0 : index
    %143 = vector.load %arg22[%c0_61, %c0_62] : memref<10x32xf32, #tpu.memory_space<vmem>>, vector<10x8xf32>
    tpu.vector_store %arg22[%c0_61, %c0_62], %142 {strides = array<i32>} : memref<10x32xf32, #tpu.memory_space<vmem>>, vector<10x8xf32>,
    %144 = vector.extract_strided_slice %141 {offsets = [10, 0], sizes = [10, 8], strides = [1, 1]} : vector<40x8xf32> to vector<10x8xf32>
    %c0_63 = arith.constant 0 : index
    %c8 = arith.constant 8 : index
    %145 = vector.load %arg22[%c0_63, %c8] : memref<10x32xf32, #tpu.memory_space<vmem>>, vector<10x8xf32>
    tpu.vector_store %arg22[%c0_63, %c8], %144 {strides = array<i32>} : memref<10x32xf32, #tpu.memory_space<vmem>>, vector<10x8xf32>,
    %146 = vector.extract_strided_slice %141 {offsets = [20, 0], sizes = [10, 8], strides = [1, 1]} : vector<40x8xf32> to vector<10x8xf32>
    %c0_64 = arith.constant 0 : index
    %c16 = arith.constant 16 : index
    %147 = vector.load %arg22[%c0_64, %c16] : memref<10x32xf32, #tpu.memory_space<vmem>>, vector<10x8xf32>
    tpu.vector_store %arg22[%c0_64, %c16], %146 {strides = array<i32>} : memref<10x32xf32, #tpu.memory_space<vmem>>, vector<10x8xf32>,
    %148 = vector.extract_strided_slice %141 {offsets = [30, 0], sizes = [10, 8], strides = [1, 1]} : vector<40x8xf32> to vector<10x8xf32>
    %c0_65 = arith.constant 0 : index
    %c24 = arith.constant 24 : index
    %149 = vector.load %arg22[%c0_65, %c24] : memref<10x32xf32, #tpu.memory_space<vmem>>, vector<10x8xf32>
    tpu.vector_store %arg22[%c0_65, %c24], %148 {strides = array<i32>} : memref<10x32xf32, #tpu.memory_space<vmem>>, vector<10x8xf32>,
    %c0_66 = arith.constant 0 : index
    %c0_67 = arith.constant 0 : index
    %150 = vector.load %arg22[%c0_66, %c0_67] : memref<10x32xf32, #tpu.memory_space<vmem>>, vector<10x32xf32>
    %c0_68 = arith.constant 0 : index
    %c0_69 = arith.constant 0 : index
    %c0_70 = arith.constant 0 : index
    %151 = vector.load %arg10[%c0_68, %c0_69, %c0_70] : memref<1x32x32xbf16, #tpu.memory_space<vmem>>, vector<1x32x32xbf16>
    %152 = vector.shape_cast %151 : vector<1x32x32xbf16> to vector<32x32xbf16>
    %153 = arith.truncf %150 : vector<10x32xf32> to vector<10x32xbf16>
    %cst_71 = arith.constant dense<0.000000e+00> : vector<10x32xf32>
    %154 = tpu.matmul %153, %152, %cst_71 {dimension_numbers = #tpu.dot_dimension_numbers<[1], [0], [0], [1], [0, 0, 1, 1], [], []>} : vector<10x32xbf16>, vector<32x32xbf16>, vector<10x32xf32> -> vector<10x32xf32>
    %155 = arith.addf %3, %154 : vector<10x32xf32>
    %c0_72 = arith.constant 0 : index
    %c0_73 = arith.constant 0 : index
    %c0_74 = arith.constant 0 : index
    %156 = vector.load %arg11[%c0_72, %c0_73, %c0_74] : memref<1x1x32xf32, #tpu.memory_space<vmem>>, vector<1x1x32xf32>
    %157 = vector.shape_cast %156 : vector<1x1x32xf32> to vector<1x32xf32>
    %158 = vector.broadcast %157 : vector<1x32xf32> to vector<10x32xf32>
    %159 = arith.addf %155, %158 : vector<10x32xf32>
    %c0_75 = arith.constant 0 : index
    %c0_76 = arith.constant 0 : index
    %c0_77 = arith.constant 0 : index
    %160 = vector.load %arg12[%c0_75, %c0_76, %c0_77] : memref<1x1x32xf32, #tpu.memory_space<vmem>>, vector<1x1x32xf32>
    %161 = vector.shape_cast %160 : vector<1x1x32xf32> to vector<1x32xf32>
    %c0_78 = arith.constant 0 : index
    %c0_79 = arith.constant 0 : index
    %c0_80 = arith.constant 0 : index
    %162 = vector.load %arg13[%c0_78, %c0_79, %c0_80] : memref<1x1x32xf32, #tpu.memory_space<vmem>>, vector<1x1x32xf32>
    %163 = vector.shape_cast %162 : vector<1x1x32xf32> to vector<1x32xf32>
    %cst_81 = arith.constant dense<0.000000e+00> : vector<10xf32>
    %164 = vector.multi_reduction <add>, %159, %cst_81 [1] : vector<10x32xf32> to vector<10xf32>
    %165 = vector.shape_cast %164 : vector<10xf32> to vector<10x1xf32>
    %cst_82 = arith.constant 3.200000e+01 : f32
    %166 = vector.broadcast %cst_82 : f32 to vector<10x1xf32>
    %167 = arith.divf %165, %166 : vector<10x1xf32>
    %168 = vector.broadcast %167 : vector<10x1xf32> to vector<10x32xf32>
    %169 = arith.subf %159, %168 : vector<10x32xf32>
    %170 = arith.mulf %169, %169 : vector<10x32xf32>
    %cst_83 = arith.constant dense<0.000000e+00> : vector<10xf32>
    %171 = vector.multi_reduction <add>, %170, %cst_83 [1] : vector<10x32xf32> to vector<10xf32>
    %172 = vector.shape_cast %171 : vector<10xf32> to vector<10x1xf32>
    %cst_84 = arith.constant 3.200000e+01 : f32
    %173 = vector.broadcast %cst_84 : f32 to vector<10x1xf32>
    %174 = arith.divf %172, %173 : vector<10x1xf32>
    %cst_85 = arith.constant 9.99999997E-7 : f32
    %175 = vector.broadcast %cst_85 : f32 to vector<10x1xf32>
    %176 = arith.addf %174, %175 : vector<10x1xf32>
    %177 = math.rsqrt %176 : vector<10x1xf32>
    %178 = vector.broadcast %177 : vector<10x1xf32> to vector<10x32xf32>
    %179 = arith.mulf %169, %178 : vector<10x32xf32>
    %180 = vector.broadcast %161 : vector<1x32xf32> to vector<10x32xf32>
    %181 = arith.mulf %179, %180 : vector<10x32xf32>
    %182 = vector.broadcast %163 : vector<1x32xf32> to vector<10x32xf32>
    %183 = arith.addf %181, %182 : vector<10x32xf32>
    %c0_86 = arith.constant 0 : index
    %c0_87 = arith.constant 0 : index
    %c0_88 = arith.constant 0 : index
    %184 = vector.load %arg14[%c0_86, %c0_87, %c0_88] : memref<1x32x128xbf16, #tpu.memory_space<vmem>>, vector<1x32x128xbf16>
    %185 = vector.shape_cast %184 : vector<1x32x128xbf16> to vector<32x128xbf16>
    %186 = arith.truncf %183 : vector<10x32xf32> to vector<10x32xbf16>
    %cst_89 = arith.constant dense<0.000000e+00> : vector<10x128xf32>
    %187 = tpu.matmul %186, %185, %cst_89 {dimension_numbers = #tpu.dot_dimension_numbers<[1], [0], [0], [1], [0, 0, 1, 1], [], []>} : vector<10x32xbf16>, vector<32x128xbf16>, vector<10x128xf32> -> vector<10x128xf32>
    %c0_90 = arith.constant 0 : index
    %c0_91 = arith.constant 0 : index
    %c0_92 = arith.constant 0 : index
    %188 = vector.load %arg15[%c0_90, %c0_91, %c0_92] : memref<1x1x128xf32, #tpu.memory_space<vmem>>, vector<1x1x128xf32>
    %189 = vector.shape_cast %188 : vector<1x1x128xf32> to vector<1x128xf32>
    %190 = vector.broadcast %189 : vector<1x128xf32> to vector<10x128xf32>
    %191 = arith.addf %187, %190 : vector<10x128xf32>
    %cst_93 = arith.constant 5.000000e-01 : f32
    %192 = vector.broadcast %cst_93 : f32 to vector<10x128xf32>
    %193 = arith.mulf %192, %191 : vector<10x128xf32>
    %cst_94 = arith.constant 0.707106769 : f32
    %194 = vector.broadcast %cst_94 : f32 to vector<10x128xf32>
    %195 = arith.mulf %191, %194 : vector<10x128xf32>
    %cst_95 = arith.constant 0.000000e+00 : f32
    %196 = vector.broadcast %cst_95 : f32 to vector<10x128xf32>
    %197 = arith.cmpf olt, %195, %196 : vector<10x128xf32>
    %cst_96 = arith.constant -1.000000e+00 : f32
    %cst_97 = arith.constant 1.000000e+00 : f32
    %198 = vector.broadcast %cst_96 : f32 to vector<10x128xf32>
    %199 = vector.broadcast %cst_97 : f32 to vector<10x128xf32>
    %200 = arith.select %197, %198, %199 : vector<10x128xi1>, vector<10x128xf32>
    %201 = math.absf %195 : vector<10x128xf32>
    %cst_98 = arith.constant 0.327591091 : f32
    %202 = vector.broadcast %cst_98 : f32 to vector<10x128xf32>
    %203 = arith.mulf %202, %201 : vector<10x128xf32>
    %cst_99 = arith.constant 1.000000e+00 : f32
    %204 = vector.broadcast %cst_99 : f32 to vector<10x128xf32>
    %205 = arith.addf %204, %203 : vector<10x128xf32>
    %cst_100 = arith.constant 1.000000e+00 : f32
    %206 = vector.broadcast %cst_100 : f32 to vector<10x128xf32>
    %207 = arith.divf %206, %205 : vector<10x128xf32>
    %cst_101 = arith.constant 1.06140542 : f32
    %208 = vector.broadcast %cst_101 : f32 to vector<10x128xf32>
    %209 = arith.mulf %208, %207 : vector<10x128xf32>
    %cst_102 = arith.constant -1.45315206 : f32
    %210 = vector.broadcast %cst_102 : f32 to vector<10x128xf32>
    %211 = arith.addf %209, %210 : vector<10x128xf32>
    %212 = arith.mulf %211, %207 : vector<10x128xf32>
    %cst_103 = arith.constant 1.42141378 : f32
    %213 = vector.broadcast %cst_103 : f32 to vector<10x128xf32>
    %214 = arith.addf %212, %213 : vector<10x128xf32>
    %215 = arith.mulf %214, %207 : vector<10x128xf32>
    %cst_104 = arith.constant -0.284496725 : f32
    %216 = vector.broadcast %cst_104 : f32 to vector<10x128xf32>
    %217 = arith.addf %215, %216 : vector<10x128xf32>
    %218 = arith.mulf %217, %207 : vector<10x128xf32>
    %cst_105 = arith.constant 0.254829586 : f32
    %219 = vector.broadcast %cst_105 : f32 to vector<10x128xf32>
    %220 = arith.addf %218, %219 : vector<10x128xf32>
    %221 = arith.mulf %220, %207 : vector<10x128xf32>
    %cst_106 = arith.constant 0.000000e+00 : f32
    %222 = vector.broadcast %cst_106 : f32 to vector<10x128xf32>
    %223 = arith.subf %222, %201 : vector<10x128xf32>
    %224 = arith.mulf %223, %201 : vector<10x128xf32>
    %225 = math.exp %224 : vector<10x128xf32>
    %226 = arith.mulf %221, %225 : vector<10x128xf32>
    %cst_107 = arith.constant 1.000000e+00 : f32
    %227 = vector.broadcast %cst_107 : f32 to vector<10x128xf32>
    %228 = arith.subf %227, %226 : vector<10x128xf32>
    %229 = arith.mulf %200, %228 : vector<10x128xf32>
    %cst_108 = arith.constant 1.000000e+00 : f32
    %230 = vector.broadcast %cst_108 : f32 to vector<10x128xf32>
    %231 = arith.addf %230, %229 : vector<10x128xf32>
    %232 = arith.mulf %193, %231 : vector<10x128xf32>
    %c0_109 = arith.constant 0 : index
    %c0_110 = arith.constant 0 : index
    %c0_111 = arith.constant 0 : index
    %233 = vector.load %arg16[%c0_109, %c0_110, %c0_111] : memref<1x128x32xbf16, #tpu.memory_space<vmem>>, vector<1x128x32xbf16>
    %234 = vector.shape_cast %233 : vector<1x128x32xbf16> to vector<128x32xbf16>
    %235 = arith.truncf %232 : vector<10x128xf32> to vector<10x128xbf16>
    %cst_112 = arith.constant dense<0.000000e+00> : vector<10x32xf32>
    %236 = tpu.matmul %235, %234, %cst_112 {dimension_numbers = #tpu.dot_dimension_numbers<[1], [0], [0], [1], [0, 0, 1, 1], [], []>} : vector<10x128xbf16>, vector<128x32xbf16>, vector<10x32xf32> -> vector<10x32xf32>
    %237 = arith.addf %159, %236 : vector<10x32xf32>
    %c0_113 = arith.constant 0 : index
    %c0_114 = arith.constant 0 : index
    %c0_115 = arith.constant 0 : index
    %238 = vector.load %arg17[%c0_113, %c0_114, %c0_115] : memref<1x1x32xf32, #tpu.memory_space<vmem>>, vector<1x1x32xf32>
    %239 = vector.shape_cast %238 : vector<1x1x32xf32> to vector<1x32xf32>
    %240 = vector.broadcast %239 : vector<1x32xf32> to vector<10x32xf32>
    %241 = arith.addf %237, %240 : vector<10x32xf32>
    %c0_116 = arith.constant 0 : index
    %c0_117 = arith.constant 0 : index
    %242 = vector.load %arg18[%c0_116, %c0_117] : memref<10x32xf32, #tpu.memory_space<vmem>>, vector<10x32xf32>
    tpu.vector_store %arg18[%c0_116, %c0_117], %241 {strides = array<i32>} : memref<10x32xf32, #tpu.memory_space<vmem>>, vector<10x32xf32>,
    return
  }
  func.func @transform_0(%arg0: i32) -> (i32, i32) {
    %c0_i32 = arith.constant 0 : i32
    %c0_i32_0 = arith.constant 0 : i32
    %c0_i32_1 = arith.constant 0 : i32
    return %c0_i32, %c0_i32_0 : i32, i32
  }
  func.func @transform_1(%arg0: i32) -> (i32, i32) {
    %c0_i32 = arith.constant 0 : i32
    %c0_i32_0 = arith.constant 0 : i32
    %c0_i32_1 = arith.constant 0 : i32
    return %c0_i32, %c0_i32_0 : i32, i32
  }
  func.func @transform_2(%arg0: i32) -> (i32, i32) {
    %c0_i32 = arith.constant 0 : i32
    %c0_i32_0 = arith.constant 0 : i32
    %c0_i32_1 = arith.constant 0 : i32
    return %c0_i32, %c0_i32_0 : i32, i32
  }
  func.func @transform_3(%arg0: i32) -> (i32, i32) {
    %c0_i32 = arith.constant 0 : i32
    %c0_i32_0 = arith.constant 0 : i32
    %c0_i32_1 = arith.constant 0 : i32
    return %c0_i32, %c0_i32_0 : i32, i32
  }
  func.func @transform_4(%arg0: i32) -> (i32, i32) {
    %c0_i32 = arith.constant 0 : i32
    %c0_i32_0 = arith.constant 0 : i32
    %c0_i32_1 = arith.constant 0 : i32
    return %c0_i32, %c0_i32_0 : i32, i32
  }
  func.func @transform_5(%arg0: i32) -> (i32, i32, i32) {
    %c0_i32 = arith.constant 0 : i32
    %c0_i32_0 = arith.constant 0 : i32
    %c0_i32_1 = arith.constant 0 : i32
    return %arg0, %c0_i32, %c0_i32_0 : i32, i32, i32
  }
  func.func @transform_6(%arg0: i32) -> (i32, i32, i32) {
    %c0_i32 = arith.constant 0 : i32
    %c0_i32_0 = arith.constant 0 : i32
    %c0_i32_1 = arith.constant 0 : i32
    return %arg0, %c0_i32, %c0_i32_0 : i32, i32, i32
  }
  func.func @transform_7(%arg0: i32) -> (i32, i32, i32) {
    %c0_i32 = arith.constant 0 : i32
    %c0_i32_0 = arith.constant 0 : i32
    %c0_i32_1 = arith.constant 0 : i32
    return %arg0, %c0_i32, %c0_i32_0 : i32, i32, i32
  }
  func.func @transform_8(%arg0: i32) -> (i32, i32, i32) {
    %c0_i32 = arith.constant 0 : i32
    %c0_i32_0 = arith.constant 0 : i32
    %c0_i32_1 = arith.constant 0 : i32
    return %arg0, %c0_i32, %c0_i32_0 : i32, i32, i32
  }
  func.func @transform_9(%arg0: i32) -> (i32, i32, i32) {
    %c0_i32 = arith.constant 0 : i32
    %c0_i32_0 = arith.constant 0 : i32
    %c0_i32_1 = arith.constant 0 : i32
    return %arg0, %c0_i32, %c0_i32_0 : i32, i32, i32
  }
  func.func @transform_10(%arg0: i32) -> (i32, i32, i32) {
    %c0_i32 = arith.constant 0 : i32
    %c0_i32_0 = arith.constant 0 : i32
    %c0_i32_1 = arith.constant 0 : i32
    return %arg0, %c0_i32, %c0_i32_0 : i32, i32, i32
  }
  func.func @transform_11(%arg0: i32) -> (i32, i32, i32) {
    %c0_i32 = arith.constant 0 : i32
    %c0_i32_0 = arith.constant 0 : i32
    %c0_i32_1 = arith.constant 0 : i32
    return %arg0, %c0_i32, %c0_i32_0 : i32, i32, i32
  }
  func.func @transform_12(%arg0: i32) -> (i32, i32, i32) {
    %c0_i32 = arith.constant 0 : i32
    %c0_i32_0 = arith.constant 0 : i32
    %c0_i32_1 = arith.constant 0 : i32
    return %arg0, %c0_i32, %c0_i32_0 : i32, i32, i32
  }
  func.func @transform_13(%arg0: i32) -> (i32, i32, i32) {
    %c0_i32 = arith.constant 0 : i32
    %c0_i32_0 = arith.constant 0 : i32
    %c0_i32_1 = arith.constant 0 : i32
    return %arg0, %c0_i32, %c0_i32_0 : i32, i32, i32
  }
  func.func @transform_14(%arg0: i32) -> (i32, i32, i32) {
    %c0_i32 = arith.constant 0 : i32
    %c0_i32_0 = arith.constant 0 : i32
    %c0_i32_1 = arith.constant 0 : i32
    return %arg0, %c0_i32, %c0_i32_0 : i32, i32, i32
  }
  func.func @transform_15(%arg0: i32) -> (i32, i32, i32) {
    %c0_i32 = arith.constant 0 : i32
    %c0_i32_0 = arith.constant 0 : i32
    %c0_i32_1 = arith.constant 0 : i32
    return %arg0, %c0_i32, %c0_i32_0 : i32, i32, i32
  }
  func.func @transform_16(%arg0: i32) -> (i32, i32, i32) {
    %c0_i32 = arith.constant 0 : i32
    %c0_i32_0 = arith.constant 0 : i32
    %c0_i32_1 = arith.constant 0 : i32
    return %arg0, %c0_i32, %c0_i32_0 : i32, i32, i32
  }
  func.func @transform_17(%arg0: i32) -> (i32, i32) {
    %c0_i32 = arith.constant 0 : i32
    %c0_i32_0 = arith.constant 0 : i32
    %c0_i32_1 = arith.constant 0 : i32
    return %c0_i32, %c0_i32_0 : i32, i32
  }
}

module attributes {stable_mosaic.version = 11 : i64} {
  func.func @_ltae_kernel(%arg0: i32, %arg1: memref<1x4x32xf32, #tpu.memory_space<vmem>>, %arg2: memref<1x1x16xf32, #tpu.memory_space<vmem>>, %arg3: memref<32x32xbf16, #tpu.memory_space<vmem>>, %arg4: memref<1x32xf32, #tpu.memory_space<vmem>>, %arg5: memref<32x32xbf16, #tpu.memory_space<vmem>>, %arg6: memref<1x32xf32, #tpu.memory_space<vmem>>, %arg7: memref<1x4x32xf32, #tpu.memory_space<vmem>>, %arg8: memref<16x4xf32, #tpu.memory_space<vmem>>, %arg9: memref<16x4xf32, #tpu.memory_space<vmem>>, %arg10: memref<16x8xf32, #tpu.memory_space<vmem>>, %arg11: memref<4x32xf32, #tpu.memory_space<vmem>>) attributes {dimension_semantics = [#tpu.dimension_semantics<parallel>], iteration_bounds = array<i64: 2>, scalar_prefetch = 0 : i64, scratch_operands = 4 : i64, tpu.core_type = #tpu.core_type<tc>, window_params = [{transform_indices = @transform_0, window_bounds = array<i64: 1, 4, 32>}, {transform_indices = @transform_1, window_bounds = array<i64: 1, 1, 16>}, {pipeline_mode = #tpu.pipeline_mode<synchronous>, transform_indices = @transform_2, window_bounds = array<i64: 32, 32>}, {pipeline_mode = #tpu.pipeline_mode<synchronous>, transform_indices = @transform_3, window_bounds = array<i64: 1, 32>}, {pipeline_mode = #tpu.pipeline_mode<synchronous>, transform_indices = @transform_4, window_bounds = array<i64: 32, 32>}, {pipeline_mode = #tpu.pipeline_mode<synchronous>, transform_indices = @transform_5, window_bounds = array<i64: 1, 32>}, {transform_indices = @transform_6, window_bounds = array<i64: 1, 4, 32>}]} {
    %c0 = arith.constant 0 : index
    %c0_0 = arith.constant 0 : index
    %c0_1 = arith.constant 0 : index
    %0 = vector.load %arg1[%c0, %c0_0, %c0_1] : memref<1x4x32xf32, #tpu.memory_space<vmem>>, vector<1x4x32xf32>
    %1 = vector.shape_cast %0 : vector<1x4x32xf32> to vector<4x32xf32>
    %c0_2 = arith.constant 0 : index
    %c0_3 = arith.constant 0 : index
    %2 = vector.load %arg3[%c0_2, %c0_3] : memref<32x32xbf16, #tpu.memory_space<vmem>>, vector<32x32xbf16>
    %3 = arith.truncf %1 : vector<4x32xf32> to vector<4x32xbf16>
    %cst = arith.constant dense<0.000000e+00> : vector<4x32xf32>
    %4 = tpu.matmul %3, %2, %cst {dimension_numbers = #tpu.dot_dimension_numbers<[1], [0], [0], [1], [0, 0, 1, 1], [], []>} : vector<4x32xbf16>, vector<32x32xbf16>, vector<4x32xf32> -> vector<4x32xf32>
    %c0_4 = arith.constant 0 : index
    %c0_5 = arith.constant 0 : index
    %5 = vector.load %arg4[%c0_4, %c0_5] : memref<1x32xf32, #tpu.memory_space<vmem>>, vector<1x32xf32>
    %6 = vector.broadcast %5 : vector<1x32xf32> to vector<4x32xf32>
    %7 = arith.addf %4, %6 : vector<4x32xf32>
    %8 = vector.extract_strided_slice %7 {offsets = [0, 0], sizes = [4, 4], strides = [1, 1]} : vector<4x32xf32> to vector<4x4xf32>
    %c0_6 = arith.constant 0 : index
    %c0_7 = arith.constant 0 : index
    %9 = vector.load %arg8[%c0_6, %c0_7] : memref<16x4xf32, #tpu.memory_space<vmem>>, vector<4x4xf32>
    tpu.vector_store %arg8[%c0_6, %c0_7], %8 {strides = array<i32>} : memref<16x4xf32, #tpu.memory_space<vmem>>, vector<4x4xf32>,
    %10 = vector.extract_strided_slice %7 {offsets = [0, 4], sizes = [4, 4], strides = [1, 1]} : vector<4x32xf32> to vector<4x4xf32>
    %c4 = arith.constant 4 : index
    %c0_8 = arith.constant 0 : index
    %11 = vector.load %arg8[%c4, %c0_8] : memref<16x4xf32, #tpu.memory_space<vmem>>, vector<4x4xf32>
    tpu.vector_store %arg8[%c4, %c0_8], %10 {strides = array<i32>} : memref<16x4xf32, #tpu.memory_space<vmem>>, vector<4x4xf32>,
    %12 = vector.extract_strided_slice %7 {offsets = [0, 8], sizes = [4, 4], strides = [1, 1]} : vector<4x32xf32> to vector<4x4xf32>
    %c8 = arith.constant 8 : index
    %c0_9 = arith.constant 0 : index
    %13 = vector.load %arg8[%c8, %c0_9] : memref<16x4xf32, #tpu.memory_space<vmem>>, vector<4x4xf32>
    tpu.vector_store %arg8[%c8, %c0_9], %12 {strides = array<i32>} : memref<16x4xf32, #tpu.memory_space<vmem>>, vector<4x4xf32>,
    %14 = vector.extract_strided_slice %7 {offsets = [0, 12], sizes = [4, 4], strides = [1, 1]} : vector<4x32xf32> to vector<4x4xf32>
    %c12 = arith.constant 12 : index
    %c0_10 = arith.constant 0 : index
    %15 = vector.load %arg8[%c12, %c0_10] : memref<16x4xf32, #tpu.memory_space<vmem>>, vector<4x4xf32>
    tpu.vector_store %arg8[%c12, %c0_10], %14 {strides = array<i32>} : memref<16x4xf32, #tpu.memory_space<vmem>>, vector<4x4xf32>,
    %16 = vector.extract_strided_slice %7 {offsets = [0, 16], sizes = [4, 4], strides = [1, 1]} : vector<4x32xf32> to vector<4x4xf32>
    %c0_11 = arith.constant 0 : index
    %c0_12 = arith.constant 0 : index
    %17 = vector.load %arg9[%c0_11, %c0_12] : memref<16x4xf32, #tpu.memory_space<vmem>>, vector<4x4xf32>
    tpu.vector_store %arg9[%c0_11, %c0_12], %16 {strides = array<i32>} : memref<16x4xf32, #tpu.memory_space<vmem>>, vector<4x4xf32>,
    %18 = vector.extract_strided_slice %7 {offsets = [0, 20], sizes = [4, 4], strides = [1, 1]} : vector<4x32xf32> to vector<4x4xf32>
    %c4_13 = arith.constant 4 : index
    %c0_14 = arith.constant 0 : index
    %19 = vector.load %arg9[%c4_13, %c0_14] : memref<16x4xf32, #tpu.memory_space<vmem>>, vector<4x4xf32>
    tpu.vector_store %arg9[%c4_13, %c0_14], %18 {strides = array<i32>} : memref<16x4xf32, #tpu.memory_space<vmem>>, vector<4x4xf32>,
    %20 = vector.extract_strided_slice %7 {offsets = [0, 24], sizes = [4, 4], strides = [1, 1]} : vector<4x32xf32> to vector<4x4xf32>
    %c8_15 = arith.constant 8 : index
    %c0_16 = arith.constant 0 : index
    %21 = vector.load %arg9[%c8_15, %c0_16] : memref<16x4xf32, #tpu.memory_space<vmem>>, vector<4x4xf32>
    tpu.vector_store %arg9[%c8_15, %c0_16], %20 {strides = array<i32>} : memref<16x4xf32, #tpu.memory_space<vmem>>, vector<4x4xf32>,
    %22 = vector.extract_strided_slice %7 {offsets = [0, 28], sizes = [4, 4], strides = [1, 1]} : vector<4x32xf32> to vector<4x4xf32>
    %c12_17 = arith.constant 12 : index
    %c0_18 = arith.constant 0 : index
    %23 = vector.load %arg9[%c12_17, %c0_18] : memref<16x4xf32, #tpu.memory_space<vmem>>, vector<4x4xf32>
    tpu.vector_store %arg9[%c12_17, %c0_18], %22 {strides = array<i32>} : memref<16x4xf32, #tpu.memory_space<vmem>>, vector<4x4xf32>,
    %24 = vector.extract_strided_slice %1 {offsets = [0, 0], sizes = [4, 8], strides = [1, 1]} : vector<4x32xf32> to vector<4x8xf32>
    %c0_19 = arith.constant 0 : index
    %c0_20 = arith.constant 0 : index
    %25 = vector.load %arg10[%c0_19, %c0_20] : memref<16x8xf32, #tpu.memory_space<vmem>>, vector<4x8xf32>
    tpu.vector_store %arg10[%c0_19, %c0_20], %24 {strides = array<i32>} : memref<16x8xf32, #tpu.memory_space<vmem>>, vector<4x8xf32>,
    %26 = vector.extract_strided_slice %1 {offsets = [0, 8], sizes = [4, 8], strides = [1, 1]} : vector<4x32xf32> to vector<4x8xf32>
    %c4_21 = arith.constant 4 : index
    %c0_22 = arith.constant 0 : index
    %27 = vector.load %arg10[%c4_21, %c0_22] : memref<16x8xf32, #tpu.memory_space<vmem>>, vector<4x8xf32>
    tpu.vector_store %arg10[%c4_21, %c0_22], %26 {strides = array<i32>} : memref<16x8xf32, #tpu.memory_space<vmem>>, vector<4x8xf32>,
    %28 = vector.extract_strided_slice %1 {offsets = [0, 16], sizes = [4, 8], strides = [1, 1]} : vector<4x32xf32> to vector<4x8xf32>
    %c8_23 = arith.constant 8 : index
    %c0_24 = arith.constant 0 : index
    %29 = vector.load %arg10[%c8_23, %c0_24] : memref<16x8xf32, #tpu.memory_space<vmem>>, vector<4x8xf32>
    tpu.vector_store %arg10[%c8_23, %c0_24], %28 {strides = array<i32>} : memref<16x8xf32, #tpu.memory_space<vmem>>, vector<4x8xf32>,
    %30 = vector.extract_strided_slice %1 {offsets = [0, 24], sizes = [4, 8], strides = [1, 1]} : vector<4x32xf32> to vector<4x8xf32>
    %c12_25 = arith.constant 12 : index
    %c0_26 = arith.constant 0 : index
    %31 = vector.load %arg10[%c12_25, %c0_26] : memref<16x8xf32, #tpu.memory_space<vmem>>, vector<4x8xf32>
    tpu.vector_store %arg10[%c12_25, %c0_26], %30 {strides = array<i32>} : memref<16x8xf32, #tpu.memory_space<vmem>>, vector<4x8xf32>,
    %c0_27 = arith.constant 0 : index
    %c0_28 = arith.constant 0 : index
    %32 = vector.load %arg8[%c0_27, %c0_28] : memref<16x4xf32, #tpu.memory_space<vmem>>, vector<16x4xf32>
    %c0_29 = arith.constant 0 : index
    %c0_30 = arith.constant 0 : index
    %33 = vector.load %arg9[%c0_29, %c0_30] : memref<16x4xf32, #tpu.memory_space<vmem>>, vector<16x4xf32>
    %c0_31 = arith.constant 0 : index
    %c0_32 = arith.constant 0 : index
    %34 = vector.load %arg10[%c0_31, %c0_32] : memref<16x8xf32, #tpu.memory_space<vmem>>, vector<16x8xf32>
    %c0_33 = arith.constant 0 : index
    %c0_34 = arith.constant 0 : index
    %c0_35 = arith.constant 0 : index
    %35 = vector.load %arg2[%c0_33, %c0_34, %c0_35] : memref<1x1x16xf32, #tpu.memory_space<vmem>>, vector<1x1x16xf32>
    %36 = vector.shape_cast %35 : vector<1x1x16xf32> to vector<1x16xf32>
    %cst_36 = arith.constant dense<0.000000e+00> : vector<16x16xf32>
    %37 = tpu.matmul %32, %33, %cst_36 {dimension_numbers = #tpu.dot_dimension_numbers<[1], [1], [0], [0], [0, 0, 1, 0], [], []>} : vector<16x4xf32>, vector<16x4xf32>, vector<16x16xf32> -> vector<16x16xf32>
    %cst_37 = arith.constant 5.000000e-01 : f32
    %38 = vector.broadcast %cst_37 : f32 to vector<16x16xf32>
    %39 = arith.mulf %37, %38 : vector<16x16xf32>
    %40 = vector.broadcast %36 : vector<1x16xf32> to vector<16x16xf32>
    %41 = arith.addf %39, %40 : vector<16x16xf32>
    %42 = tpu.iota {dimensions = array<i32: 0>} : vector<16x1xi32>
    %43 = tpu.iota {dimensions = array<i32: 1>} : vector<1x16xi32>
    %c0_i32 = arith.constant 0 : i32
    %44 = vector.broadcast %c0_i32 : i32 to vector<16x1xi32>
    %c0_i32_38 = arith.constant 0 : i32
    %45 = vector.broadcast %c0_i32_38 : i32 to vector<1x16xi32>
    %c2_i32 = arith.constant 2 : i32
    %46 = vector.broadcast %c2_i32 : i32 to vector<16x1xi32>
    %47 = arith.cmpi sge, %42, %46 : vector<16x1xi32>
    %48 = arith.extui %47 : vector<16x1xi1> to vector<16x1xi32>
    %49 = arith.addi %44, %48 : vector<16x1xi32>
    %c2_i32_39 = arith.constant 2 : i32
    %50 = vector.broadcast %c2_i32_39 : i32 to vector<1x16xi32>
    %51 = arith.cmpi sge, %43, %50 : vector<1x16xi32>
    %52 = arith.extui %51 : vector<1x16xi1> to vector<1x16xi32>
    %53 = arith.addi %45, %52 : vector<1x16xi32>
    %c4_i32 = arith.constant 4 : i32
    %54 = vector.broadcast %c4_i32 : i32 to vector<16x1xi32>
    %55 = arith.cmpi sge, %42, %54 : vector<16x1xi32>
    %56 = arith.extui %55 : vector<16x1xi1> to vector<16x1xi32>
    %57 = arith.addi %49, %56 : vector<16x1xi32>
    %c4_i32_40 = arith.constant 4 : i32
    %58 = vector.broadcast %c4_i32_40 : i32 to vector<1x16xi32>
    %59 = arith.cmpi sge, %43, %58 : vector<1x16xi32>
    %60 = arith.extui %59 : vector<1x16xi1> to vector<1x16xi32>
    %61 = arith.addi %53, %60 : vector<1x16xi32>
    %c6_i32 = arith.constant 6 : i32
    %62 = vector.broadcast %c6_i32 : i32 to vector<16x1xi32>
    %63 = arith.cmpi sge, %42, %62 : vector<16x1xi32>
    %64 = arith.extui %63 : vector<16x1xi1> to vector<16x1xi32>
    %65 = arith.addi %57, %64 : vector<16x1xi32>
    %c6_i32_41 = arith.constant 6 : i32
    %66 = vector.broadcast %c6_i32_41 : i32 to vector<1x16xi32>
    %67 = arith.cmpi sge, %43, %66 : vector<1x16xi32>
    %68 = arith.extui %67 : vector<1x16xi1> to vector<1x16xi32>
    %69 = arith.addi %61, %68 : vector<1x16xi32>
    %c8_i32 = arith.constant 8 : i32
    %70 = vector.broadcast %c8_i32 : i32 to vector<16x1xi32>
    %71 = arith.cmpi sge, %42, %70 : vector<16x1xi32>
    %72 = arith.extui %71 : vector<16x1xi1> to vector<16x1xi32>
    %73 = arith.addi %65, %72 : vector<16x1xi32>
    %c8_i32_42 = arith.constant 8 : i32
    %74 = vector.broadcast %c8_i32_42 : i32 to vector<1x16xi32>
    %75 = arith.cmpi sge, %43, %74 : vector<1x16xi32>
    %76 = arith.extui %75 : vector<1x16xi1> to vector<1x16xi32>
    %77 = arith.addi %69, %76 : vector<1x16xi32>
    %c10_i32 = arith.constant 10 : i32
    %78 = vector.broadcast %c10_i32 : i32 to vector<16x1xi32>
    %79 = arith.cmpi sge, %42, %78 : vector<16x1xi32>
    %80 = arith.extui %79 : vector<16x1xi1> to vector<16x1xi32>
    %81 = arith.addi %73, %80 : vector<16x1xi32>
    %c10_i32_43 = arith.constant 10 : i32
    %82 = vector.broadcast %c10_i32_43 : i32 to vector<1x16xi32>
    %83 = arith.cmpi sge, %43, %82 : vector<1x16xi32>
    %84 = arith.extui %83 : vector<1x16xi1> to vector<1x16xi32>
    %85 = arith.addi %77, %84 : vector<1x16xi32>
    %c12_i32 = arith.constant 12 : i32
    %86 = vector.broadcast %c12_i32 : i32 to vector<16x1xi32>
    %87 = arith.cmpi sge, %42, %86 : vector<16x1xi32>
    %88 = arith.extui %87 : vector<16x1xi1> to vector<16x1xi32>
    %89 = arith.addi %81, %88 : vector<16x1xi32>
    %c12_i32_44 = arith.constant 12 : i32
    %90 = vector.broadcast %c12_i32_44 : i32 to vector<1x16xi32>
    %91 = arith.cmpi sge, %43, %90 : vector<1x16xi32>
    %92 = arith.extui %91 : vector<1x16xi1> to vector<1x16xi32>
    %93 = arith.addi %85, %92 : vector<1x16xi32>
    %c14_i32 = arith.constant 14 : i32
    %94 = vector.broadcast %c14_i32 : i32 to vector<16x1xi32>
    %95 = arith.cmpi sge, %42, %94 : vector<16x1xi32>
    %96 = arith.extui %95 : vector<16x1xi1> to vector<16x1xi32>
    %97 = arith.addi %89, %96 : vector<16x1xi32>
    %c14_i32_45 = arith.constant 14 : i32
    %98 = vector.broadcast %c14_i32_45 : i32 to vector<1x16xi32>
    %99 = arith.cmpi sge, %43, %98 : vector<1x16xi32>
    %100 = arith.extui %99 : vector<1x16xi1> to vector<1x16xi32>
    %101 = arith.addi %93, %100 : vector<1x16xi32>
    %102 = vector.broadcast %97 : vector<16x1xi32> to vector<16x16xi32>
    %103 = vector.broadcast %101 : vector<1x16xi32> to vector<16x16xi32>
    %104 = arith.cmpi eq, %102, %103 : vector<16x16xi32>
    %cst_46 = arith.constant -1.000000e+30 : f32
    %105 = vector.broadcast %cst_46 : f32 to vector<16x16xf32>
    %106 = arith.select %104, %41, %105 : vector<16x16xi1>, vector<16x16xf32>
    %cst_47 = arith.constant dense<0xFF800000> : vector<16xf32>
    %107 = vector.multi_reduction <maximumf>, %106, %cst_47 [1] : vector<16x16xf32> to vector<16xf32>
    %108 = vector.shape_cast %107 : vector<16xf32> to vector<16x1xf32>
    %109 = vector.broadcast %108 : vector<16x1xf32> to vector<16x16xf32>
    %110 = arith.subf %106, %109 : vector<16x16xf32>
    %111 = math.exp %110 : vector<16x16xf32>
    %cst_48 = arith.constant dense<0.000000e+00> : vector<16xf32>
    %112 = vector.multi_reduction <add>, %111, %cst_48 [1] : vector<16x16xf32> to vector<16xf32>
    %113 = vector.shape_cast %112 : vector<16xf32> to vector<16x1xf32>
    %114 = tpu.reciprocal %113 {approx = true} : vector<16x1xf32> -> vector<16x1xf32>
    %115 = vector.broadcast %114 : vector<16x1xf32> to vector<16x16xf32>
    %116 = arith.mulf %111, %115 : vector<16x16xf32>
    %cst_49 = arith.constant dense<0.000000e+00> : vector<16x8xf32>
    %117 = tpu.matmul %116, %34, %cst_49 {dimension_numbers = #tpu.dot_dimension_numbers<[1], [0], [0], [1], [0, 0, 1, 1], [], []>} : vector<16x16xf32>, vector<16x8xf32>, vector<16x8xf32> -> vector<16x8xf32>
    %118 = vector.extract_strided_slice %117 {offsets = [0, 0], sizes = [4, 8], strides = [1, 1]} : vector<16x8xf32> to vector<4x8xf32>
    %c0_50 = arith.constant 0 : index
    %c0_51 = arith.constant 0 : index
    %119 = vector.load %arg11[%c0_50, %c0_51] : memref<4x32xf32, #tpu.memory_space<vmem>>, vector<4x8xf32>
    tpu.vector_store %arg11[%c0_50, %c0_51], %118 {strides = array<i32>} : memref<4x32xf32, #tpu.memory_space<vmem>>, vector<4x8xf32>,
    %120 = vector.extract_strided_slice %117 {offsets = [4, 0], sizes = [4, 8], strides = [1, 1]} : vector<16x8xf32> to vector<4x8xf32>
    %c0_52 = arith.constant 0 : index
    %c8_53 = arith.constant 8 : index
    %121 = vector.load %arg11[%c0_52, %c8_53] : memref<4x32xf32, #tpu.memory_space<vmem>>, vector<4x8xf32>
    tpu.vector_store %arg11[%c0_52, %c8_53], %120 {strides = array<i32>} : memref<4x32xf32, #tpu.memory_space<vmem>>, vector<4x8xf32>,
    %122 = vector.extract_strided_slice %117 {offsets = [8, 0], sizes = [4, 8], strides = [1, 1]} : vector<16x8xf32> to vector<4x8xf32>
    %c0_54 = arith.constant 0 : index
    %c16 = arith.constant 16 : index
    %123 = vector.load %arg11[%c0_54, %c16] : memref<4x32xf32, #tpu.memory_space<vmem>>, vector<4x8xf32>
    tpu.vector_store %arg11[%c0_54, %c16], %122 {strides = array<i32>} : memref<4x32xf32, #tpu.memory_space<vmem>>, vector<4x8xf32>,
    %124 = vector.extract_strided_slice %117 {offsets = [12, 0], sizes = [4, 8], strides = [1, 1]} : vector<16x8xf32> to vector<4x8xf32>
    %c0_55 = arith.constant 0 : index
    %c24 = arith.constant 24 : index
    %125 = vector.load %arg11[%c0_55, %c24] : memref<4x32xf32, #tpu.memory_space<vmem>>, vector<4x8xf32>
    tpu.vector_store %arg11[%c0_55, %c24], %124 {strides = array<i32>} : memref<4x32xf32, #tpu.memory_space<vmem>>, vector<4x8xf32>,
    %c0_56 = arith.constant 0 : index
    %c0_57 = arith.constant 0 : index
    %126 = vector.load %arg11[%c0_56, %c0_57] : memref<4x32xf32, #tpu.memory_space<vmem>>, vector<4x32xf32>
    %c0_58 = arith.constant 0 : index
    %c0_59 = arith.constant 0 : index
    %127 = vector.load %arg5[%c0_58, %c0_59] : memref<32x32xbf16, #tpu.memory_space<vmem>>, vector<32x32xbf16>
    %128 = arith.truncf %126 : vector<4x32xf32> to vector<4x32xbf16>
    %cst_60 = arith.constant dense<0.000000e+00> : vector<4x32xf32>
    %129 = tpu.matmul %128, %127, %cst_60 {dimension_numbers = #tpu.dot_dimension_numbers<[1], [0], [0], [1], [0, 0, 1, 1], [], []>} : vector<4x32xbf16>, vector<32x32xbf16>, vector<4x32xf32> -> vector<4x32xf32>
    %c0_61 = arith.constant 0 : index
    %c0_62 = arith.constant 0 : index
    %130 = vector.load %arg6[%c0_61, %c0_62] : memref<1x32xf32, #tpu.memory_space<vmem>>, vector<1x32xf32>
    %131 = vector.broadcast %130 : vector<1x32xf32> to vector<4x32xf32>
    %132 = arith.addf %129, %131 : vector<4x32xf32>
    %c0_63 = arith.constant 0 : index
    %c0_64 = arith.constant 0 : index
    %c0_65 = arith.constant 0 : index
    %133 = vector.load %arg7[%c0_63, %c0_64, %c0_65] : memref<1x4x32xf32, #tpu.memory_space<vmem>>, vector<1x4x32xf32>
    %134 = vector.shape_cast %133 : vector<1x4x32xf32> to vector<4x32xf32>
    %135 = vector.shape_cast %132 : vector<4x32xf32> to vector<1x4x32xf32>
    tpu.vector_store %arg7[%c0_63, %c0_64, %c0_65], %135 {strides = array<i32>} : memref<1x4x32xf32, #tpu.memory_space<vmem>>, vector<1x4x32xf32>,
    return
  }
  func.func @transform_0(%arg0: i32) -> (i32, i32, i32) {
    %c0_i32 = arith.constant 0 : i32
    %c0_i32_0 = arith.constant 0 : i32
    %c0_i32_1 = arith.constant 0 : i32
    return %arg0, %c0_i32, %c0_i32_0 : i32, i32, i32
  }
  func.func @transform_1(%arg0: i32) -> (i32, i32, i32) {
    %c0_i32 = arith.constant 0 : i32
    %c0_i32_0 = arith.constant 0 : i32
    %c0_i32_1 = arith.constant 0 : i32
    return %arg0, %c0_i32, %c0_i32_0 : i32, i32, i32
  }
  func.func @transform_2(%arg0: i32) -> (i32, i32) {
    %c0_i32 = arith.constant 0 : i32
    %c0_i32_0 = arith.constant 0 : i32
    %c0_i32_1 = arith.constant 0 : i32
    return %c0_i32, %c0_i32_0 : i32, i32
  }
  func.func @transform_3(%arg0: i32) -> (i32, i32) {
    %c0_i32 = arith.constant 0 : i32
    %c0_i32_0 = arith.constant 0 : i32
    %c0_i32_1 = arith.constant 0 : i32
    return %c0_i32, %c0_i32_0 : i32, i32
  }
  func.func @transform_4(%arg0: i32) -> (i32, i32) {
    %c0_i32 = arith.constant 0 : i32
    %c0_i32_0 = arith.constant 0 : i32
    %c0_i32_1 = arith.constant 0 : i32
    return %c0_i32, %c0_i32_0 : i32, i32
  }
  func.func @transform_5(%arg0: i32) -> (i32, i32) {
    %c0_i32 = arith.constant 0 : i32
    %c0_i32_0 = arith.constant 0 : i32
    %c0_i32_1 = arith.constant 0 : i32
    return %c0_i32, %c0_i32_0 : i32, i32
  }
  func.func @transform_6(%arg0: i32) -> (i32, i32, i32) {
    %c0_i32 = arith.constant 0 : i32
    %c0_i32_0 = arith.constant 0 : i32
    %c0_i32_1 = arith.constant 0 : i32
    return %arg0, %c0_i32, %c0_i32_0 : i32, i32, i32
  }
}

module attributes {stable_mosaic.version = 11 : i64} {
  func.func @_seghead_kernel(%arg0: i32, %arg1: memref<1x4x32xf32, #tpu.memory_space<vmem>>, %arg2: memref<32x64xbf16, #tpu.memory_space<vmem>>, %arg3: memref<1x64xf32, #tpu.memory_space<vmem>>, %arg4: memref<1x64xf32, #tpu.memory_space<vmem>>, %arg5: memref<144x16xbf16, #tpu.memory_space<vmem>>, %arg6: memref<1x16xf32, #tpu.memory_space<vmem>>, %arg7: memref<1x16xf32, #tpu.memory_space<vmem>>, %arg8: memref<16x12xbf16, #tpu.memory_space<vmem>>, %arg9: memref<1x12xf32, #tpu.memory_space<vmem>>, %arg10: memref<9x16x1xf32, #tpu.memory_space<vmem>>, %arg11: memref<1x16x12xf32, #tpu.memory_space<vmem>>, %arg12: memref<26x16xf32, #tpu.memory_space<vmem>>, %arg13: memref<16x144xf32, #tpu.memory_space<vmem>>) attributes {dimension_semantics = [#tpu.dimension_semantics<parallel>], iteration_bounds = array<i64: 2>, scalar_prefetch = 0 : i64, scratch_operands = 2 : i64, tpu.core_type = #tpu.core_type<tc>, window_params = [{transform_indices = @transform_0, window_bounds = array<i64: 1, 4, 32>}, {pipeline_mode = #tpu.pipeline_mode<synchronous>, transform_indices = @transform_1, window_bounds = array<i64: 32, 64>}, {pipeline_mode = #tpu.pipeline_mode<synchronous>, transform_indices = @transform_2, window_bounds = array<i64: 1, 64>}, {pipeline_mode = #tpu.pipeline_mode<synchronous>, transform_indices = @transform_3, window_bounds = array<i64: 1, 64>}, {pipeline_mode = #tpu.pipeline_mode<synchronous>, transform_indices = @transform_4, window_bounds = array<i64: 144, 16>}, {pipeline_mode = #tpu.pipeline_mode<synchronous>, transform_indices = @transform_5, window_bounds = array<i64: 1, 16>}, {pipeline_mode = #tpu.pipeline_mode<synchronous>, transform_indices = @transform_6, window_bounds = array<i64: 1, 16>}, {pipeline_mode = #tpu.pipeline_mode<synchronous>, transform_indices = @transform_7, window_bounds = array<i64: 16, 12>}, {pipeline_mode = #tpu.pipeline_mode<synchronous>, transform_indices = @transform_8, window_bounds = array<i64: 1, 12>}, {pipeline_mode = #tpu.pipeline_mode<synchronous>, transform_indices = @transform_9, window_bounds = array<i64: 9, 16, 1>}, {transform_indices = @transform_10, window_bounds = array<i64: 1, 16, 12>}]} {
    %c0 = arith.constant 0 : index
    %c0_0 = arith.constant 0 : index
    %c0_1 = arith.constant 0 : index
    %0 = vector.load %arg1[%c0, %c0_0, %c0_1] : memref<1x4x32xf32, #tpu.memory_space<vmem>>, vector<1x4x32xf32>
    %1 = vector.shape_cast %0 : vector<1x4x32xf32> to vector<4x32xf32>
    %c0_2 = arith.constant 0 : index
    %c0_3 = arith.constant 0 : index
    %2 = vector.load %arg2[%c0_2, %c0_3] : memref<32x64xbf16, #tpu.memory_space<vmem>>, vector<32x64xbf16>
    %3 = arith.truncf %1 : vector<4x32xf32> to vector<4x32xbf16>
    %cst = arith.constant dense<0.000000e+00> : vector<4x64xf32>
    %4 = tpu.matmul %3, %2, %cst {dimension_numbers = #tpu.dot_dimension_numbers<[1], [0], [0], [1], [0, 0, 1, 1], [], []>} : vector<4x32xbf16>, vector<32x64xbf16>, vector<4x64xf32> -> vector<4x64xf32>
    %c0_4 = arith.constant 0 : index
    %c0_5 = arith.constant 0 : index
    %5 = vector.load %arg3[%c0_4, %c0_5] : memref<1x64xf32, #tpu.memory_space<vmem>>, vector<1x64xf32>
    %6 = vector.broadcast %5 : vector<1x64xf32> to vector<4x64xf32>
    %7 = arith.mulf %4, %6 : vector<4x64xf32>
    %c0_6 = arith.constant 0 : index
    %c0_7 = arith.constant 0 : index
    %8 = vector.load %arg4[%c0_6, %c0_7] : memref<1x64xf32, #tpu.memory_space<vmem>>, vector<1x64xf32>
    %9 = vector.broadcast %8 : vector<1x64xf32> to vector<4x64xf32>
    %10 = arith.addf %7, %9 : vector<4x64xf32>
    %cst_8 = arith.constant 5.000000e-01 : f32
    %11 = vector.broadcast %cst_8 : f32 to vector<4x64xf32>
    %12 = arith.mulf %11, %10 : vector<4x64xf32>
    %cst_9 = arith.constant 0.707106769 : f32
    %13 = vector.broadcast %cst_9 : f32 to vector<4x64xf32>
    %14 = arith.mulf %10, %13 : vector<4x64xf32>
    %cst_10 = arith.constant 0.000000e+00 : f32
    %15 = vector.broadcast %cst_10 : f32 to vector<4x64xf32>
    %16 = arith.cmpf olt, %14, %15 : vector<4x64xf32>
    %cst_11 = arith.constant -1.000000e+00 : f32
    %cst_12 = arith.constant 1.000000e+00 : f32
    %17 = vector.broadcast %cst_11 : f32 to vector<4x64xf32>
    %18 = vector.broadcast %cst_12 : f32 to vector<4x64xf32>
    %19 = arith.select %16, %17, %18 : vector<4x64xi1>, vector<4x64xf32>
    %20 = math.absf %14 : vector<4x64xf32>
    %cst_13 = arith.constant 0.327591091 : f32
    %21 = vector.broadcast %cst_13 : f32 to vector<4x64xf32>
    %22 = arith.mulf %21, %20 : vector<4x64xf32>
    %cst_14 = arith.constant 1.000000e+00 : f32
    %23 = vector.broadcast %cst_14 : f32 to vector<4x64xf32>
    %24 = arith.addf %23, %22 : vector<4x64xf32>
    %cst_15 = arith.constant 1.000000e+00 : f32
    %25 = vector.broadcast %cst_15 : f32 to vector<4x64xf32>
    %26 = arith.divf %25, %24 : vector<4x64xf32>
    %cst_16 = arith.constant 1.06140542 : f32
    %27 = vector.broadcast %cst_16 : f32 to vector<4x64xf32>
    %28 = arith.mulf %27, %26 : vector<4x64xf32>
    %cst_17 = arith.constant -1.45315206 : f32
    %29 = vector.broadcast %cst_17 : f32 to vector<4x64xf32>
    %30 = arith.addf %28, %29 : vector<4x64xf32>
    %31 = arith.mulf %30, %26 : vector<4x64xf32>
    %cst_18 = arith.constant 1.42141378 : f32
    %32 = vector.broadcast %cst_18 : f32 to vector<4x64xf32>
    %33 = arith.addf %31, %32 : vector<4x64xf32>
    %34 = arith.mulf %33, %26 : vector<4x64xf32>
    %cst_19 = arith.constant -0.284496725 : f32
    %35 = vector.broadcast %cst_19 : f32 to vector<4x64xf32>
    %36 = arith.addf %34, %35 : vector<4x64xf32>
    %37 = arith.mulf %36, %26 : vector<4x64xf32>
    %cst_20 = arith.constant 0.254829586 : f32
    %38 = vector.broadcast %cst_20 : f32 to vector<4x64xf32>
    %39 = arith.addf %37, %38 : vector<4x64xf32>
    %40 = arith.mulf %39, %26 : vector<4x64xf32>
    %cst_21 = arith.constant 0.000000e+00 : f32
    %41 = vector.broadcast %cst_21 : f32 to vector<4x64xf32>
    %42 = arith.subf %41, %20 : vector<4x64xf32>
    %43 = arith.mulf %42, %20 : vector<4x64xf32>
    %44 = math.exp %43 : vector<4x64xf32>
    %45 = arith.mulf %40, %44 : vector<4x64xf32>
    %cst_22 = arith.constant 1.000000e+00 : f32
    %46 = vector.broadcast %cst_22 : f32 to vector<4x64xf32>
    %47 = arith.subf %46, %45 : vector<4x64xf32>
    %48 = arith.mulf %19, %47 : vector<4x64xf32>
    %cst_23 = arith.constant 1.000000e+00 : f32
    %49 = vector.broadcast %cst_23 : f32 to vector<4x64xf32>
    %50 = arith.addf %49, %48 : vector<4x64xf32>
    %51 = arith.mulf %12, %50 : vector<4x64xf32>
    %cst_24 = arith.constant 0.000000e+00 : f32
    %52 = vector.broadcast %cst_24 : f32 to vector<26x16xf32>
    %c0_25 = arith.constant 0 : index
    %c0_26 = arith.constant 0 : index
    %53 = vector.load %arg12[%c0_25, %c0_26] : memref<26x16xf32, #tpu.memory_space<vmem>>, vector<26x16xf32>
    tpu.vector_store %arg12[%c0_25, %c0_26], %52 {strides = array<i32>} : memref<26x16xf32, #tpu.memory_space<vmem>>, vector<26x16xf32>,
    %54 = vector.extract_strided_slice %51 {offsets = [0, 0], sizes = [1, 16], strides = [1, 1]} : vector<4x64xf32> to vector<1x16xf32>
    %c5 = arith.constant 5 : index
    %c0_27 = arith.constant 0 : index
    %55 = vector.load %arg12[%c5, %c0_27] : memref<26x16xf32, #tpu.memory_space<vmem>>, vector<1x16xf32>
    tpu.vector_store %arg12[%c5, %c0_27], %54 {strides = array<i32>} : memref<26x16xf32, #tpu.memory_space<vmem>>, vector<1x16xf32>,
    %56 = vector.extract_strided_slice %51 {offsets = [0, 16], sizes = [1, 16], strides = [1, 1]} : vector<4x64xf32> to vector<1x16xf32>
    %c6 = arith.constant 6 : index
    %c0_28 = arith.constant 0 : index
    %57 = vector.load %arg12[%c6, %c0_28] : memref<26x16xf32, #tpu.memory_space<vmem>>, vector<1x16xf32>
    tpu.vector_store %arg12[%c6, %c0_28], %56 {strides = array<i32>} : memref<26x16xf32, #tpu.memory_space<vmem>>, vector<1x16xf32>,
    %58 = vector.extract_strided_slice %51 {offsets = [1, 0], sizes = [1, 16], strides = [1, 1]} : vector<4x64xf32> to vector<1x16xf32>
    %c7 = arith.constant 7 : index
    %c0_29 = arith.constant 0 : index
    %59 = vector.load %arg12[%c7, %c0_29] : memref<26x16xf32, #tpu.memory_space<vmem>>, vector<1x16xf32>
    tpu.vector_store %arg12[%c7, %c0_29], %58 {strides = array<i32>} : memref<26x16xf32, #tpu.memory_space<vmem>>, vector<1x16xf32>,
    %60 = vector.extract_strided_slice %51 {offsets = [1, 16], sizes = [1, 16], strides = [1, 1]} : vector<4x64xf32> to vector<1x16xf32>
    %c8 = arith.constant 8 : index
    %c0_30 = arith.constant 0 : index
    %61 = vector.load %arg12[%c8, %c0_30] : memref<26x16xf32, #tpu.memory_space<vmem>>, vector<1x16xf32>
    tpu.vector_store %arg12[%c8, %c0_30], %60 {strides = array<i32>} : memref<26x16xf32, #tpu.memory_space<vmem>>, vector<1x16xf32>,
    %62 = vector.extract_strided_slice %51 {offsets = [0, 32], sizes = [1, 16], strides = [1, 1]} : vector<4x64xf32> to vector<1x16xf32>
    %c9 = arith.constant 9 : index
    %c0_31 = arith.constant 0 : index
    %63 = vector.load %arg12[%c9, %c0_31] : memref<26x16xf32, #tpu.memory_space<vmem>>, vector<1x16xf32>
    tpu.vector_store %arg12[%c9, %c0_31], %62 {strides = array<i32>} : memref<26x16xf32, #tpu.memory_space<vmem>>, vector<1x16xf32>,
    %64 = vector.extract_strided_slice %51 {offsets = [0, 48], sizes = [1, 16], strides = [1, 1]} : vector<4x64xf32> to vector<1x16xf32>
    %c10 = arith.constant 10 : index
    %c0_32 = arith.constant 0 : index
    %65 = vector.load %arg12[%c10, %c0_32] : memref<26x16xf32, #tpu.memory_space<vmem>>, vector<1x16xf32>
    tpu.vector_store %arg12[%c10, %c0_32], %64 {strides = array<i32>} : memref<26x16xf32, #tpu.memory_space<vmem>>, vector<1x16xf32>,
    %66 = vector.extract_strided_slice %51 {offsets = [1, 32], sizes = [1, 16], strides = [1, 1]} : vector<4x64xf32> to vector<1x16xf32>
    %c11 = arith.constant 11 : index
    %c0_33 = arith.constant 0 : index
    %67 = vector.load %arg12[%c11, %c0_33] : memref<26x16xf32, #tpu.memory_space<vmem>>, vector<1x16xf32>
    tpu.vector_store %arg12[%c11, %c0_33], %66 {strides = array<i32>} : memref<26x16xf32, #tpu.memory_space<vmem>>, vector<1x16xf32>,
    %68 = vector.extract_strided_slice %51 {offsets = [1, 48], sizes = [1, 16], strides = [1, 1]} : vector<4x64xf32> to vector<1x16xf32>
    %c12 = arith.constant 12 : index
    %c0_34 = arith.constant 0 : index
    %69 = vector.load %arg12[%c12, %c0_34] : memref<26x16xf32, #tpu.memory_space<vmem>>, vector<1x16xf32>
    tpu.vector_store %arg12[%c12, %c0_34], %68 {strides = array<i32>} : memref<26x16xf32, #tpu.memory_space<vmem>>, vector<1x16xf32>,
    %70 = vector.extract_strided_slice %51 {offsets = [2, 0], sizes = [1, 16], strides = [1, 1]} : vector<4x64xf32> to vector<1x16xf32>
    %c13 = arith.constant 13 : index
    %c0_35 = arith.constant 0 : index
    %71 = vector.load %arg12[%c13, %c0_35] : memref<26x16xf32, #tpu.memory_space<vmem>>, vector<1x16xf32>
    tpu.vector_store %arg12[%c13, %c0_35], %70 {strides = array<i32>} : memref<26x16xf32, #tpu.memory_space<vmem>>, vector<1x16xf32>,
    %72 = vector.extract_strided_slice %51 {offsets = [2, 16], sizes = [1, 16], strides = [1, 1]} : vector<4x64xf32> to vector<1x16xf32>
    %c14 = arith.constant 14 : index
    %c0_36 = arith.constant 0 : index
    %73 = vector.load %arg12[%c14, %c0_36] : memref<26x16xf32, #tpu.memory_space<vmem>>, vector<1x16xf32>
    tpu.vector_store %arg12[%c14, %c0_36], %72 {strides = array<i32>} : memref<26x16xf32, #tpu.memory_space<vmem>>, vector<1x16xf32>,
    %74 = vector.extract_strided_slice %51 {offsets = [3, 0], sizes = [1, 16], strides = [1, 1]} : vector<4x64xf32> to vector<1x16xf32>
    %c15 = arith.constant 15 : index
    %c0_37 = arith.constant 0 : index
    %75 = vector.load %arg12[%c15, %c0_37] : memref<26x16xf32, #tpu.memory_space<vmem>>, vector<1x16xf32>
    tpu.vector_store %arg12[%c15, %c0_37], %74 {strides = array<i32>} : memref<26x16xf32, #tpu.memory_space<vmem>>, vector<1x16xf32>,
    %76 = vector.extract_strided_slice %51 {offsets = [3, 16], sizes = [1, 16], strides = [1, 1]} : vector<4x64xf32> to vector<1x16xf32>
    %c16 = arith.constant 16 : index
    %c0_38 = arith.constant 0 : index
    %77 = vector.load %arg12[%c16, %c0_38] : memref<26x16xf32, #tpu.memory_space<vmem>>, vector<1x16xf32>
    tpu.vector_store %arg12[%c16, %c0_38], %76 {strides = array<i32>} : memref<26x16xf32, #tpu.memory_space<vmem>>, vector<1x16xf32>,
    %78 = vector.extract_strided_slice %51 {offsets = [2, 32], sizes = [1, 16], strides = [1, 1]} : vector<4x64xf32> to vector<1x16xf32>
    %c17 = arith.constant 17 : index
    %c0_39 = arith.constant 0 : index
    %79 = vector.load %arg12[%c17, %c0_39] : memref<26x16xf32, #tpu.memory_space<vmem>>, vector<1x16xf32>
    tpu.vector_store %arg12[%c17, %c0_39], %78 {strides = array<i32>} : memref<26x16xf32, #tpu.memory_space<vmem>>, vector<1x16xf32>,
    %80 = vector.extract_strided_slice %51 {offsets = [2, 48], sizes = [1, 16], strides = [1, 1]} : vector<4x64xf32> to vector<1x16xf32>
    %c18 = arith.constant 18 : index
    %c0_40 = arith.constant 0 : index
    %81 = vector.load %arg12[%c18, %c0_40] : memref<26x16xf32, #tpu.memory_space<vmem>>, vector<1x16xf32>
    tpu.vector_store %arg12[%c18, %c0_40], %80 {strides = array<i32>} : memref<26x16xf32, #tpu.memory_space<vmem>>, vector<1x16xf32>,
    %82 = vector.extract_strided_slice %51 {offsets = [3, 32], sizes = [1, 16], strides = [1, 1]} : vector<4x64xf32> to vector<1x16xf32>
    %c19 = arith.constant 19 : index
    %c0_41 = arith.constant 0 : index
    %83 = vector.load %arg12[%c19, %c0_41] : memref<26x16xf32, #tpu.memory_space<vmem>>, vector<1x16xf32>
    tpu.vector_store %arg12[%c19, %c0_41], %82 {strides = array<i32>} : memref<26x16xf32, #tpu.memory_space<vmem>>, vector<1x16xf32>,
    %84 = vector.extract_strided_slice %51 {offsets = [3, 48], sizes = [1, 16], strides = [1, 1]} : vector<4x64xf32> to vector<1x16xf32>
    %c20 = arith.constant 20 : index
    %c0_42 = arith.constant 0 : index
    %85 = vector.load %arg12[%c20, %c0_42] : memref<26x16xf32, #tpu.memory_space<vmem>>, vector<1x16xf32>
    tpu.vector_store %arg12[%c20, %c0_42], %84 {strides = array<i32>} : memref<26x16xf32, #tpu.memory_space<vmem>>, vector<1x16xf32>,
    %c0_43 = arith.constant 0 : index
    %c0_44 = arith.constant 0 : index
    %86 = vector.load %arg12[%c0_43, %c0_44] : memref<26x16xf32, #tpu.memory_space<vmem>>, vector<16x16xf32>
    %c0_45 = arith.constant 0 : index
    %c0_46 = arith.constant 0 : index
    %c0_47 = arith.constant 0 : index
    %87 = vector.load %arg10[%c0_45, %c0_46, %c0_47] : memref<9x16x1xf32, #tpu.memory_space<vmem>>, vector<1x16x1xf32>
    %88 = vector.shape_cast %87 : vector<1x16x1xf32> to vector<16x1xf32>
    %89 = vector.broadcast %88 : vector<16x1xf32> to vector<16x16xf32>
    %90 = arith.mulf %86, %89 : vector<16x16xf32>
    %c0_48 = arith.constant 0 : index
    %c0_49 = arith.constant 0 : index
    %91 = vector.load %arg13[%c0_48, %c0_49] : memref<16x144xf32, #tpu.memory_space<vmem>>, vector<16x16xf32>
    tpu.vector_store %arg13[%c0_48, %c0_49], %90 {strides = array<i32>} : memref<16x144xf32, #tpu.memory_space<vmem>>, vector<16x16xf32>,
    %c1 = arith.constant 1 : index
    %c0_50 = arith.constant 0 : index
    %92 = vector.load %arg12[%c1, %c0_50] : memref<26x16xf32, #tpu.memory_space<vmem>>, vector<16x16xf32>
    %c1_51 = arith.constant 1 : index
    %c0_52 = arith.constant 0 : index
    %c0_53 = arith.constant 0 : index
    %93 = vector.load %arg10[%c1_51, %c0_52, %c0_53] : memref<9x16x1xf32, #tpu.memory_space<vmem>>, vector<1x16x1xf32>
    %94 = vector.shape_cast %93 : vector<1x16x1xf32> to vector<16x1xf32>
    %95 = vector.broadcast %94 : vector<16x1xf32> to vector<16x16xf32>
    %96 = arith.mulf %92, %95 : vector<16x16xf32>
    %c0_54 = arith.constant 0 : index
    %c16_55 = arith.constant 16 : index
    %97 = vector.load %arg13[%c0_54, %c16_55] : memref<16x144xf32, #tpu.memory_space<vmem>>, vector<16x16xf32>
    tpu.vector_store %arg13[%c0_54, %c16_55], %96 {strides = array<i32>} : memref<16x144xf32, #tpu.memory_space<vmem>>, vector<16x16xf32>,
    %c2 = arith.constant 2 : index
    %c0_56 = arith.constant 0 : index
    %98 = vector.load %arg12[%c2, %c0_56] : memref<26x16xf32, #tpu.memory_space<vmem>>, vector<16x16xf32>
    %c2_57 = arith.constant 2 : index
    %c0_58 = arith.constant 0 : index
    %c0_59 = arith.constant 0 : index
    %99 = vector.load %arg10[%c2_57, %c0_58, %c0_59] : memref<9x16x1xf32, #tpu.memory_space<vmem>>, vector<1x16x1xf32>
    %100 = vector.shape_cast %99 : vector<1x16x1xf32> to vector<16x1xf32>
    %101 = vector.broadcast %100 : vector<16x1xf32> to vector<16x16xf32>
    %102 = arith.mulf %98, %101 : vector<16x16xf32>
    %c0_60 = arith.constant 0 : index
    %c32 = arith.constant 32 : index
    %103 = vector.load %arg13[%c0_60, %c32] : memref<16x144xf32, #tpu.memory_space<vmem>>, vector<16x16xf32>
    tpu.vector_store %arg13[%c0_60, %c32], %102 {strides = array<i32>} : memref<16x144xf32, #tpu.memory_space<vmem>>, vector<16x16xf32>,
    %c4 = arith.constant 4 : index
    %c0_61 = arith.constant 0 : index
    %104 = vector.load %arg12[%c4, %c0_61] : memref<26x16xf32, #tpu.memory_space<vmem>>, vector<16x16xf32>
    %c3 = arith.constant 3 : index
    %c0_62 = arith.constant 0 : index
    %c0_63 = arith.constant 0 : index
    %105 = vector.load %arg10[%c3, %c0_62, %c0_63] : memref<9x16x1xf32, #tpu.memory_space<vmem>>, vector<1x16x1xf32>
    %106 = vector.shape_cast %105 : vector<1x16x1xf32> to vector<16x1xf32>
    %107 = vector.broadcast %106 : vector<16x1xf32> to vector<16x16xf32>
    %108 = arith.mulf %104, %107 : vector<16x16xf32>
    %c0_64 = arith.constant 0 : index
    %c48 = arith.constant 48 : index
    %109 = vector.load %arg13[%c0_64, %c48] : memref<16x144xf32, #tpu.memory_space<vmem>>, vector<16x16xf32>
    tpu.vector_store %arg13[%c0_64, %c48], %108 {strides = array<i32>} : memref<16x144xf32, #tpu.memory_space<vmem>>, vector<16x16xf32>,
    %c5_65 = arith.constant 5 : index
    %c0_66 = arith.constant 0 : index
    %110 = vector.load %arg12[%c5_65, %c0_66] : memref<26x16xf32, #tpu.memory_space<vmem>>, vector<16x16xf32>
    %c4_67 = arith.constant 4 : index
    %c0_68 = arith.constant 0 : index
    %c0_69 = arith.constant 0 : index
    %111 = vector.load %arg10[%c4_67, %c0_68, %c0_69] : memref<9x16x1xf32, #tpu.memory_space<vmem>>, vector<1x16x1xf32>
    %112 = vector.shape_cast %111 : vector<1x16x1xf32> to vector<16x1xf32>
    %113 = vector.broadcast %112 : vector<16x1xf32> to vector<16x16xf32>
    %114 = arith.mulf %110, %113 : vector<16x16xf32>
    %c0_70 = arith.constant 0 : index
    %c64 = arith.constant 64 : index
    %115 = vector.load %arg13[%c0_70, %c64] : memref<16x144xf32, #tpu.memory_space<vmem>>, vector<16x16xf32>
    tpu.vector_store %arg13[%c0_70, %c64], %114 {strides = array<i32>} : memref<16x144xf32, #tpu.memory_space<vmem>>, vector<16x16xf32>,
    %c6_71 = arith.constant 6 : index
    %c0_72 = arith.constant 0 : index
    %116 = vector.load %arg12[%c6_71, %c0_72] : memref<26x16xf32, #tpu.memory_space<vmem>>, vector<16x16xf32>
    %c5_73 = arith.constant 5 : index
    %c0_74 = arith.constant 0 : index
    %c0_75 = arith.constant 0 : index
    %117 = vector.load %arg10[%c5_73, %c0_74, %c0_75] : memref<9x16x1xf32, #tpu.memory_space<vmem>>, vector<1x16x1xf32>
    %118 = vector.shape_cast %117 : vector<1x16x1xf32> to vector<16x1xf32>
    %119 = vector.broadcast %118 : vector<16x1xf32> to vector<16x16xf32>
    %120 = arith.mulf %116, %119 : vector<16x16xf32>
    %c0_76 = arith.constant 0 : index
    %c80 = arith.constant 80 : index
    %121 = vector.load %arg13[%c0_76, %c80] : memref<16x144xf32, #tpu.memory_space<vmem>>, vector<16x16xf32>
    tpu.vector_store %arg13[%c0_76, %c80], %120 {strides = array<i32>} : memref<16x144xf32, #tpu.memory_space<vmem>>, vector<16x16xf32>,
    %c8_77 = arith.constant 8 : index
    %c0_78 = arith.constant 0 : index
    %122 = vector.load %arg12[%c8_77, %c0_78] : memref<26x16xf32, #tpu.memory_space<vmem>>, vector<16x16xf32>
    %c6_79 = arith.constant 6 : index
    %c0_80 = arith.constant 0 : index
    %c0_81 = arith.constant 0 : index
    %123 = vector.load %arg10[%c6_79, %c0_80, %c0_81] : memref<9x16x1xf32, #tpu.memory_space<vmem>>, vector<1x16x1xf32>
    %124 = vector.shape_cast %123 : vector<1x16x1xf32> to vector<16x1xf32>
    %125 = vector.broadcast %124 : vector<16x1xf32> to vector<16x16xf32>
    %126 = arith.mulf %122, %125 : vector<16x16xf32>
    %c0_82 = arith.constant 0 : index
    %c96 = arith.constant 96 : index
    %127 = vector.load %arg13[%c0_82, %c96] : memref<16x144xf32, #tpu.memory_space<vmem>>, vector<16x16xf32>
    tpu.vector_store %arg13[%c0_82, %c96], %126 {strides = array<i32>} : memref<16x144xf32, #tpu.memory_space<vmem>>, vector<16x16xf32>,
    %c9_83 = arith.constant 9 : index
    %c0_84 = arith.constant 0 : index
    %128 = vector.load %arg12[%c9_83, %c0_84] : memref<26x16xf32, #tpu.memory_space<vmem>>, vector<16x16xf32>
    %c7_85 = arith.constant 7 : index
    %c0_86 = arith.constant 0 : index
    %c0_87 = arith.constant 0 : index
    %129 = vector.load %arg10[%c7_85, %c0_86, %c0_87] : memref<9x16x1xf32, #tpu.memory_space<vmem>>, vector<1x16x1xf32>
    %130 = vector.shape_cast %129 : vector<1x16x1xf32> to vector<16x1xf32>
    %131 = vector.broadcast %130 : vector<16x1xf32> to vector<16x16xf32>
    %132 = arith.mulf %128, %131 : vector<16x16xf32>
    %c0_88 = arith.constant 0 : index
    %c112 = arith.constant 112 : index
    %133 = vector.load %arg13[%c0_88, %c112] : memref<16x144xf32, #tpu.memory_space<vmem>>, vector<16x16xf32>
    tpu.vector_store %arg13[%c0_88, %c112], %132 {strides = array<i32>} : memref<16x144xf32, #tpu.memory_space<vmem>>, vector<16x16xf32>,
    %c10_89 = arith.constant 10 : index
    %c0_90 = arith.constant 0 : index
    %134 = vector.load %arg12[%c10_89, %c0_90] : memref<26x16xf32, #tpu.memory_space<vmem>>, vector<16x16xf32>
    %c8_91 = arith.constant 8 : index
    %c0_92 = arith.constant 0 : index
    %c0_93 = arith.constant 0 : index
    %135 = vector.load %arg10[%c8_91, %c0_92, %c0_93] : memref<9x16x1xf32, #tpu.memory_space<vmem>>, vector<1x16x1xf32>
    %136 = vector.shape_cast %135 : vector<1x16x1xf32> to vector<16x1xf32>
    %137 = vector.broadcast %136 : vector<16x1xf32> to vector<16x16xf32>
    %138 = arith.mulf %134, %137 : vector<16x16xf32>
    %c0_94 = arith.constant 0 : index
    %c128 = arith.constant 128 : index
    %139 = vector.load %arg13[%c0_94, %c128] : memref<16x144xf32, #tpu.memory_space<vmem>>, vector<16x16xf32>
    tpu.vector_store %arg13[%c0_94, %c128], %138 {strides = array<i32>} : memref<16x144xf32, #tpu.memory_space<vmem>>, vector<16x16xf32>,
    %c0_95 = arith.constant 0 : index
    %c0_96 = arith.constant 0 : index
    %140 = vector.load %arg13[%c0_95, %c0_96] : memref<16x144xf32, #tpu.memory_space<vmem>>, vector<16x144xf32>
    %c0_97 = arith.constant 0 : index
    %c0_98 = arith.constant 0 : index
    %141 = vector.load %arg5[%c0_97, %c0_98] : memref<144x16xbf16, #tpu.memory_space<vmem>>, vector<144x16xbf16>
    %142 = arith.truncf %140 : vector<16x144xf32> to vector<16x144xbf16>
    %cst_99 = arith.constant dense<0.000000e+00> : vector<16x16xf32>
    %143 = tpu.matmul %142, %141, %cst_99 {dimension_numbers = #tpu.dot_dimension_numbers<[1], [0], [0], [1], [0, 0, 1, 1], [], []>} : vector<16x144xbf16>, vector<144x16xbf16>, vector<16x16xf32> -> vector<16x16xf32>
    %c0_100 = arith.constant 0 : index
    %c0_101 = arith.constant 0 : index
    %144 = vector.load %arg6[%c0_100, %c0_101] : memref<1x16xf32, #tpu.memory_space<vmem>>, vector<1x16xf32>
    %145 = vector.broadcast %144 : vector<1x16xf32> to vector<16x16xf32>
    %146 = arith.mulf %143, %145 : vector<16x16xf32>
    %c0_102 = arith.constant 0 : index
    %c0_103 = arith.constant 0 : index
    %147 = vector.load %arg7[%c0_102, %c0_103] : memref<1x16xf32, #tpu.memory_space<vmem>>, vector<1x16xf32>
    %148 = vector.broadcast %147 : vector<1x16xf32> to vector<16x16xf32>
    %149 = arith.addf %146, %148 : vector<16x16xf32>
    %cst_104 = arith.constant 5.000000e-01 : f32
    %150 = vector.broadcast %cst_104 : f32 to vector<16x16xf32>
    %151 = arith.mulf %150, %149 : vector<16x16xf32>
    %cst_105 = arith.constant 0.707106769 : f32
    %152 = vector.broadcast %cst_105 : f32 to vector<16x16xf32>
    %153 = arith.mulf %149, %152 : vector<16x16xf32>
    %cst_106 = arith.constant 0.000000e+00 : f32
    %154 = vector.broadcast %cst_106 : f32 to vector<16x16xf32>
    %155 = arith.cmpf olt, %153, %154 : vector<16x16xf32>
    %cst_107 = arith.constant -1.000000e+00 : f32
    %cst_108 = arith.constant 1.000000e+00 : f32
    %156 = vector.broadcast %cst_107 : f32 to vector<16x16xf32>
    %157 = vector.broadcast %cst_108 : f32 to vector<16x16xf32>
    %158 = arith.select %155, %156, %157 : vector<16x16xi1>, vector<16x16xf32>
    %159 = math.absf %153 : vector<16x16xf32>
    %cst_109 = arith.constant 0.327591091 : f32
    %160 = vector.broadcast %cst_109 : f32 to vector<16x16xf32>
    %161 = arith.mulf %160, %159 : vector<16x16xf32>
    %cst_110 = arith.constant 1.000000e+00 : f32
    %162 = vector.broadcast %cst_110 : f32 to vector<16x16xf32>
    %163 = arith.addf %162, %161 : vector<16x16xf32>
    %cst_111 = arith.constant 1.000000e+00 : f32
    %164 = vector.broadcast %cst_111 : f32 to vector<16x16xf32>
    %165 = arith.divf %164, %163 : vector<16x16xf32>
    %cst_112 = arith.constant 1.06140542 : f32
    %166 = vector.broadcast %cst_112 : f32 to vector<16x16xf32>
    %167 = arith.mulf %166, %165 : vector<16x16xf32>
    %cst_113 = arith.constant -1.45315206 : f32
    %168 = vector.broadcast %cst_113 : f32 to vector<16x16xf32>
    %169 = arith.addf %167, %168 : vector<16x16xf32>
    %170 = arith.mulf %169, %165 : vector<16x16xf32>
    %cst_114 = arith.constant 1.42141378 : f32
    %171 = vector.broadcast %cst_114 : f32 to vector<16x16xf32>
    %172 = arith.addf %170, %171 : vector<16x16xf32>
    %173 = arith.mulf %172, %165 : vector<16x16xf32>
    %cst_115 = arith.constant -0.284496725 : f32
    %174 = vector.broadcast %cst_115 : f32 to vector<16x16xf32>
    %175 = arith.addf %173, %174 : vector<16x16xf32>
    %176 = arith.mulf %175, %165 : vector<16x16xf32>
    %cst_116 = arith.constant 0.254829586 : f32
    %177 = vector.broadcast %cst_116 : f32 to vector<16x16xf32>
    %178 = arith.addf %176, %177 : vector<16x16xf32>
    %179 = arith.mulf %178, %165 : vector<16x16xf32>
    %cst_117 = arith.constant 0.000000e+00 : f32
    %180 = vector.broadcast %cst_117 : f32 to vector<16x16xf32>
    %181 = arith.subf %180, %159 : vector<16x16xf32>
    %182 = arith.mulf %181, %159 : vector<16x16xf32>
    %183 = math.exp %182 : vector<16x16xf32>
    %184 = arith.mulf %179, %183 : vector<16x16xf32>
    %cst_118 = arith.constant 1.000000e+00 : f32
    %185 = vector.broadcast %cst_118 : f32 to vector<16x16xf32>
    %186 = arith.subf %185, %184 : vector<16x16xf32>
    %187 = arith.mulf %158, %186 : vector<16x16xf32>
    %cst_119 = arith.constant 1.000000e+00 : f32
    %188 = vector.broadcast %cst_119 : f32 to vector<16x16xf32>
    %189 = arith.addf %188, %187 : vector<16x16xf32>
    %190 = arith.mulf %151, %189 : vector<16x16xf32>
    %c0_120 = arith.constant 0 : index
    %c0_121 = arith.constant 0 : index
    %191 = vector.load %arg8[%c0_120, %c0_121] : memref<16x12xbf16, #tpu.memory_space<vmem>>, vector<16x12xbf16>
    %192 = arith.truncf %190 : vector<16x16xf32> to vector<16x16xbf16>
    %cst_122 = arith.constant dense<0.000000e+00> : vector<16x12xf32>
    %193 = tpu.matmul %192, %191, %cst_122 {dimension_numbers = #tpu.dot_dimension_numbers<[1], [0], [0], [1], [0, 0, 1, 1], [], []>} : vector<16x16xbf16>, vector<16x12xbf16>, vector<16x12xf32> -> vector<16x12xf32>
    %c0_123 = arith.constant 0 : index
    %c0_124 = arith.constant 0 : index
    %194 = vector.load %arg9[%c0_123, %c0_124] : memref<1x12xf32, #tpu.memory_space<vmem>>, vector<1x12xf32>
    %195 = vector.broadcast %194 : vector<1x12xf32> to vector<16x12xf32>
    %196 = arith.addf %193, %195 : vector<16x12xf32>
    %c0_125 = arith.constant 0 : index
    %c0_126 = arith.constant 0 : index
    %c0_127 = arith.constant 0 : index
    %197 = vector.load %arg11[%c0_125, %c0_126, %c0_127] : memref<1x16x12xf32, #tpu.memory_space<vmem>>, vector<1x16x12xf32>
    %198 = vector.shape_cast %197 : vector<1x16x12xf32> to vector<16x12xf32>
    %199 = vector.shape_cast %196 : vector<16x12xf32> to vector<1x16x12xf32>
    tpu.vector_store %arg11[%c0_125, %c0_126, %c0_127], %199 {strides = array<i32>} : memref<1x16x12xf32, #tpu.memory_space<vmem>>, vector<1x16x12xf32>,
    return
  }
  func.func @transform_0(%arg0: i32) -> (i32, i32, i32) {
    %c0_i32 = arith.constant 0 : i32
    %c0_i32_0 = arith.constant 0 : i32
    %c0_i32_1 = arith.constant 0 : i32
    return %arg0, %c0_i32, %c0_i32_0 : i32, i32, i32
  }
  func.func @transform_1(%arg0: i32) -> (i32, i32) {
    %c0_i32 = arith.constant 0 : i32
    %c0_i32_0 = arith.constant 0 : i32
    %c0_i32_1 = arith.constant 0 : i32
    return %c0_i32, %c0_i32_0 : i32, i32
  }
  func.func @transform_2(%arg0: i32) -> (i32, i32) {
    %c0_i32 = arith.constant 0 : i32
    %c0_i32_0 = arith.constant 0 : i32
    %c0_i32_1 = arith.constant 0 : i32
    return %c0_i32, %c0_i32_0 : i32, i32
  }
  func.func @transform_3(%arg0: i32) -> (i32, i32) {
    %c0_i32 = arith.constant 0 : i32
    %c0_i32_0 = arith.constant 0 : i32
    %c0_i32_1 = arith.constant 0 : i32
    return %c0_i32, %c0_i32_0 : i32, i32
  }
  func.func @transform_4(%arg0: i32) -> (i32, i32) {
    %c0_i32 = arith.constant 0 : i32
    %c0_i32_0 = arith.constant 0 : i32
    %c0_i32_1 = arith.constant 0 : i32
    return %c0_i32, %c0_i32_0 : i32, i32
  }
  func.func @transform_5(%arg0: i32) -> (i32, i32) {
    %c0_i32 = arith.constant 0 : i32
    %c0_i32_0 = arith.constant 0 : i32
    %c0_i32_1 = arith.constant 0 : i32
    return %c0_i32, %c0_i32_0 : i32, i32
  }
  func.func @transform_6(%arg0: i32) -> (i32, i32) {
    %c0_i32 = arith.constant 0 : i32
    %c0_i32_0 = arith.constant 0 : i32
    %c0_i32_1 = arith.constant 0 : i32
    return %c0_i32, %c0_i32_0 : i32, i32
  }
  func.func @transform_7(%arg0: i32) -> (i32, i32) {
    %c0_i32 = arith.constant 0 : i32
    %c0_i32_0 = arith.constant 0 : i32
    %c0_i32_1 = arith.constant 0 : i32
    return %c0_i32, %c0_i32_0 : i32, i32
  }
  func.func @transform_8(%arg0: i32) -> (i32, i32) {
    %c0_i32 = arith.constant 0 : i32
    %c0_i32_0 = arith.constant 0 : i32
    %c0_i32_1 = arith.constant 0 : i32
    return %c0_i32, %c0_i32_0 : i32, i32
  }
  func.func @transform_9(%arg0: i32) -> (i32, i32, i32) {
    %c0_i32 = arith.constant 0 : i32
    %c0_i32_0 = arith.constant 0 : i32
    %c0_i32_1 = arith.constant 0 : i32
    %c0_i32_2 = arith.constant 0 : i32
    return %c0_i32, %c0_i32_0, %c0_i32_1 : i32, i32, i32
  }
  func.func @transform_10(%arg0: i32) -> (i32, i32, i32) {
    %c0_i32 = arith.constant 0 : i32
    %c0_i32_0 = arith.constant 0 : i32
    %c0_i32_1 = arith.constant 0 : i32
    return %arg0, %c0_i32, %c0_i32_0 : i32, i32, i32
  }
}

</mosaic_0001>

<bundles_post_ra>
// kernel: tile.34
= control target key start
LH: loop header
LB: loop body
LE: loop exit
PB: predicated region body
PF: predicated region fallthrough
CT: control target
= control target key end

     0   :  { %s22_s0 = inlined_call_operand.vmem [shape: f32[16], index: 0, kind: input, shape index: {}]   ;;  %s23_s1 = inlined_call_operand.vmem [shape: f32[4,16], index: 1, kind: output, shape index: {}]  }
   0x1   :  { %v4_v0 = vld [vmem:[%s22_s0] ss:$0 sm:$0xff] }
   0x2   :  { %5 = vst [vmem:[%s23_s1] sm:$0xf] %v4_v0 }

// kernel: tile.35
= control target key start
LH: loop header
LB: loop body
LE: loop exit
PB: predicated region body
PF: predicated region fallthrough
CT: control target
= control target key end

     0   :  { %s37_s8 = smov 16   ;;  %s38_s9 = smov 32   ;;  %vm7_vm0 = vcmask 130048   ;;  %vm13_vm1 = vcmask 523648   ;;  %vm19_vm2 = vcmask 392448   ;;  %vm25_vm3 = vcmask 261248   ;;  %s55_s0 = inlined_call_operand.vmem [shape: f32[4,16], index: 0, kind: input, shape index: {}]   ;;  %s56_s1 = inlined_call_operand.vmem [shape: f32[1,64], index: 1, kind: output, shape index: {}]  }
   0x1   :  { %v4_v0 = vld [vmem:[%s55_s0] sm:$0xf]  ;;  %s36_s0 = smov 48  }
   0x2   :  { %5 = vst [vmem:[#allocation1] sm:$0xf] %v4_v0 }
   0x9   :  { %v10_v1 = vld [vmem:[#allocation1 + $0x3] sm:$0x1]   ;;  %v22_v2 = vld [vmem:[#allocation1 + $0x1] sm:$0x1]   ;;  %v16_v3 = vld [vmem:[#allocation1 + $0x2] sm:$0x1]  }
   0xa   :  { %11 = vrot.lane.b32.xlu0 %v10_v1, %s36_s0  ;;  %23 = vrot.lane.b32.xlu1 %v22_v2, %s37_s8  ;;  %v6_v4 = vld [vmem:[#allocation1] sm:$0x1]  }
   0xb   :  { %8 = vst.msk [vmem:[#allocation0] sm:$0x1] %vm7_vm0, %v6_v4  }
  0x12   :  { %17 = vrot.lane.b32.xlu0 %v16_v3, %s38_s9 }
  0x7c   :  { %v12_v5 = vpop.permute.xlu0 %11   ;;  %v24_v6 = vpop.permute.xlu1 %23  }
  0x7d   :  { %14 = vst.msk [vmem:[#allocation0] sm:$0x1] %vm13_vm1, %v12_v5  }
  0x84   :  { %v18_v7 = vpop.permute.xlu0 %17  }
  0x85   :  { %20 = vst.msk [vmem:[#allocation0] sm:$0x1] %vm19_vm2, %v18_v7  }
  0x86   :  { %26 = vst.msk [vmem:[#allocation0] sm:$0x1] %vm25_vm3, %v24_v6  }
  0x8d   :  { %v29_v8 = vld [vmem:[#allocation0] sm:$0x1] }
  0x8e   :  { %32 = vst [vmem:[%s56_s1] sm:$0x1] %v29_v8 }

// kernel: tile.44
= control target key start
LH: loop header
LB: loop body
LE: loop exit
PB: predicated region body
PF: predicated region fallthrough
CT: control target
= control target key end

     0   :  { %s22_s0 = inlined_call_operand.vmem [shape: f32[3], index: 0, kind: input, shape index: {}]   ;;  %s23_s1 = inlined_call_operand.vmem [shape: f32[4,3], index: 1, kind: output, shape index: {}]  }
   0x1   :  { %v4_v0 = vld [vmem:[%s22_s0] ss:$0 sm:$0xff] }
   0x2   :  { %5 = vst [vmem:[%s23_s1] sm:$0xf] %v4_v0 }

// kernel: tile.45
= control target key start
LH: loop header
LB: loop body
LE: loop exit
PB: predicated region body
PF: predicated region fallthrough
CT: control target
= control target key end

     0   :  { %s37_s8 = smov 3   ;;  %s38_s9 = smov 6   ;;  %vm7_vm0 = vcmask 23552   ;;  %vm13_vm1 = vcmask 97352   ;;  %vm19_vm2 = vcmask 72752   ;;  %vm25_vm3 = vcmask 48152   ;;  %s55_s0 = inlined_call_operand.vmem [shape: f32[4,3], index: 0, kind: input, shape index: {}]   ;;  %s56_s1 = inlined_call_operand.vmem [shape: f32[1,12], index: 1, kind: output, shape index: {}]  }
   0x1   :  { %v4_v0 = vld [vmem:[%s55_s0] sm:$0xf]  ;;  %s36_s0 = smov 9  }
   0x2   :  { %5 = vst [vmem:[#allocation1] sm:$0xf] %v4_v0 }
   0x9   :  { %v10_v1 = vld [vmem:[#allocation1 + $0x3] sm:$0x1]   ;;  %v22_v2 = vld [vmem:[#allocation1 + $0x1] sm:$0x1]   ;;  %v16_v3 = vld [vmem:[#allocation1 + $0x2] sm:$0x1]  }
   0xa   :  { %11 = vrot.lane.b32.xlu0 %v10_v1, %s36_s0  ;;  %23 = vrot.lane.b32.xlu1 %v22_v2, %s37_s8  ;;  %v6_v4 = vld [vmem:[#allocation1] sm:$0x1]  }
   0xb   :  { %8 = vst.msk [vmem:[#allocation0] sm:$0x1] %vm7_vm0, %v6_v4  }
  0x12   :  { %17 = vrot.lane.b32.xlu0 %v16_v3, %s38_s9 }
  0x7c   :  { %v12_v5 = vpop.permute.xlu0 %11   ;;  %v24_v6 = vpop.permute.xlu1 %23  }
  0x7d   :  { %14 = vst.msk [vmem:[#allocation0] sm:$0x1] %vm13_vm1, %v12_v5  }
  0x84   :  { %v18_v7 = vpop.permute.xlu0 %17  }
  0x85   :  { %20 = vst.msk [vmem:[#allocation0] sm:$0x1] %vm19_vm2, %v18_v7  }
  0x86   :  { %26 = vst.msk [vmem:[#allocation0] sm:$0x1] %vm25_vm3, %v24_v6  }
  0x8d   :  { %v29_v8 = vld [vmem:[#allocation0] sm:$0x1] }
  0x8e   :  { %32 = vst [vmem:[%s56_s1] sm:$0x1] %v29_v8 }

// kernel: dofa_forward.6
= control target key start
LH: loop header
LB: loop body
LE: loop exit
PB: predicated region body
PF: predicated region fallthrough
CT: control target
= control target key end

     0   :  { %s759_s21 = smov 0   ;;  %s841_s0 = inlined_call_operand.vmem [shape: f32[2,4,32], index: 0, kind: input, shape index: {}]   ;;  %s842_s1 = inlined_call_operand.vmem [shape: f32[2,1,16], index: 1, kind: input, shape index: {}]   ;;  %s843_s2 = inlined_call_operand.vmem [shape: bf16[32,32], index: 2, kind: input, shape index: {}]   ;;  %s844_s3 = inlined_call_operand.vmem [shape: f32[1,32], index: 3, kind: input, shape index: {}]   ;;  %s845_s4 = inlined_call_operand.vmem [shape: bf16[32,32], index: 4, kind: input, shape index: {}]   ;;  %s846_s5 = inlined_call_operand.vmem [shape: f32[1,32], index: 5, kind: input, shape index: {}]   ;;  %s847_s6 = inlined_call_operand.vmem [shape: f32[2,4,32], index: 6, kind: output, shape index: {}]  }
   0x1 LB: > { %s638_s22 = sadd.s32 4294967295, %s711_s21   ;;  %p642_p0 = scmp.ge.s32.totalorder %s711_s21, 1  ;;  %s711_s21 = sphi %s759_s21, %s16_s21  }
   0x2   : > { %p219_p1 = scmp.lt.s32.totalorder %s711_s21, 3 }
   0x4   : > { %p220_p2 = pnand %p642_p0, %p219_p1 }
   0x5   : > { %p250_p3 = scmp.lt.s32.totalorder (!%p220_p2), %s638_s22, 1  ;;  %s713_s9 = smov (!%p220_p2), 124  }
   0x6   : > { %223 = sbr.rel (%p220_p2) target bundleno = 1076 (0x434), region = 44  ;;  %s714_s10 = smov (!%p220_p2), 112  }
   0x7   : > { %s715_s11 = smov (!%p220_p2), 104   ;;  %s716_s12 = smov (!%p220_p2), 120  }
   0x8   : > { %s717_s13 = smov (!%p220_p2), 108   ;;  %s718_s14 = smov (!%p220_p2), 100  }
   0x9   : > { %s719_s15 = smov (!%p220_p2), 116   ;;  %s721_s23 = smov (!%p220_p2), 8  }
   0xa   : > { %s722_s24 = smov (!%p220_p2), 24   ;;  %s723_s25 = smov (!%p220_p2), 16  }
   0xb   : > { %v672_v0 = vld [vmem:[%s843_s2 + $0x8] sm:$0xff]  ;;  %v671_v1 = vld [vmem:[%s843_s2] sm:$0xff]  ;;  %s849_s22 = smov (!%p250_p3, %s638_s22), 1  ;;  %vm284_vm0 = vcmask 261120   ;;  %vm301_vm1 = vcmask 27648   ;;  %vm354_vm2 = vcmask 31744   ;;  %v397_v19 = vlaneseq }
   0xc   : > { %294 = vmatpush.bf16.msra.mxu0 %v672_v0  ;;  %s643_s27 = sshll.u32 %s849_s22, 2  ;;  %v694_v4 = vld [vmem:[%s844_s3] ss:$0 sm:$0xff]  ;;  %s256_s18 = scalar_lea.vmem %s842_s1, %s849_s22  ;;  %v720_v21 = vmov 0  }
   0xd   : > { %s253_s30 = scalar_lea.vmem %s841_s0, %s643_s27  ;;  %v401_v20 = vand.u32 127, %v397_v19  ;;  %v398_v28 = vshrl.u32 %v397_v19, 7  ;;  %v695_v44 = vld [vmem:[%s256_s18] ss:$0 sm:$0xff] }
   0xe   : > { %v781_v2 = vld [vmem:[%s253_s30] sm:$0xf] }
   0xf   : > { %v267_v3 = vpack.c.bf16 %v781_v2, %v781_v2  ;;  %vm406_vm3 = vcmp.ge.s32.totalorder %v401_v20, 2  ;;  %vm414_vm4 = vcmp.ge.s32.totalorder %v401_v20, 4  ;;  %vm423_vm5 = vcmp.ge.s32.totalorder %v401_v20, 6  ;;  %v673_v19 = vld [vmem:[%s845_s4] sm:$0xff] }
  0x10   : > { %295 = vmatpush.bf16.msra.mxu0 %v671_v1  ;;  %v407_v22 = vsel %vm406_vm3, 1, %v720_v21  ;;  %v415_v23 = vsel %vm414_vm4, 1, %v720_v21  ;;  %v424_v25 = vsel %vm423_vm5, 1, %v720_v21  ;;  %vm432_vm6 = vcmp.ge.s32.totalorder %v401_v20, 8 }
  0x11   : > { %v416_v24 = vadd.s32 %v415_v23, %v407_v22  ;;  %v433_v27 = vsel %vm432_vm6, 1, %v720_v21  ;;  %vm441_vm7 = vcmp.ge.s32.totalorder %v401_v20, 10  ;;  %vm402_vm8 = vcmp.ge.s32.totalorder %v398_v28, 2 }
  0x12   : > { %v442_v30 = vsel %vm441_vm7, 1, %v720_v21  ;;  %vm408_vm9 = vcmp.ge.s32.totalorder %v398_v28, 4  ;;  %vm450_vm10 = vcmp.ge.s32.totalorder %v401_v20, 12  ;;  %v399_v31 = vadd.s32 8, %v398_v28 }
  0x13   : > { %653 = vmatmul.msk.bf16.vlgmr.msra.gmra.mxu0 %vm284_vm0, %v267_v3  ;;  %v425_v26 = vadd.s32 %v424_v25, %v416_v24  ;;  %v404_v33 = vsel %vm402_vm8, 1, %v720_v21  ;;  %v410_v34 = vsel %vm408_vm9, 1, %v720_v21  ;;  %v451_v35 = vsel %vm450_vm10, 1, %v720_v21  ;;  %v696_v25 = vld [vmem:[%s846_s5] ss:$0 sm:$0xff] }
  0x14   : > { %vm417_vm11 = vcmp.ge.s32.totalorder %v398_v28, 6  ;;  %vm459_vm12 = vcmp.ge.s32.totalorder %v401_v20, 14  ;;  %vm436_vm13 = vcmp.ge.s32.totalorder %v399_v31, 10  ;;  %v412_v36 = vadd.s32 %v410_v34, %v404_v33 }
  0x15   : > { %v434_v29 = vadd.s32 %v433_v27, %v425_v26  ;;  %v419_v38 = vsel %vm417_vm11, 1, %v720_v21  ;;  %v460_v39 = vsel %vm459_vm12, 1, %v720_v21  ;;  %v438_v40 = vsel %vm436_vm13, 1, %v720_v21 }
  0x16   : > { %vm445_vm14 = vcmp.ge.s32.totalorder %v399_v31, 12  ;;  %v421_v41 = vadd.s32 %v419_v38, %v412_v36  ;;  %v440_v43 = vadd.s32 4, %v438_v40  ;;  %vm454_vm15 = vcmp.ge.s32.totalorder %v399_v31, 14 }
  0x17   : > { %v443_v32 = vadd.s32 %v442_v30, %v434_v29  ;;  %v447_v45 = vsel %vm445_vm14, 1, %v720_v21  ;;  %v456_v50 = vsel %vm454_vm15, 1, %v720_v21  ;;  %vm332_vm4 = vcmask 60416  }
  0x18   : > { %v449_v48 = vadd.s32 %v447_v45, %v440_v43  ;;  %333 = vst.msk [vmem:[#allocation4] sm:$0xf] %vm332_vm4, %v781_v2  ;;  %vm523_vm5 = vcmask 130116   ;;  %vm529_vm6 = vcmask 191616   ;;  %vm534_vm7 = vcmask 261316  }
  0x19   : > { %v452_v37 = vadd.s32 %v451_v35, %v443_v32  ;;  %vm574_vm8 = vcmask 257024  }
  0x1a   : > { %v458_v53 = vadd.s32 %v456_v50, %v449_v48 }
  0x1b   : > { %v461_v42 = vadd.s32 %v460_v39, %v452_v37 }
  0x1d   : > { %vm463_vm3 = vcmp.eq.s32.totalorder %v458_v53, %v461_v42 }
  0x90   : > { %v297_v5 = vpop.f32.mrf.mxu0 }
  0x91   : > { %v298_v6 = vadd.f32 %v694_v4, %v297_v5 }
  0x93   : > { %304 = vrot.lane.b32.xlu2 %v298_v6, %s713_s9  ;;  %316 = vrot.lane.b32.xlu1 %v298_v6, %s714_s10  ;;  %302 = vst.msk [vmem:[#allocation2] sm:$0xf] %vm301_vm1, %v298_v6 }
  0x94   : > { %324 = vrot.lane.b32.xlu0 %v298_v6, %s715_s11 }
  0x98   : > { %v299_v7 = vpop.f32.mrf.mxu0 }
  0x9b   : > { %308 = vrot.lane.b32.xlu2 %v298_v6, %s716_s12  ;;  %320 = vrot.lane.b32.xlu1 %v298_v6, %s717_s13 }
  0x9c   : > { %328 = vrot.lane.b32.xlu0 %v298_v6, %s718_s14 }
  0xa4   : > { %312 = vrot.lane.b32.xlu0 %v298_v6, %s719_s15 }
  0xac   : > { %339 = vrot.lane.b32.xlu0 %v781_v2, %s714_s10 }
  0xb4   : > { %343 = vrot.lane.b32.xlu0 %v781_v2, %s715_s11  ;;  %s260_s11 = scalar_lea.vmem %s847_s6, %s643_s27 }
  0xed   : > { %v305_v8 = vpop.permute.xlu2 %304 }
  0xee   : > { %307 = vst.msk [vmem:[#allocation2 + $0x4] sm:$0xf] %vm301_vm1, %v305_v8 }
  0xf5   : > { %v309_v9 = vpop.permute.xlu2 %308  ;;  %v347_v17 = vld [vmem:[#allocation2] sm:$0xff] }
  0xf6   : > { %311 = vst.msk [vmem:[#allocation2 + $0x8] sm:$0xf] %vm301_vm1, %v309_v9 }
 0x105   : > { %v317_v10 = vpop.permute.xlu1 %316 }
 0x106   : > { %319 = vst.msk [vmem:[#allocation3] sm:$0xf] %vm301_vm1, %v317_v10  ;;  %v325_v11 = vpop.permute.xlu0 %324 }
 0x107   : > { %327 = vst.msk [vmem:[#allocation3 + $0x8] sm:$0xf] %vm301_vm1, %v325_v11 }
 0x10d   : > { %v321_v12 = vpop.permute.xlu1 %320 }
 0x10e   : > { %323 = vst.msk [vmem:[#allocation3 + $0x4] sm:$0xf] %vm301_vm1, %v321_v12  ;;  %v329_v13 = vpop.permute.xlu0 %328 }
 0x10f   : > { %331 = vst.msk [vmem:[#allocation3 + $0xc] sm:$0xf] %vm301_vm1, %v329_v13 }
 0x115   : > { %v349_v16 = vld [vmem:[#allocation3] sm:$0xff] }
 0x116   : > { %v313_v14 = vpop.permute.xlu0 %312  ;;  %v350_v15 = vld [vmem:[#allocation3 + $0x8] sm:$0xff] }
 0x117   : > { %315 = vst.msk [vmem:[#allocation2 + $0xc] sm:$0xf] %vm301_vm1, %v313_v14  ;;  %654 = vmatpush.xpose.msk.msra.mxu1 %vm354_vm2, %v350_v15  ;;  %vm462_vm1 = vcmp.eq.s32.totalorder %v421_v41, %v461_v42 }
 0x11b   : > { %655 = vmatpush.xpose.msk.msra.mxu1 %vm354_vm2, %v349_v16 }
 0x11e   : > { %656 = vmatmul.msk.f32.vlgmr.msra.gmra.mxu1 %vm354_vm2, %v347_v17  ;;  %v348_v18 = vld [vmem:[#allocation2 + $0x8] sm:$0xff]  ;;  %v340_v59 = vpop.permute.xlu0 %339 }
 0x11f   : > { %342 = vst.msk [vmem:[#allocation4 + $0x8] sm:$0xf] %vm332_vm4, %v340_v59 }
 0x126   : > { %657 = vmatmul.msk.f32.gmra.mxu1 %vm354_vm2, %v348_v18  ;;  %vm466_vm2 = vcmask 130048   ;;  %v344_v60 = vpop.permute.xlu0 %343  ;;  %v674_v18 = vld [vmem:[%s845_s4 + $0x8] sm:$0xff] }
 0x127   : > { %346 = vst.msk [vmem:[#allocation4 + $0xc] sm:$0xf] %vm332_vm4, %v344_v60  ;;  %567 = vmatpush.bf16.msra.mxu3 %v674_v18 }
 0x12b   : > { %568 = vmatpush.bf16.msra.mxu3 %v673_v19 }
 0x12e   : > { %v352_v0 = vld [vmem:[#allocation4 + $0x8] sm:$0xff] }
 0x12f   : > { %509 = vmatpush.msra.mxu2 %v352_v0 }
 0x19b   : > { %v384_v46 = vpop.f32.mrf.mxu1 }
 0x19c   : > { %v390_v47 = vmul.f32 0.5, %v384_v46 }
 0x19e   : > { %v395_v49 = vadd.f32 %v695_v44, %v390_v47 }
 0x1a0   : > { %v464_v51 = vsel %vm462_vm1, %v395_v49, -1e+30 }
 0x1a1   : > { %v467_v52 = vsel %vm466_vm2, %v464_v51, -inf }
 0x1a2   : > { %468 = vmax.xlane.f32.xlu1 %v467_v52 }
 0x1a3   : > { %v387_v54 = vpop.f32.mrf.mxu1 }
 0x1a4   : > { %v391_v55 = vmul.f32 0.5, %v387_v54 }
 0x1a6   : > { %v396_v56 = vadd.f32 %v695_v44, %v391_v55 }
 0x1a8   : > { %v465_v57 = vsel %vm463_vm3, %v396_v56, -1e+30 }
 0x1a9   : > { %v470_v58 = vsel %vm466_vm2, %v465_v57, -inf }
 0x1aa   : > { %471 = vmax.xlane.f32.xlu2 %v470_v58 }
 0x1c2   : > { %335 = vrot.lane.b32.xlu2 %v781_v2, %s716_s12 }
 0x215   : > { %v469_v61 = vpop.xlane.xlu1 %468 }
 0x216   : > { %v473_v62 = vsub.f32 %v464_v51, %v469_v61 }
 0x218   : > { %v475_v63 = vmul.f32 1.442695, %v473_v62 }
 0x21a   : > { %697 = vpow2.f32 %v475_v63 }
 0x21d   : > { %v472_v1 = vpop.xlane.xlu2 %471 }
 0x21e   : > { %v474_v3 = vsub.f32 %v465_v57, %v472_v1 }
 0x220   : > { %v698_v4 = vpop.eup %697  ;;  %v477_v5 = vmul.f32 1.442695, %v474_v3 }
 0x221   : > { %v479_v6 = vsel %vm466_vm2, %v698_v4, 0.0 }
 0x222   : > { %699 = vpow2.f32 %v477_v5  ;;  %480 = vadd.xlane.f32.xlu0 %v479_v6 }
 0x225   : > { %v336_v8 = vpop.permute.xlu2 %335 }
 0x226   : > { %338 = vst.msk [vmem:[#allocation4 + $0x4] sm:$0xf] %vm332_vm4, %v336_v8 }
 0x228   : > { %v700_v2 = vpop.eup %699 }
 0x229   : > { %v482_v7 = vsel %vm466_vm2, %v700_v2, 0.0 }
 0x22a   : > { %483 = vadd.xlane.f32.xlu1 %v482_v7 }
 0x22d   : > { %v351_v9 = vld [vmem:[#allocation4] sm:$0xff] }
 0x22e   : > { %510 = vmatpush.msra.mxu2 %v351_v9 }
 0x295   : > { %v481_v10 = vpop.xlane.xlu0 %480 }
 0x296   : > { %701 = vrcp.f32 %v481_v10 }
 0x29c   : > { %v702_v11 = vpop.eup %701 }
 0x29d   : > { %v484_v12 = vpop.xlane.xlu1 %483  ;;  %v487_v13 = vmul.f32 %v702_v11, %v698_v4 }
 0x29e   : > { %703 = vrcp.f32 %v484_v12 }
 0x29f   : > { %658 = vmatmul.msk.f32.vlgmr.msra.gmra.mxu2 %vm466_vm2, %v487_v13 }
 0x2a4   : > { %v704_v14 = vpop.eup %703 }
 0x2a5   : > { %v488_v15 = vmul.f32 %v704_v14, %v700_v2 }
 0x2a7   : > { %659 = vmatmul.msk.f32.gmra.mxu2 %vm466_vm2, %v488_v15 }
 0x322   : > { %v512_v16 = vpop.f32.mrf.mxu2 }
 0x323   : > { %518 = vst.msk [vmem:[#allocation5] sm:$0xf] %vm332_vm4, %v512_v16  ;;  %520 = vrot.lane.b32.xlu1 %v512_v16, %s721_s23 }
 0x32a   : > { %v515_v17 = vpop.f32.mrf.mxu2 }
 0x32b   : > { %531 = vrot.lane.b32.xlu0 %v515_v17, %s722_s24  ;;  %526 = vrot.lane.b32.xlu2 %v515_v17, %s723_s25 }
 0x385   : > { %v527_v21 = vpop.permute.xlu2 %526 }
 0x395   : > { %v521_v20 = vpop.permute.xlu1 %520 }
 0x396   : > { %524 = vst.msk [vmem:[#allocation5 - $0x4] sm:$0xf0] %vm523_vm5, %v521_v20 }
 0x397   : > { %530 = vst.msk [vmem:[#allocation5] sm:$0xf] %vm529_vm6, %v527_v21 }
 0x39d   : > { %v532_v22 = vpop.permute.xlu0 %531 }
 0x39e   : > { %535 = vst.msk [vmem:[#allocation5 - $0x4] sm:$0xf0] %vm534_vm7, %v532_v22 }
 0x3a5   : > { %v536_v23 = vld [vmem:[#allocation5] sm:$0xf] }
 0x3a6   : > { %v541_v24 = vpack.c.bf16 %v536_v23, %v536_v23 }
 0x3a8   : > { %668 = vmatmul.msk.bf16.vlgmr.msra.gmra.mxu3 %vm284_vm0, %v541_v24 }
 0x42b   : > { %v570_v26 = vpop.f32.mrf.mxu3 }
 0x42c   : > { %v571_v27 = vadd.f32 %v696_v25, %v570_v26 }
 0x42e   : > { %575 = vst.msk [vmem:[%s260_s11] sm:$0xf] %vm574_vm8, %v571_v27 }
 0x433   : > { %v572_v28 = vpop.f32.mrf.mxu3 }
 0x434 PF: > { %s16_s21 = sadd.s32 1, %s711_s21  }
 0x435   : > { %p13_p4 = scmp.ge.s32.totalorder %s16_s21, 4  }
 0x437   :  { %15 = sbr.rel (!%p13_p4) target bundleno = 1 (0x1), region = 77 }

// kernel: dofa_forward.4
= control target key start
LH: loop header
LB: loop body
LE: loop exit
PB: predicated region body
PF: predicated region fallthrough
CT: control target
= control target key end

     0   :  { %vm86_vm0 = vcmask 130048   ;;  %v138_v14 = vlaneseq  ;;  %v1249_v23 = vmov 0.0   ;;  %vm183_vm2 = vcmask 31744   ;;  %s1250_s23 = smov 104   ;;  %s1255_s25 = smov 120   ;;  %s1663_s1 = inlined_call_operand.vmem [shape: bf16[16,16], index: 1, kind: input, shape index: {}]   ;;  %s1664_s0 = inlined_call_operand.vmem [shape: f32[13,16], index: 0, kind: input, shape index: {}]   ;;  %s1665_s2 = inlined_call_operand.vmem [shape: f32[1,16], index: 2, kind: input, shape index: {}]   ;;  %s1666_s4 = inlined_call_operand.vmem [shape: f32[1,16], index: 4, kind: input, shape index: {}]   ;;  %s1667_s3 = inlined_call_operand.vmem [shape: bf16[16,16], index: 3, kind: input, shape index: {}]   ;;  %s1668_s6 = inlined_call_operand.vmem [shape: f32[1,48], index: 6, kind: input, shape index: {}]   ;;  %s1669_s5 = inlined_call_operand.vmem [shape: bf16[16,48], index: 5, kind: input, shape index: {}]   ;;  %s1670_s8 = inlined_call_operand.vmem [shape: f32[1,16], index: 8, kind: input, shape index: {}]   ;;  %s1671_s7 = inlined_call_operand.vmem [shape: bf16[16,16], index: 7, kind: input, shape index: {}]   ;;  %s1672_s9 = inlined_call_operand.vmem [shape: f32[1,16], index: 9, kind: input, shape index: {}]   ;;  %s1673_s10 = inlined_call_operand.vmem [shape: f32[1,16], index: 10, kind: input, shape index: {}]   ;;  %s1674_s14 = inlined_call_operand.vmem [shape: f32[1,32], index: 14, kind: input, shape index: {}]   ;;  %s1675_s13 = inlined_call_operand.vmem [shape: bf16[16,32], index: 13, kind: input, shape index: {}]   ;;  %s1676_s15 = inlined_call_operand.vmem [shape: bf16[32,16], index: 15, kind: input, shape index: {}]   ;;  %s1677_s16 = inlined_call_operand.vmem [shape: f32[1,16], index: 16, kind: input, shape index: {}]   ;;  %s1678_s11 = inlined_call_operand.vmem [shape: f32[1,16], index: 11, kind: input, shape index: {}]   ;;  %s1679_s12 = inlined_call_operand.vmem [shape: f32[1,16], index: 12, kind: input, shape index: {}]   ;;  %s1680_s17 = inlined_call_operand.vmem [shape: bf16[16,512], index: 17, kind: input, shape index: {}]   ;;  %s1681_s19 = inlined_call_operand.vmem [shape: bf16[16,32], index: 19, kind: input, shape index: {}]   ;;  %s1682_s18 = inlined_call_operand.vmem [shape: f32[1,512], index: 18, kind: input, shape index: {}]   ;;  %s1683_s21 = inlined_call_operand.vmem [shape: f32[4,512], index: 21, kind: output, shape index: {0}]   ;;  %s1684_s20 = inlined_call_operand.vmem [shape: f32[1,32], index: 20, kind: input, shape index: {}]   ;;  %s1685_s22 = inlined_call_operand.vmem [shape: f32[1,32], index: 22, kind: output, shape index: {1}]  }
   0x1   :  { %1687 = sst [smem:[#allocation6_spill]] %s1663_s1  ;;  %vm185_vm3 = vcmask 28672   ;;  %vm570_vm4 = vcmask 1043456   ;;  %vm470_vm9 = vcmask 424960   ;;  %s1262_s28 = smov 4  }
   0x2   :  { %1688 = sst [smem:[#allocation7_spill]] %s1664_s0  ;;  %v1406_v16 = vshrl.u32 %v138_v14, 7  ;;  %s1251_s0 = smov 108  }
   0x3   :  { %1689 = sst [smem:[#allocation8_spill]] %s1665_s2  ;;  %s1259_s2 = smov 88  }
   0x4   :  { %1690 = sst [smem:[#allocation9_spill]] %s1666_s4  ;;  %v1409_v19 = vadd.s32 8, %v1406_v16  ;;  %s1261_s4 = smov 96  }
   0x5   :  { %1691 = sst [smem:[#allocation10_spill]] %s1667_s3  ;;  %s1264_s30 = smov 12  }
   0x6   :  { %1692 = sst [smem:[#allocation11_spill]] %s1668_s6  ;;  %vm144_vm1 = vcmp.lt.s32.totalorder %v1409_v19, 12  ;;  %s1252_s6 = smov 100   ;;  %vm393_vm10 = vcmp.ge.s32.totalorder %v1409_v19, 13  ;;  %v387_v19 = vadd.s32 32, %v1406_v16 }
   0x7   :  { %1693 = sst [smem:[#allocation12_spill]] %s1669_s5  ;;  %v148_v24 = vsel %vm144_vm1, 1.0, %v1249_v23  ;;  %s1254_s5 = smov 124  }
   0x8   :  { %1694 = sst [smem:[#allocation13_spill]] %s1679_s12  ;;  %vm436_vm14 = vcmp.ge.s32.totalorder %v387_v19, 39 }
   0x9   :  { %s1695_s29 = sld [smem:[#allocation6_spill]] }
   0xa   :  { %s1696_s12 = sld [smem:[#allocation7_spill]] }
   0xb   :  { %s1697_s24 = sld [smem:[#allocation10_spill]] }
   0xc   :  { %s1698_s26 = sld [smem:[#allocation8_spill]] }
   0xd   :  { %s1699_s27 = sld [smem:[#allocation12_spill]] }
   0xe   :  { %s1701_s1 = sld [smem:[#allocation11_spill]] }
   0xf   :  { %v1165_v0 = vld [vmem:[%s1695_s29] sm:$0xff]  ;;  %s1700_s29 = sld [smem:[#allocation9_spill]] }
  0x10   :  { %v71_v1 = vld [vmem:[%s1696_s12] sm:$0xff]  ;;  %v72_v2 = vld [vmem:[%s1696_s12 + $0x8] sm:$0x1f]  ;;  %97 = vmatpush.bf16.msra.mxu0 %v1165_v0  ;;  %s1257_s12 = smov 84  }
  0x11   :  { %v75_v3 = vpack.c.bf16 %v72_v2, %v71_v1  ;;  %v1166_v4 = vld [vmem:[%s1697_s24] sm:$0xff]  ;;  %s1253_s24 = smov 112  }
  0x12   :  { %129 = vmatpush.bf16.msra.mxu1 %v1166_v4  ;;  %v1195_v6 = vld [vmem:[%s1698_s26] ss:$0 sm:$0xff]  ;;  %s1256_s26 = smov 116  }
  0x13   :  { %1084 = vmatmul.msk.bf16.vlgmr.msra.gmra.mxu0 %vm86_vm0, %v75_v3  ;;  %v1167_v13 = vld [vmem:[%s1699_s27] sm:$0xff]  ;;  %v1258_v3 = vmov 0   ;;  %s1260_s27 = smov 92  }
  0x14   :  { %176 = vmatpush.bf16.msra.mxu2 %v1167_v13  ;;  %v1197_v31 = vld [vmem:[%s1701_s1] ss:$0 sm:$0xff]  ;;  %v400_v13 = vsel %vm393_vm10, 1, %v1258_v3  ;;  %vm654_vm10 = vcmask 130151  }
  0x15   :  { %v1196_v15 = vld [vmem:[%s1700_s29] ss:$0 sm:$0xff]  ;;  %s1263_s29 = smov 8  }
  0x90   :  { %v99_v5 = vpop.f32.mrf.mxu0 }
  0x91   :  { %v100_v7 = vadd.f32 %v1195_v6, %v99_v5 }
  0x93   :  { %v104_v10 = vmax.f32 %v100_v7, 0.0 }
  0x98   :  { %v101_v8 = vpop.f32.mrf.mxu0 }
  0x99   :  { %v102_v9 = vadd.f32 %v1195_v6, %v101_v8 }
  0x9b   :  { %v105_v11 = vmax.f32 %v102_v9, 0.0 }
  0x9d   :  { %v108_v12 = vpack.c.bf16 %v105_v11, %v104_v10 }
  0x9f   :  { %1089 = vmatmul.msk.bf16.vlgmr.msra.gmra.mxu1 %vm86_vm0, %v108_v12 }
 0x11c   :  { %v131_v17 = vpop.f32.mrf.mxu1 }
 0x11d   :  { %v132_v18 = vadd.f32 %v1196_v15, %v131_v17  ;;  %v386_v17 = vadd.s32 24, %v1406_v16 }
 0x11f   :  { %v136_v20 = vmax.f32 %v132_v18, 0.0  ;;  %vm411_vm12 = vcmp.ge.s32.totalorder %v386_v17, 26 }
 0x120   :  { %v418_v23 = vsel %vm411_vm12, 1, %v1258_v3  ;;  %vm656_vm12 = vcmask 130144  }
 0x121   :  { %v149_v25 = vmul.f32 0.0, %v136_v20 }
 0x123   :  { %v1412_v28 = vadd.f32 %v149_v25, %v71_v1 }
 0x124   :  { %v133_v21 = vpop.f32.mrf.mxu1 }
 0x125   :  { %v134_v22 = vadd.f32 %v1196_v15, %v133_v21 }
 0x127   :  { %v137_v26 = vmax.f32 %v134_v22, 0.0 }
 0x129   :  { %v150_v27 = vmul.f32 %v148_v24, %v137_v26  ;;  %v425_v26 = vadd.s32 1, %v418_v23 }
 0x12b   :  { %v1414_v29 = vadd.f32 %v150_v27, %v72_v2  ;;  %v391_v2 = vand.u32 127, %v138_v14 }
 0x12d   :  { %v155_v30 = vpack.c.bf16 %v1414_v29, %v1412_v28  ;;  %vm406_vm5 = vcmp.ge.s32.totalorder %v391_v2, 13  ;;  %vm429_vm6 = vcmp.ge.s32.totalorder %v391_v2, 26  ;;  %vm453_vm7 = vcmp.ge.s32.totalorder %v391_v2, 39 }
 0x12e   :  { %v407_v4 = vsel %vm406_vm5, 1, %v1258_v3  ;;  %v430_v5 = vsel %vm429_vm6, 1, %v1258_v3  ;;  %v454_v7 = vsel %vm453_vm7, 1, %v1258_v3  ;;  %vm489_vm6 = vcmask 420864  }
 0x12f   :  { %1094 = vmatmul.msk.bf16.vlgmr.msra.gmra.mxu2 %vm86_vm0, %v155_v30  ;;  %v431_v6 = vadd.s32 %v430_v5, %v407_v4  ;;  %vm639_vm7 = vcmask 97346  }
 0x131   :  { %v455_v8 = vadd.s32 %v454_v7, %v431_v6 }
 0x133   :  { %vm1109_vm8 = vcmp.eq.s32.totalorder %v455_v8, 0  ;;  %vm457_vm11 = vcmp.eq.s32.totalorder %v400_v13, %v455_v8  ;;  %vm1110_vm13 = vcmp.eq.s32.totalorder %v455_v8, 1  ;;  %vm459_vm15 = vcmp.eq.s32.totalorder %v425_v26, %v455_v8 }
 0x134   :  { %vm1111_vm5 = vcmp.eq.s32.totalorder %v455_v8, 3 }
 0x1b2   :  { %v178_v32 = vpop.f32.mrf.mxu2 }
 0x1b3   :  { %v1422_v33 = vadd.f32 %v1197_v31, %v178_v32 }
 0x1b5   :  { %229 = vrot.lane.b32.xlu1 %v1422_v33, %s1250_s23  ;;  %184 = vst.msk [vmem:[#allocation2] sm:$0xff] %vm183_vm2, %v1422_v33 }
 0x1ba   :  { %v180_v34 = vpop.f32.mrf.mxu2 }
 0x1bb   :  { %v1427_v35 = vadd.f32 %v1197_v31, %v180_v34  ;;  %v443_v31 = vsel %vm436_vm14, 1, %v1258_v3 }
 0x1bc   :  { %v277_v58 = vld [vmem:[#allocation2] sm:$0xff] }
 0x1bd   :  { %223 = vrot.lane.b32.xlu2 %v1427_v35, %s1251_s0  ;;  %239 = vrot.lane.b32.xlu0 %v1427_v35, %s1252_s6  ;;  %186 = vst.msk [vmem:[#allocation2 + $0x8] sm:$0x1f] %vm185_vm3, %v1427_v35 }
 0x1be   :  { %231 = vrot.lane.b32.xlu1 %v1427_v35, %s1250_s23 }
 0x1c5   :  { %221 = vrot.lane.b32.xlu2 %v1422_v33, %s1251_s0  ;;  %237 = vrot.lane.b32.xlu0 %v1422_v33, %s1252_s6 }
 0x1c6   :  { %213 = vrot.lane.b32.xlu1 %v1422_v33, %s1253_s24 }
 0x1cd   :  { %189 = vrot.lane.b32.xlu2 %v1422_v33, %s1254_s5  ;;  %215 = vrot.lane.b32.xlu0 %v1427_v35, %s1253_s24 }
 0x1ce   :  { %197 = vrot.lane.b32.xlu1 %v1422_v33, %s1255_s25 }
 0x1d5   :  { %199 = vrot.lane.b32.xlu2 %v1427_v35, %s1255_s25  ;;  %191 = vrot.lane.b32.xlu0 %v1427_v35, %s1254_s5 }
 0x1d6   :  { %207 = vrot.lane.b32.xlu1 %v1427_v35, %s1256_s26 }
 0x1dd   :  { %205 = vrot.lane.b32.xlu0 %v1422_v33, %s1256_s26 }
 0x1de   :  { %271 = vrot.lane.b32.xlu1 %v1427_v35, %s1257_s12 }
 0x217   :  { %v224_v36 = vpop.permute.xlu2 %223 }
 0x218   :  { %228 = vst.msk [vmem:[#allocation3 + $0x15] sm:$0x1f] %vm185_vm3, %v224_v36  ;;  %v450_v36 = vadd.s32 2, %v443_v31 }
 0x21a   :  { %vm460_vm1 = vcmp.eq.s32.totalorder %v450_v36, %v455_v8 }
 0x21f   :  { %v222_v37 = vpop.permute.xlu2 %221 }
 0x220   :  { %227 = vst.msk [vmem:[#allocation3 + $0xd] sm:$0xff] %vm183_vm2, %v222_v37 }
 0x227   :  { %v190_v38 = vpop.permute.xlu2 %189  ;;  %v230_v39 = vpop.permute.xlu1 %229  ;;  %v286_v53 = vld [vmem:[#allocation3 + $0x10] sm:$0xff] }
 0x228   :  { %195 = vst.msk [vmem:[#allocation2 + $0xd] sm:$0xff] %vm183_vm2, %v190_v38 }
 0x229   :  { %235 = vst.msk [vmem:[#allocation3 + $0x1a] sm:$0xff] %vm183_vm2, %v230_v39 }
 0x22f   :  { %v240_v40 = vpop.permute.xlu0 %239  ;;  %v200_v41 = vpop.permute.xlu2 %199  ;;  %v278_v60 = vld [vmem:[#allocation2 + $0x8] sm:$0xff] }
 0x230   :  { %244 = vst.msk [vmem:[#allocation3 + $0x2f] sm:$0x1f] %vm185_vm3, %v240_v40  ;;  %v232_v42 = vpop.permute.xlu1 %231  ;;  %v287_v51 = vld [vmem:[#allocation3 + $0x18] sm:$0xff] }
 0x231   :  { %204 = vst.msk [vmem:[#allocation2 + $0x22] sm:$0x1f] %vm185_vm3, %v200_v41 }
 0x232   :  { %236 = vst.msk [vmem:[#allocation3 + $0x22] sm:$0x1f] %vm185_vm3, %v232_v42 }
 0x237   :  { %v238_v43 = vpop.permute.xlu0 %237  ;;  %v290_v44 = vld [vmem:[#allocation3 + $0x30] sm:$0xf] }
 0x238   :  { %v214_v45 = vpop.permute.xlu1 %213  ;;  %243 = vst.msk [vmem:[#allocation3 + $0x27] sm:$0xff] %vm183_vm2, %v238_v43  ;;  %1095 = vmatpush.xpose.msk.msra.mxu3 %vm183_vm2, %v290_v44 }
 0x239   :  { %219 = vst.msk [vmem:[#allocation3] sm:$0xff] %vm183_vm2, %v214_v45 }
 0x23f   :  { %v216_v46 = vpop.permute.xlu0 %215  ;;  %v289_v47 = vld [vmem:[#allocation3 + $0x28] sm:$0xff]  ;;  %v288_v49 = vld [vmem:[#allocation3 + $0x20] sm:$0xff] }
 0x240   :  { %v198_v48 = vpop.permute.xlu1 %197  ;;  %220 = vst.msk [vmem:[#allocation3 + $0x8] sm:$0x1f] %vm185_vm3, %v216_v46  ;;  %1096 = vmatpush.xpose.msk.msra.mxu3 %vm183_vm2, %v289_v47  ;;  %v284_v57 = vld [vmem:[#allocation3] sm:$0xff] }
 0x241   :  { %203 = vst.msk [vmem:[#allocation2 + $0x1a] sm:$0xff] %vm183_vm2, %v198_v48 }
 0x244   :  { %1097 = vmatpush.xpose.msk.msra.mxu3 %vm183_vm2, %v288_v49 }
 0x247   :  { %v192_v50 = vpop.permute.xlu0 %191  ;;  %v285_v55 = vld [vmem:[#allocation3 + $0x8] sm:$0xff] }
 0x248   :  { %v208_v52 = vpop.permute.xlu1 %207  ;;  %196 = vst.msk [vmem:[#allocation2 + $0x15] sm:$0x1f] %vm185_vm3, %v192_v50  ;;  %1098 = vmatpush.xpose.msk.msra.mxu3 %vm183_vm2, %v287_v51 }
 0x249   :  { %212 = vst.msk [vmem:[#allocation2 + $0x2f] sm:$0x1f] %vm185_vm3, %v208_v52 }
 0x24c   :  { %1099 = vmatpush.xpose.msk.msra.mxu3 %vm183_vm2, %v286_v53 }
 0x24f   :  { %v206_v54 = vpop.permute.xlu0 %205  ;;  %v279_v61 = vld [vmem:[#allocation2 + $0x10] sm:$0xff]  ;;  %v280_v62 = vld [vmem:[#allocation2 + $0x18] sm:$0xff] }
 0x250   :  { %v272_v56 = vpop.permute.xlu1 %271  ;;  %211 = vst.msk [vmem:[#allocation2 + $0x27] sm:$0xff] %vm183_vm2, %v206_v54  ;;  %1100 = vmatpush.xpose.msk.msra.mxu3 %vm183_vm2, %v285_v55  ;;  %v283_v1 = vld [vmem:[#allocation2 + $0x30] sm:$0xf] }
 0x251   :  { %276 = vst.msk [vmem:[#allocation4 + $0x2f] sm:$0x1f] %vm185_vm3, %v272_v56 }
 0x254   :  { %1101 = vmatpush.xpose.msk.msra.mxu3 %vm183_vm2, %v284_v57 }
 0x257   :  { %1102 = vmatmul.msk.f32.vlgmr.msra.gmra.mxu3 %vm183_vm2, %v277_v58  ;;  %v281_v63 = vld [vmem:[#allocation2 + $0x20] sm:$0xff]  ;;  %v282_v0 = vld [vmem:[#allocation2 + $0x28] sm:$0xff] }
 0x258   :  { %v297_v59 = vld [vmem:[#allocation4 + $0x30] sm:$0xf] }
 0x259   :  { %1113 = vmatpush.msk.msrb.mxu0 %vm570_vm4, %v297_v59 }
 0x25f   :  { %1103 = vmatmul.msk.f32.gmra.mxu3 %vm183_vm2, %v278_v60 }
 0x267   :  { %1104 = vmatmul.msk.f32.gmra.mxu3 %vm183_vm2, %v279_v61 }
 0x26f   :  { %1105 = vmatmul.msk.f32.gmra.mxu3 %vm183_vm2, %v280_v62 }
 0x277   :  { %1106 = vmatmul.msk.f32.gmra.mxu3 %vm183_vm2, %v281_v63 }
 0x27f   :  { %1107 = vmatmul.msk.f32.gmra.mxu3 %vm183_vm2, %v282_v0 }
 0x287   :  { %1108 = vmatmul.msk.f32.gmra.mxu3 %vm183_vm2, %v283_v1 }
 0x2da   :  { %v357_v9 = vpop.f32.mrf.mxu3 }
 0x2db   :  { %v378_v10 = vmul.f32 0.5, %v357_v9 }
 0x2dd   :  { %v463_v11 = vsel %vm1109_vm8, %v378_v10, -1e+30  ;;  %vm630_vm8 = vcmask 58400  }
 0x2de   :  { %v471_v12 = vsel %vm470_vm9, %v463_v11, -inf }
 0x2df   :  { %472 = vmax.xlane.f32.xlu2 %v471_v12 }
 0x2e2   :  { %v360_v14 = vpop.f32.mrf.mxu3 }
 0x2e3   :  { %v379_v15 = vmul.f32 0.5, %v360_v14 }
 0x2e5   :  { %v464_v18 = vsel %vm457_vm11, %v379_v15, -1e+30  ;;  %vm658_vm11 = vcmask 126048  }
 0x2e6   :  { %v474_v20 = vsel %vm470_vm9, %v464_v18, -inf }
 0x2e7   :  { %475 = vmax.xlane.f32.xlu0 %v474_v20 }
 0x2ea   :  { %v363_v21 = vpop.f32.mrf.mxu3 }
 0x2eb   :  { %v380_v22 = vmul.f32 0.5, %v363_v21 }
 0x2ed   :  { %v465_v24 = vsel %vm1110_vm13, %v380_v22, -1e+30  ;;  %vm699_vm13 = vcmask 126976  }
 0x2ee   :  { %v477_v25 = vsel %vm470_vm9, %v465_v24, -inf }
 0x2ef   :  { %478 = vmax.xlane.f32.xlu1 %v477_v25 }
 0x2f2   :  { %v366_v27 = vpop.f32.mrf.mxu3 }
 0x2f3   :  { %v381_v30 = vmul.f32 0.5, %v366_v27 }
 0x2f5   :  { %v466_v32 = vsel %vm459_vm15, %v381_v30, -1e+30 }
 0x2f6   :  { %v480_v34 = vsel %vm470_vm9, %v466_v32, -inf }
 0x2f7   :  { %481 = vmax.xlane.f32.xlu2 %v480_v34 }
 0x2fa   :  { %v369_v37 = vpop.f32.mrf.mxu3 }
 0x2fb   :  { %v382_v38 = vmul.f32 0.5, %v369_v37  ;;  %261 = vrot.lane.b32.xlu0 %v1422_v33, %s1259_s2 }
 0x2fd   :  { %v467_v16 = vsel %vm460_vm1, %v382_v38, -1e+30 }
 0x2fe   :  { %v483_v39 = vsel %vm470_vm9, %v467_v16, -inf }
 0x2ff   :  { %484 = vmax.xlane.f32.xlu2 %v483_v39 }
 0x302   :  { %v372_v40 = vpop.f32.mrf.mxu3 }
 0x303   :  { %255 = vrot.lane.b32.xlu0 %v1427_v35, %s1260_s27  ;;  %v383_v41 = vmul.f32 0.5, %v372_v40 }
 0x305   :  { %v1491_v42 = vsel %vm1111_vm5, %v383_v41, -1e+30 }
 0x306   :  { %v486_v43 = vsel %vm470_vm9, %v1491_v42, -inf }
 0x308   :  { %263 = vrot.lane.b32.xlu1 %v1427_v35, %s1259_s2 }
 0x30a   :  { %v375_v44 = vpop.f32.mrf.mxu3 }
 0x30b   :  { %v384_v45 = vmul.f32 0.5, %v375_v44 }
 0x30d   :  { %v1495_v46 = vsel %vm1111_vm5, %v384_v45, -1e+30 }
 0x30e   :  { %v490_v47 = vsel %vm489_vm6, %v1495_v46, -inf }
 0x310   :  { %253 = vrot.lane.b32.xlu1 %v1422_v33, %s1260_s27 }
 0x317   :  { %269 = vrot.lane.b32.xlu2 %v1422_v33, %s1257_s12 }
 0x32d   :  { %487 = vmax.xlane.f32.xlu0 %v486_v43 }
 0x340   :  { %491 = vmax.xlane.f32.xlu2 %v490_v47 }
 0x341   :  { %247 = vrot.lane.b32.xlu0 %v1427_v35, %s1261_s4 }
 0x349   :  { %245 = vrot.lane.b32.xlu0 %v1422_v33, %s1261_s4 }
 0x352   :  { %v473_v48 = vpop.xlane.xlu2 %472 }
 0x353   :  { %v493_v49 = vsub.f32 %v463_v11, %v473_v48 }
 0x355   :  { %v500_v50 = vmul.f32 1.442695, %v493_v49 }
 0x357   :  { %1205 = vpow2.f32 %v500_v50 }
 0x35a   :  { %v476_v52 = vpop.xlane.xlu0 %475 }
 0x35b   :  { %v494_v54 = vsub.f32 %v464_v18, %v476_v52 }
 0x35d   :  { %v1501_v51 = vpop.eup %1205  ;;  %v502_v57 = vmul.f32 1.442695, %v494_v54 }
 0x35e   :  { %v514_v53 = vsel %vm470_vm9, %v1501_v51, 0.0 }
 0x35f   :  { %515 = vadd.xlane.f32.xlu1 %v514_v53 }
 0x362   :  { %v479_v55 = vpop.xlane.xlu1 %478 }
 0x363   :  { %v495_v56 = vsub.f32 %v465_v24, %v479_v55 }
 0x365   :  { %v504_v58 = vmul.f32 1.442695, %v495_v56 }
 0x367   :  { %1207 = vpow2.f32 %v504_v58 }
 0x368   :  { %1209 = vpow2.f32 %v502_v57 }
 0x36a   :  { %v482_v35 = vpop.xlane.xlu2 %481 }
 0x36b   :  { %v496_v33 = vsub.f32 %v466_v32, %v482_v35 }
 0x36d   :  { %v1505_v59 = vpop.eup %1207  ;;  %v506_v60 = vmul.f32 1.442695, %v496_v33  ;;  %v262_v61 = vpop.permute.xlu0 %261 }
 0x36e   :  { %267 = vst.msk [vmem:[#allocation4 + $0x1a] sm:$0xff] %vm183_vm2, %v262_v61  ;;  %v520_v62 = vsel %vm470_vm9, %v1505_v59, 0.0  ;;  %v1510_v63 = vpop.eup %1209  ;;  %v1168_v61 = vld [vmem:[%s1671_s7] sm:$0xff] }
 0x36f   :  { %1211 = vpow2.f32 %v506_v60  ;;  %521 = vadd.xlane.f32.xlu2 %v520_v62  ;;  %v517_v1 = vsel %vm470_vm9, %v1510_v63, 0.0  ;;  %685 = vmatpush.bf16.msrb.mxu1 %v1168_v61 }
 0x372   :  { %v485_v0 = vpop.xlane.xlu2 %484 }
 0x373   :  { %v497_v2 = vsub.f32 %v467_v16, %v485_v0  ;;  %518 = vadd.xlane.f32.xlu0 %v517_v1 }
 0x375   :  { %v1514_v3 = vpop.eup %1211  ;;  %v508_v4 = vmul.f32 1.442695, %v497_v2  ;;  %v256_v5 = vpop.permute.xlu0 %255 }
 0x376   :  { %260 = vst.msk [vmem:[#allocation4 + $0x15] sm:$0x1f] %vm185_vm3, %v256_v5  ;;  %v523_v6 = vsel %vm470_vm9, %v1514_v3, 0.0 }
 0x377   :  { %1213 = vpow2.f32 %v508_v4  ;;  %524 = vadd.xlane.f32.xlu2 %v523_v6 }
 0x37a   :  { %v264_v7 = vpop.permute.xlu1 %263  ;;  %v270_v8 = vpop.permute.xlu2 %269 }
 0x37b   :  { %268 = vst.msk [vmem:[#allocation4 + $0x22] sm:$0x1f] %vm185_vm3, %v264_v7 }
 0x37c   :  { %275 = vst.msk [vmem:[#allocation4 + $0x27] sm:$0xff] %vm183_vm2, %v270_v8  ;;  %v1198_v8 = vld [vmem:[%s1670_s8] ss:$0 sm:$0xff] }
 0x37d   :  { %v1214_v9 = vpop.eup %1213  ;;  %v294_v14 = vld [vmem:[#allocation4 + $0x18] sm:$0xff] }
 0x37e   :  { %v526_v10 = vsel %vm470_vm9, %v1214_v9, 0.0 }
 0x37f   :  { %527 = vadd.xlane.f32.xlu1 %v526_v10 }
 0x382   :  { %v254_v11 = vpop.permute.xlu1 %253 }
 0x383   :  { %259 = vst.msk [vmem:[#allocation4 + $0xd] sm:$0xff] %vm183_vm2, %v254_v11  ;;  %v296_v12 = vld [vmem:[#allocation4 + $0x28] sm:$0xff]  ;;  %v295_v13 = vld [vmem:[#allocation4 + $0x20] sm:$0xff] }
 0x384   :  { %584 = vmatpush.msrb.mxu0 %v296_v12 }
 0x386   :  { %585 = vmatpush.msrb.mxu0 %v295_v13 }
 0x388   :  { %586 = vmatpush.msrb.mxu0 %v294_v14 }
 0x38a   :  { %v293_v15 = vld [vmem:[#allocation4 + $0x10] sm:$0xff] }
 0x38b   :  { %587 = vmatpush.msrb.mxu0 %v293_v15 }
 0x3a0   :  { %v488_v17 = vpop.xlane.xlu0 %487 }
 0x3a1   :  { %v498_v18 = vsub.f32 %v1491_v42, %v488_v17 }
 0x3a3   :  { %v510_v20 = vmul.f32 1.442695, %v498_v18  ;;  %v1265_v18 = vmov 16.0  }
 0x3a5   :  { %1215 = vpow2.f32 %v510_v20 }
 0x3ab   :  { %v1216_v21 = vpop.eup %1215 }
 0x3ac   :  { %v529_v22 = vsel %vm470_vm9, %v1216_v21, 0.0 }
 0x3ad   :  { %530 = vadd.xlane.f32.xlu2 %v529_v22 }
 0x3b3   :  { %v248_v23 = vpop.permute.xlu0 %247  ;;  %v492_v19 = vpop.xlane.xlu2 %491 }
 0x3b4   :  { %252 = vst.msk [vmem:[#allocation4 + $0x8] sm:$0x1f] %vm185_vm3, %v248_v23  ;;  %v499_v24 = vsub.f32 %v1495_v46, %v492_v19 }
 0x3b6   :  { %v512_v25 = vmul.f32 1.442695, %v499_v24 }
 0x3b8   :  { %1217 = vpow2.f32 %v512_v25 }
 0x3bb   :  { %v246_v26 = vpop.permute.xlu0 %245  ;;  %v292_v27 = vld [vmem:[#allocation4 + $0x8] sm:$0xff] }
 0x3bc   :  { %251 = vst.msk [vmem:[#allocation4] sm:$0xff] %vm183_vm2, %v246_v26  ;;  %588 = vmatpush.msrb.mxu0 %v292_v27 }
 0x3be   :  { %v1218_v30 = vpop.eup %1217 }
 0x3bf   :  { %v532_v31 = vsel %vm489_vm6, %v1218_v30, 0.0 }
 0x3c0   :  { %533 = vadd.xlane.f32.xlu1 %v532_v31 }
 0x3c3   :  { %v291_v32 = vld [vmem:[#allocation4] sm:$0xff] }
 0x3c4   :  { %589 = vmatpush.msrb.mxu0 %v291_v32 }
 0x3d2   :  { %v516_v34 = vpop.xlane.xlu1 %515 }
 0x3d3   :  { %1219 = vrcp.f32 %v516_v34 }
 0x3d9   :  { %v1220_v36 = vpop.eup %1219 }
 0x3da   :  { %v542_v37 = vmul.f32 %v1220_v36, %v1501_v51 }
 0x3dc   :  { %1114 = vmatmul.msk.f32.vlgmr.msrb.gmra.mxu0 %vm470_vm9, %v542_v37 }
 0x3e2   :  { %v522_v16 = vpop.xlane.xlu2 %521 }
 0x3e6   :  { %v519_v38 = vpop.xlane.xlu0 %518 }
 0x3e7   :  { %1221 = vrcp.f32 %v519_v38  ;;  %v1169_v38 = vld [vmem:[%s1675_s13] sm:$0xff] }
 0x3e8   :  { %1223 = vrcp.f32 %v522_v16  ;;  %781 = vmatpush.bf16.msrb.mxu2 %v1169_v38 }
 0x3ea   :  { %v525_v41 = vpop.xlane.xlu2 %524 }
 0x3eb   :  { %1225 = vrcp.f32 %v525_v41 }
 0x3ed   :  { %v1222_v39 = vpop.eup %1221 }
 0x3ee   :  { %v543_v40 = vmul.f32 %v1222_v39, %v1510_v63  ;;  %v1224_v42 = vpop.eup %1223 }
 0x3ef   :  { %v544_v43 = vmul.f32 %v1224_v42, %v1505_v59 }
 0x3f0   :  { %1115 = vmatmul.msk.f32.gmra.mxu0 %vm470_vm9, %v543_v40 }
 0x3f1   :  { %v1226_v45 = vpop.eup %1225 }
 0x3f2   :  { %v528_v44 = vpop.xlane.xlu1 %527  ;;  %v545_v46 = vmul.f32 %v1226_v45, %v1514_v3 }
 0x3f3   :  { %1227 = vrcp.f32 %v528_v44 }
 0x3f8   :  { %1116 = vmatmul.msk.f32.gmra.mxu0 %vm470_vm9, %v544_v43 }
 0x3f9   :  { %v1228_v47 = vpop.eup %1227 }
 0x3fa   :  { %v546_v48 = vmul.f32 %v1228_v47, %v1214_v9 }
 0x400   :  { %1117 = vmatmul.msk.f32.gmra.mxu0 %vm470_vm9, %v545_v46 }
 0x408   :  { %1118 = vmatmul.msk.f32.gmra.mxu0 %vm470_vm9, %v546_v48 }
 0x420   :  { %v531_v49 = vpop.xlane.xlu2 %530 }
 0x421   :  { %1229 = vrcp.f32 %v531_v49 }
 0x427   :  { %v1230_v50 = vpop.eup %1229 }
 0x428   :  { %v547_v51 = vmul.f32 %v1230_v50, %v1216_v21 }
 0x42a   :  { %1119 = vmatmul.msk.f32.gmra.mxu0 %vm470_vm9, %v547_v51 }
 0x433   :  { %v534_v52 = vpop.xlane.xlu1 %533 }
 0x434   :  { %1231 = vrcp.f32 %v534_v52 }
 0x435   :  { %1233 = vrcp.f32 %v1265_v18 }
 0x43a   :  { %v1232_v53 = vpop.eup %1231 }
 0x43b   :  { %v548_v54 = vmul.f32 %v1232_v53, %v1218_v30  ;;  %v1234_v20 = vpop.eup %1233 }
 0x43c   :  { %v704_v21 = vmul.f32 16.0, %v1234_v20  ;;  %vm708_vm14 = vweird.f32 %v1234_v20 }
 0x43d   :  { %1120 = vmatmul.msk.f32.gmra.mxu0 %vm470_vm9, %v548_v54  ;;  %vm641_vm9 = vcmask 96320  }
 0x43e   :  { %v705_v22 = vsub.f32 1.0, %v704_v21 }
 0x440   :  { %v706_v23 = vmul.f32 %v1234_v20, %v705_v22 }
 0x442   :  { %v707_v19 = vadd.f32 %v1234_v20, %v706_v23 }
 0x459   :  { %v591_v55 = vpop.f32.mrf.mxu0 }
 0x45a   :  { %612 = vst.msk [vmem:[#allocation5] sm:$0xff] %vm183_vm2, %v591_v55  ;;  %vm628_vm2 = vcmask 64544  }
 0x46d   :  { %v594_v56 = vpop.f32.mrf.mxu0 }
 0x46e   :  { %613 = vst.msk [vmem:[#allocation5 + $0x8] sm:$0x1f] %vm185_vm3, %v594_v56  ;;  %617 = vrot.lane.b32.xlu0 %v594_v56, %s1262_s28  ;;  %vm626_vm3 = vcmask 64549  }
 0x475   :  { %v597_v57 = vpop.f32.mrf.mxu0 }
 0x476   :  { %619 = vrot.lane.b32.xlu2 %v597_v57, %s1262_s28  ;;  %v1199_v57 = vld [vmem:[%s1672_s9] ss:$0 sm:$0xff] }
 0x47d   :  { %v600_v58 = vpop.f32.mrf.mxu0 }
 0x47e   :  { %633 = vrot.lane.b32.xlu0 %v600_v58, %s1263_s29  ;;  %621 = vrot.lane.b32.xlu1 %v600_v58, %s1262_s28 }
 0x485   :  { %v603_v35 = vpop.f32.mrf.mxu0 }
 0x486   :  { %645 = vrot.lane.b32.xlu0 %v603_v35, %s1264_s30  ;;  %635 = vrot.lane.b32.xlu2 %v603_v35, %s1263_s29 }
 0x4a7   :  { %v606_v33 = vpop.f32.mrf.mxu0 }
 0x4a8   :  { %647 = vrot.lane.b32.xlu1 %v606_v33, %s1264_s30 }
 0x4ba   :  { %v609_v59 = vpop.f32.mrf.mxu0 }
 0x4bb   :  { %649 = vrot.lane.b32.xlu2 %v609_v59, %s1264_s30 }
 0x4d0   :  { %v620_v60 = vpop.permute.xlu2 %619 }
 0x4d1   :  { %629 = vst.msk [vmem:[#allocation5 + $0x3] sm:$0xff] %vm628_vm2, %v620_v60  ;;  %v1200_v60 = vld [vmem:[%s1673_s10] ss:$0 sm:$0xff] }
 0x4e0   :  { %v618_v62 = vpop.permute.xlu0 %617  ;;  %v636_v1 = vpop.permute.xlu2 %635 }
 0x4e1   :  { %627 = vst.msk [vmem:[#allocation5 - $0x5] sm:$0xe0] %vm626_vm3, %v618_v62 }
 0x4f0   :  { %v634_v63 = vpop.permute.xlu0 %633  ;;  %v622_v0 = vpop.permute.xlu1 %621 }
 0x4f1   :  { %640 = vst.msk [vmem:[#allocation5 - $0x2] sm:$0xfc] %vm639_vm7, %v634_v63 }
 0x4f2   :  { %631 = vst.msk [vmem:[#allocation5 + $0xb] sm:$0x3] %vm630_vm8, %v622_v0 }
 0x4f3   :  { %642 = vst.msk [vmem:[#allocation5 + $0x6] sm:$0x7f] %vm641_vm9, %v636_v1  ;;  %v1201_v1 = vld [vmem:[%s1674_s14] ss:$0 sm:$0xff]  ;;  %s1702_s14 = sld [smem:[#allocation13_spill]] }
 0x4f8   :  { %v646_v2 = vpop.permute.xlu0 %645 }
 0x4f9   :  { %655 = vst.msk [vmem:[#allocation5 - $0x7] sm:$0x80] %vm654_vm10, %v646_v2 }
 0x515   :  { %v650_v3 = vpop.permute.xlu2 %649 }
 0x516   :  { %659 = vst.msk [vmem:[#allocation5 + $0x9] sm:$0xf] %vm658_vm11, %v650_v3 }
 0x51a   :  { %v648_v4 = vpop.permute.xlu1 %647 }
 0x51b   :  { %657 = vst.msk [vmem:[#allocation5 + $0x1] sm:$0xff] %vm656_vm12, %v648_v4 }
 0x522   :  { %v660_v5 = vld [vmem:[#allocation5] sm:$0xff]  ;;  %v661_v6 = vld [vmem:[#allocation5 + $0x8] sm:$0x1f] }
 0x523   :  { %v664_v7 = vpack.c.bf16 %v661_v6, %v660_v5 }
 0x525   :  { %1125 = vmatmul.msk.bf16.vlgmr.msrb.gmra.mxu1 %vm86_vm0, %v664_v7 }
 0x5a2   :  { %v687_v9 = vpop.f32.mrf.mxu1 }
 0x5a3   :  { %v688_v10 = vadd.f32 %v1198_v8, %v687_v9 }
 0x5a5   :  { %v692_v11 = vadd.f32 %v688_v10, %v1412_v28  ;;  %v1553_v28 = vsel %vm708_vm14, %v1234_v20, %v707_v19 }
 0x5a7   :  { %v696_v12 = vsel %vm86_vm0, %v692_v11, 0.0 }
 0x5a8   :  { %697 = vadd.xlane.f32.xlu0 %v696_v12 }
 0x5aa   :  { %v689_v13 = vpop.f32.mrf.mxu1 }
 0x5ab   :  { %v690_v14 = vadd.f32 %v1198_v8, %v689_v13 }
 0x5ad   :  { %v693_v15 = vadd.f32 %v690_v14, %v1414_v29 }
 0x5af   :  { %v700_v17 = vsel %vm699_vm13, %v693_v15, 0.0 }
 0x5b0   :  { %701 = vadd.xlane.f32.xlu1 %v700_v17 }
 0x61b   :  { %v698_v24 = vpop.xlane.xlu0 %697 }
 0x61c   :  { %v710_v25 = vmul.f32 %v1553_v28, %v698_v24 }
 0x61e   :  { %v712_v26 = vsub.f32 %v692_v11, %v710_v25 }
 0x620   :  { %v714_v27 = vmul.f32 %v712_v26, %v712_v26 }
 0x622   :  { %v716_v30 = vsel %vm86_vm0, %v714_v27, 0.0  ;;  %v1171_v27 = vld [vmem:[%s1676_s15 + $0x8] sm:$0xff] }
 0x623   :  { %v702_v31 = vpop.xlane.xlu1 %701  ;;  %717 = vadd.xlane.f32.xlu2 %v716_v30  ;;  %899 = vmatpush.bf16.msra.mxu1 %v1171_v27 }
 0x624   :  { %v711_v32 = vmul.f32 %v1553_v28, %v702_v31 }
 0x626   :  { %v713_v34 = vsub.f32 %v693_v15, %v711_v32 }
 0x628   :  { %v715_v36 = vmul.f32 %v713_v34, %v713_v34 }
 0x62a   :  { %v719_v37 = vsel %vm699_vm13, %v715_v36, 0.0 }
 0x62b   :  { %720 = vadd.xlane.f32.xlu0 %v719_v37 }
 0x696   :  { %v718_v16 = vpop.xlane.xlu2 %717 }
 0x697   :  { %v722_v39 = vmul.f32 %v718_v16, %v1553_v28  ;;  %v1170_v16 = vld [vmem:[%s1676_s15] sm:$0xff] }
 0x698   :  { %900 = vmatpush.bf16.msra.mxu1 %v1170_v16 }
 0x699   :  { %v724_v40 = vadd.f32 1e-05, %v722_v39 }
 0x69b   :  { %1235 = vrsqrt.f32 %v724_v40  ;;  %vm732_vm1 = vweird.f32 %v724_v40 }
 0x69e   :  { %v721_v41 = vpop.xlane.xlu0 %720 }
 0x69f   :  { %v723_v42 = vmul.f32 %v721_v41, %v1553_v28 }
 0x6a1   :  { %v1236_v43 = vpop.eup %1235  ;;  %v725_v44 = vadd.f32 1e-05, %v723_v42 }
 0x6a2   :  { %v727_v45 = vmul.f32 %v1236_v43, %v724_v40  ;;  %vm733_vm15 = vweird.f32 %v1236_v43 }
 0x6a3   :  { %1237 = vrsqrt.f32 %v725_v44  ;;  %vm734_vm5 = vmor %vm732_vm1, %vm733_vm15  ;;  %vm742_vm2 = vweird.f32 %v725_v44 }
 0x6a4   :  { %v728_v46 = vmul.f32 %v1236_v43, %v727_v45 }
 0x6a6   :  { %v729_v47 = vmul.f32 0.5, %v728_v46 }
 0x6a8   :  { %v730_v48 = vsub.f32 1.5, %v729_v47 }
 0x6a9   :  { %v1238_v49 = vpop.eup %1237 }
 0x6aa   :  { %v731_v50 = vmul.f32 %v1236_v43, %v730_v48  ;;  %v737_v51 = vmul.f32 %v1238_v49, %v725_v44  ;;  %vm743_vm6 = vweird.f32 %v1238_v49 }
 0x6ab   :  { %vm744_vm3 = vmor %vm742_vm2, %vm743_vm6  ;;  %vm889_vm6 = vcmask 261120  }
 0x6ac   :  { %v738_v52 = vmul.f32 %v1238_v49, %v737_v51  ;;  %v735_v53 = vsel %vm734_vm5, %v1236_v43, %v731_v50 }
 0x6ad   :  { %v746_v56 = vmul.f32 %v735_v53, %v712_v26 }
 0x6ae   :  { %v739_v54 = vmul.f32 0.5, %v738_v52 }
 0x6af   :  { %v751_v59 = vmul.f32 %v1199_v57, %v746_v56 }
 0x6b0   :  { %v740_v55 = vsub.f32 1.5, %v739_v54 }
 0x6b1   :  { %v756_v62 = vadd.f32 %v1200_v60, %v751_v59 }
 0x6b2   :  { %v741_v58 = vmul.f32 %v1238_v49, %v740_v55 }
 0x6b4   :  { %v745_v35 = vsel %vm744_vm3, %v1238_v49, %v741_v58 }
 0x6b5   :  { %v747_v33 = vmul.f32 %v745_v35, %v713_v34 }
 0x6b7   :  { %v752_v61 = vmul.f32 %v1199_v57, %v747_v33 }
 0x6b9   :  { %v1570_v63 = vadd.f32 %v1200_v60, %v752_v61 }
 0x6bb   :  { %v760_v0 = vpack.c.bf16 %v1570_v63, %v756_v62 }
 0x6bd   :  { %1130 = vmatmul.msk.bf16.vlgmr.msrb.gmra.mxu2 %vm86_vm0, %v760_v0 }
 0x740   :  { %v783_v2 = vpop.f32.mrf.mxu2 }
 0x741   :  { %v1577_v3 = vadd.f32 %v1201_v1, %v783_v2 }
 0x743   :  { %v1580_v4 = vmul.f32 0.70710677, %v1577_v3 }
 0x745   :  { %v796_v5 = vand.u32 2147483647, %v1580_v4  ;;  %vm792_vm1 = vcmp.lt.f32.partialorder %v1580_v4, 0.0 }
 0x747   :  { %v798_v6 = vmul.f32 0.3275911, %v796_v5  ;;  %v850_v31 = vsub.f32 0.0, %v796_v5 }
 0x748   :  { %v785_v7 = vpop.f32.mrf.mxu2 }
 0x749   :  { %v800_v8 = vadd.f32 1.0, %v798_v6  ;;  %v1583_v9 = vadd.f32 %v1201_v1, %v785_v7  ;;  %v852_v40 = vmul.f32 %v850_v31, %v796_v5  ;;  %v1266_v5 = vmov 1.0   ;;  %v1142_v31 = vld [vmem:[%s1680_s17] sm:$0xf] }
 0x74a   :  { %v794_v6 = vsel %vm792_vm1, -1.0, %v1266_v5 }
 0x74b   :  { %1239 = vrcp.f32 %v800_v8  ;;  %v1586_v10 = vmul.f32 0.70710677, %v1583_v9  ;;  %v813_v18 = vand.u32 2147483648, %v800_v8  ;;  %v811_v21 = vand.u32 2147483647, %v800_v8 }
 0x74c   :  { %vm807_vm8 = vweird.f32 %v800_v8  ;;  %v854_v46 = vmul.f32 1.442695, %v852_v40  ;;  %v1175_v40 = vld [vmem:[%s1680_s17 + $0x14] sm:$0xf0] }
 0x74d   :  { %v797_v11 = vand.u32 2147483647, %v1586_v10  ;;  %v814_v23 = vor.u32 1.1754944e-38, %v813_v18  ;;  %vm812_vm10 = vcmp.eq.f32.partialorder %v811_v21, 8.507059e+37  ;;  %vm793_vm5 = vcmp.lt.f32.partialorder %v1586_v10, 0.0 }
 0x74e   :  { %v1202_v10 = vld [vmem:[%s1677_s16] ss:$0 sm:$0xff] }
 0x74f   :  { %v799_v12 = vmul.f32 0.3275911, %v797_v11  ;;  %v851_v48 = vsub.f32 0.0, %v797_v11 }
 0x751   :  { %v1240_v13 = vpop.eup %1239  ;;  %v801_v15 = vadd.f32 1.0, %v799_v12  ;;  %v853_v53 = vmul.f32 %v851_v48, %v797_v11  ;;  %v795_v12 = vsel %vm793_vm5, -1.0, %v1266_v5 }
 0x752   :  { %v803_v14 = vmul.f32 %v1240_v13, %v800_v8  ;;  %vm808_vm7 = vweird.f32 %v1240_v13 }
 0x753   :  { %1241 = vrcp.f32 %v801_v15  ;;  %vm809_vm9 = vmor %vm807_vm8, %vm808_vm7  ;;  %v828_v36 = vand.u32 2147483648, %v801_v15  ;;  %v826_v38 = vand.u32 2147483647, %v801_v15  ;;  %vm822_vm12 = vweird.f32 %v801_v15 }
 0x754   :  { %v804_v17 = vsub.f32 1.0, %v803_v14  ;;  %1243 = vpow2.f32 %v854_v46  ;;  %v856_v58 = vmul.f32 1.442695, %v853_v53  ;;  %v1204_v53 = vld [vmem:[%s1702_s14] ss:$0 sm:$0xff] }
 0x755   :  { %v829_v43 = vor.u32 1.1754944e-38, %v828_v36  ;;  %vm827_vm15 = vcmp.eq.f32.partialorder %v826_v38, 8.507059e+37  ;;  %v1144_v36 = vld [vmem:[%s1680_s17 + $0x10] sm:$0xf0] }
 0x756   :  { %v805_v20 = vmul.f32 %v1240_v13, %v804_v17  ;;  %1245 = vpow2.f32 %v856_v58  ;;  %v789_v17 = vmul.f32 0.5, %v1583_v9  ;;  %v1176_v58 = vld [vmem:[%s1681_s19] sm:$0xff] }
 0x758   :  { %v806_v22 = vadd.f32 %v1240_v13, %v805_v20 }
 0x759   :  { %v1242_v19 = vpop.eup %1241 }
 0x75a   :  { %v810_v24 = vsel %vm809_vm9, %v1240_v13, %v806_v22  ;;  %v818_v26 = vmul.f32 %v1242_v19, %v801_v15  ;;  %vm823_vm11 = vweird.f32 %v1242_v19  ;;  %v1244_v33 = vpop.eup %1243  ;;  %v788_v15 = vmul.f32 0.5, %v1577_v3 }
 0x75b   :  { %v815_v25 = vsel %vm812_vm10, %v814_v23, %v810_v24  ;;  %vm824_vm14 = vmor %vm822_vm12, %vm823_vm11 }
 0x75c   :  { %v832_v30 = vmul.f32 1.0614054, %v815_v25  ;;  %v819_v32 = vsub.f32 1.0, %v818_v26  ;;  %v1246_v2 = vpop.eup %1245 }
 0x75e   :  { %v834_v34 = vadd.f32 -1.4531521, %v832_v30  ;;  %v820_v37 = vmul.f32 %v1242_v19, %v819_v32  ;;  %v1174_v32 = vld [vmem:[%s1680_s17 + $0xc] sm:$0xf0] }
 0x760   :  { %v836_v39 = vmul.f32 %v834_v34, %v815_v25  ;;  %v821_v41 = vadd.f32 %v1242_v19, %v820_v37  ;;  %v1143_v34 = vor.u32 %v1174_v32, %v1142_v31 }
 0x762   :  { %v838_v42 = vadd.f32 1.4214138, %v836_v39  ;;  %v825_v44 = vsel %vm824_vm14, %v1242_v19, %v821_v41  ;;  %985 = vmatpush.bf16.msra.mxu2 %v1143_v34  ;;  %v1150_v39 = vld [vmem:[%s1680_s17 + $0x8] sm:$0xf]  ;;  %v1173_v41 = vld [vmem:[%s1680_s17 + $0xc] sm:$0xf] }
 0x763   :  { %v830_v47 = vsel %vm827_vm15, %v829_v43, %v825_v44  ;;  %v1152_v43 = vld [vmem:[%s1680_s17 + $0x18] sm:$0xf0] }
 0x764   :  { %v840_v45 = vmul.f32 %v838_v42, %v815_v25  ;;  %v833_v49 = vmul.f32 1.0614054, %v830_v47  ;;  %v1151_v42 = vor.u32 %v1175_v40, %v1150_v39 }
 0x766   :  { %v842_v50 = vadd.f32 -0.28449672, %v840_v45  ;;  %v835_v51 = vadd.f32 -1.4531521, %v833_v49  ;;  %v1155_v45 = vor.u32 %v1173_v41, %v1152_v43  ;;  %1011 = vmatpush.bf16.msrb.mxu2 %v1151_v42 }
 0x768   :  { %v844_v52 = vmul.f32 %v842_v50, %v815_v25  ;;  %v837_v54 = vmul.f32 %v835_v51, %v830_v47  ;;  %v1203_v51 = vld [vmem:[%s1678_s11] ss:$0 sm:$0xff] }
 0x76a   :  { %v846_v55 = vadd.f32 0.2548296, %v844_v52  ;;  %v839_v56 = vadd.f32 1.4214138, %v837_v54 }
 0x76c   :  { %v848_v57 = vmul.f32 %v846_v55, %v815_v25  ;;  %v841_v35 = vmul.f32 %v839_v56, %v830_v47 }
 0x76e   :  { %v858_v59 = vmul.f32 %v1244_v33, %v848_v57  ;;  %v843_v60 = vadd.f32 -0.28449672, %v841_v35 }
 0x770   :  { %v845_v61 = vmul.f32 %v843_v60, %v830_v47  ;;  %v860_v62 = vsub.f32 1.0, %v858_v59 }
 0x772   :  { %v847_v0 = vadd.f32 0.2548296, %v845_v61  ;;  %v862_v7 = vmul.f32 %v860_v62, %v794_v6 }
 0x774   :  { %v849_v1 = vmul.f32 %v847_v0, %v830_v47  ;;  %v864_v13 = vadd.f32 1.0, %v862_v7 }
 0x776   :  { %v859_v8 = vmul.f32 %v1246_v2, %v849_v1  ;;  %v866_v4 = vmul.f32 %v864_v13, %v788_v15 }
 0x778   :  { %v861_v11 = vsub.f32 1.0, %v859_v8 }
 0x77a   :  { %v863_v14 = vmul.f32 %v861_v11, %v795_v12 }
 0x77c   :  { %v865_v18 = vadd.f32 1.0, %v863_v14 }
 0x77e   :  { %v867_v20 = vmul.f32 %v865_v18, %v789_v17 }
 0x780   :  { %v872_v21 = vpack.c.bf16 %v867_v20, %v866_v4 }
 0x782   :  { %1139 = vmatmul.msk.bf16.vlgmr.msra.gmra.mxu1 %vm889_vm6, %v872_v21 }
 0x7ff   :  { %v902_v22 = vpop.f32.mrf.mxu1 }
 0x800   :  { %v1045_v22 = vld [vmem:[%s1684_s20] sm:$0x1] }
 0x807   :  { %v903_v23 = vpop.f32.mrf.mxu1 }
 0x808   :  { %v904_v19 = vadd.f32 %v1202_v10, %v903_v23 }
 0x80a   :  { %v906_v24 = vadd.f32 %v904_v19, %v1570_v63  ;;  %v1172_v63 = vld [vmem:[%s1680_s17 + $0x4] sm:$0xf] }
 0x80b   :  { %v1147_v37 = vor.u32 %v1172_v63, %v1144_v36 }
 0x80c   :  { %v909_v25 = vsel %vm699_vm13, %v906_v24, 0.0 }
 0x80d   :  { %910 = vadd.xlane.f32.xlu1 %v909_v25  ;;  %998 = vmatpush.bf16.msrb.mxu1 %v1147_v37 }
 0x811   :  { %1024 = vmatpush.bf16.msra.mxu1 %v1155_v45 }
 0x880   :  { %v911_v3 = vpop.xlane.xlu1 %910 }
 0x881   :  { %v912_v9 = vmul.f32 %v911_v3, %v1553_v28 }
 0x883   :  { %v913_v26 = vsub.f32 %v906_v24, %v912_v9 }
 0x885   :  { %v914_v27 = vmul.f32 %v913_v26, %v913_v26 }
 0x887   :  { %v915_v30 = vsel %vm699_vm13, %v914_v27, 0.0 }
 0x888   :  { %916 = vadd.xlane.f32.xlu2 %v915_v30 }
 0x8fb   :  { %v917_v38 = vpop.xlane.xlu2 %916 }
 0x8fc   :  { %v918_v16 = vmul.f32 %v917_v38, %v1553_v28 }
 0x8fe   :  { %v919_v44 = vadd.f32 1e-05, %v918_v16 }
 0x900   :  { %1247 = vrsqrt.f32 %v919_v44  ;;  %vm926_vm2 = vweird.f32 %v919_v44 }
 0x906   :  { %v1248_v28 = vpop.eup %1247 }
 0x907   :  { %v921_v46 = vmul.f32 %v1248_v28, %v919_v44  ;;  %vm927_vm13 = vweird.f32 %v1248_v28 }
 0x908   :  { %vm928_vm3 = vmor %vm926_vm2, %vm927_vm13 }
 0x909   :  { %v922_v47 = vmul.f32 %v1248_v28, %v921_v46 }
 0x90b   :  { %v923_v48 = vmul.f32 0.5, %v922_v47 }
 0x90d   :  { %v924_v49 = vsub.f32 1.5, %v923_v48 }
 0x90f   :  { %v925_v50 = vmul.f32 %v1248_v28, %v924_v49 }
 0x911   :  { %v929_v52 = vsel %vm928_vm3, %v1248_v28, %v925_v50 }
 0x912   :  { %v930_v54 = vmul.f32 %v929_v52, %v913_v26 }
 0x914   :  { %v934_v55 = vmul.f32 %v1203_v51, %v930_v54 }
 0x916   :  { %v938_v56 = vadd.f32 %v1204_v53, %v934_v55 }
 0x918   :  { %v939_v57 = vadd.f32 %v938_v56, %v1414_v29  ;;  %v1044_v33 = vpack.c.bf16 %v938_v56, %v938_v56  ;;  %v945_v29 = vld [vmem:[%s1682_s18] sm:$0xf] }
 0x919   :  { %v948_v60 = vperm.slane %v945_v29, 1  ;;  %v947_v0 = vperm.slane %v945_v29, 0  ;;  %v950_v11 = vperm.slane %v945_v29, 3  ;;  %v949_v14 = vperm.slane %v945_v29, 2 }
 0x91a   :  { %v944_v35 = vpack.c.bf16 %v939_v57, %v939_v57  ;;  %v1047_v59 = vrot.slane %v1044_v33, 2 }
 0x91c   :  { %1156 = vmatmul.msk.bf16.vlgmr.msra.gmra.mxu2 %vm86_vm0, %v944_v35  ;;  %1157 = vmatmul.msk.bf16.vlgmr.msrb.gmra.mxu1 %vm86_vm0, %v944_v35 }
 0x91d   :  { %1064 = vmatpush.bf16.msra.mxu2 %v1176_v58 }
 0x92c   :  { %1158 = vmatmul.msk.bf16.vlgmr.msrb.gmra.mxu2 %vm86_vm0, %v944_v35  ;;  %1159 = vmatmul.msk.bf16.vlgmr.msra.gmra.mxu1 %vm86_vm0, %v944_v35 }
 0x93c   :  { %1164 = vmatmul.msk.bf16.vlgmr.msra.gmra.mxu2 %vm86_vm0, %v1047_v59  ;;  %vm1070_vm0 = vcmask 253952  }
 0x999   :  { %v1000_v61 = vpop.f32.mrf.mxu1 }
 0x99a   :  { %v1001_v62 = vadd.f32 %v1000_v61, %v948_v60 }
 0x99c   :  { %v1034_v2 = vrot.slane %v1001_v62, 4 }
 0x99f   :  { %v987_v1 = vpop.f32.mrf.mxu2 }
 0x9a0   :  { %v988_v5 = vadd.f32 %v987_v1, %v947_v0 }
 0x9a1   :  { %v1002_v6 = vpop.f32.mrf.mxu1 }
 0x9a2   :  { %v1036_v7 = vsel %vm570_vm4, %v988_v5, %v1034_v2 }
 0x9a3   :  { %1040 = vst [vmem:[%s1683_s21] sm:$0xff] %v1036_v7 }
 0x9a7   :  { %v989_v8 = vpop.f32.mrf.mxu2 }
 0x9a9   :  { %v1026_v12 = vpop.f32.mrf.mxu1 }
 0x9aa   :  { %v1027_v13 = vadd.f32 %v1026_v12, %v950_v11 }
 0x9ac   :  { %v1035_v17 = vrot.slane %v1027_v13, 4 }
 0x9af   :  { %v1013_v15 = vpop.f32.mrf.mxu2 }
 0x9b0   :  { %v1014_v18 = vadd.f32 %v1013_v15, %v949_v14 }
 0x9b1   :  { %v1028_v4 = vpop.f32.mrf.mxu1 }
 0x9b2   :  { %v1037_v20 = vsel %vm570_vm4, %v1014_v18, %v1035_v17 }
 0x9b3   :  { %1041 = vst [vmem:[%s1683_s21 + $0x8] sm:$0xff] %v1037_v20 }
 0x9b7   :  { %v1015_v21 = vpop.f32.mrf.mxu2 }
 0x9bf   :  { %v1066_v10 = vpop.f32.mrf.mxu2 }
 0x9c0   :  { %v1067_v23 = vadd.f32 %v1066_v10, %v1045_v22 }
 0x9c2   :  { %1071 = vst.msk [vmem:[%s1685_s22] sm:$0x1] %vm1070_vm0, %v1067_v23 }
 0x9c7   :  { %v1068_v19 = vpop.f32.mrf.mxu2 }

// kernel: dofa_forward.5
= control target key start
LH: loop header
LB: loop body
LE: loop exit
PB: predicated region body
PF: predicated region fallthrough
CT: control target
= control target key end

     0   :  { %s2058_s24 = smov 0   ;;  %s2399_s0 = inlined_call_operand.vmem [shape: f32[8,64], index: 0, kind: input, shape index: {}]   ;;  %s2400_s1 = inlined_call_operand.vmem [shape: f32[8,32], index: 1, kind: input, shape index: {}]   ;;  %s2401_s2 = inlined_call_operand.vmem [shape: f32[1,32], index: 2, kind: input, shape index: {}]   ;;  %s2402_s3 = inlined_call_operand.vmem [shape: f32[64,32], index: 3, kind: input, shape index: {}]   ;;  %s2403_s4 = inlined_call_operand.vmem [shape: f32[1,32], index: 4, kind: input, shape index: {}]   ;;  %s2404_s5 = inlined_call_operand.vmem [shape: f32[2,1,32], index: 5, kind: input, shape index: {}]   ;;  %s2405_s6 = inlined_call_operand.vmem [shape: f32[2,1,32], index: 6, kind: input, shape index: {}]   ;;  %s2406_s7 = inlined_call_operand.vmem [shape: bf16[2,32,96], index: 7, kind: input, shape index: {}]   ;;  %s2407_s8 = inlined_call_operand.vmem [shape: f32[2,1,96], index: 8, kind: input, shape index: {}]   ;;  %s2408_s9 = inlined_call_operand.vmem [shape: bf16[2,32,32], index: 9, kind: input, shape index: {}]   ;;  %s2409_s10 = inlined_call_operand.vmem [shape: f32[2,1,32], index: 10, kind: input, shape index: {}]   ;;  %s2410_s11 = inlined_call_operand.vmem [shape: f32[2,1,32], index: 11, kind: input, shape index: {}]   ;;  %s2411_s12 = inlined_call_operand.vmem [shape: f32[2,1,32], index: 12, kind: input, shape index: {}]   ;;  %s2412_s13 = inlined_call_operand.vmem [shape: bf16[2,32,128], index: 13, kind: input, shape index: {}]   ;;  %s2413_s14 = inlined_call_operand.vmem [shape: f32[2,1,128], index: 14, kind: input, shape index: {}]   ;;  %s2414_s15 = inlined_call_operand.vmem [shape: bf16[2,128,32], index: 15, kind: input, shape index: {}]   ;;  %s2415_s16 = inlined_call_operand.vmem [shape: f32[2,1,32], index: 16, kind: input, shape index: {}]   ;;  %s2416_s17 = inlined_call_operand.vmem [shape: f32[10,32], index: 17, kind: output, shape index: {}]  }
   0x1   :  { %2419 = sst [smem:[#allocation8_spill]] %s2399_s0 }
   0x2   :  { %2420 = sst [smem:[#allocation9_spill]] %s2400_s1 }
   0x3   :  { %2421 = sst [smem:[#allocation10_spill]] %s2403_s4 }
   0x4   :  { %2422 = sst [smem:[#allocation11_spill]] %s2404_s5 }
   0x5   :  { %2423 = sst [smem:[#allocation12_spill]] %s2405_s6 }
   0x6   :  { %2424 = sst [smem:[#allocation13_spill]] %s2406_s7 }
   0x7   :  { %2425 = sst [smem:[#allocation14_spill]] %s2408_s9 }
   0x8 LB: > { %2426 = sst [smem:[#allocation6_spill]] %s1949_s24  ;;  %s1758_s25 = sadd.s32 4294967295, %s1949_s24   ;;  %s1949_s24 = sphi %s2058_s24, %s27_s24  }
   0x9   : > { %p1761_p0 = scmp.ge.s32.totalorder %s1949_s24, 1  ;;  %p576_p1 = scmp.lt.s32.totalorder %s1949_s24, 3 }
   0xb   : > { %p577_p2 = pnand %p1761_p0, %p576_p1 }
   0xd   : > { %580 = sbr.rel (%p577_p2) target bundleno = 2164 (0x874), region = 88 }
  0x12   : > { %p662_p3 = scmp.lt.s32.totalorder %s1758_s25, 1  ;;  %s2429_s7 = sld [smem:[#allocation13_spill]] }
  0x13   : > { %s2430_s9 = sld [smem:[#allocation14_spill]]  ;;  %p1770_p4 = scmp.ne.s32.totalorder %s1758_s25, 0 }
  0x14   : > { %s2066_s26 = scalar_select %p662_p3, %s1758_s25, 1 }
  0x15   : > { %s2433_s28 = sld [smem:[#allocation10_spill]] (!%p1770_p4) }
  0x16   : > { %s1848_s19 = sshll.u32 %s2066_s26, 4  ;;  %s686_s6 = scalar_lea.vmem %s2410_s11, %s2066_s26 }
  0x17   : > { %s689_s21 = scalar_lea.vmem %s2411_s12, %s2066_s26  ;;  %s705_s1 = scalar_lea.vmem %s2415_s16, %s2066_s26 }
  0x18   : > { %s2084_s27 = scalar_lea.vmem %s2429_s7, %s1848_s19  ;;  %s2106_s7 = scalar_lea.vmem %s2412_s13, %s1848_s19 }
  0x19   : > { %s2089_s4 = scalar_lea.vmem %s2430_s9, %s1848_s19  ;;  %s697_s9 = scalar_lea.vmem %s2413_s14, %s2066_s26 }
  0x1a   : > { %2431 = sst [smem:[#allocation7_spill]] %s2089_s4  ;;  %s1851_s4 = sshll.u32 %s2066_s26, 6 }
  0x1b   : > { %s2116_s0 = scalar_lea.vmem %s2414_s15, %s1851_s4  ;;  %710 = sbr.rel (%p1770_p4) target bundleno = 184 (0xb8), region = 92 }
  0x1c   : > { %s2432_s4 = sld [smem:[#allocation8_spill]] (!%p1770_p4) }
  0x1d   : > { %s2434_s25 = sld [smem:[#allocation9_spill]] (!%p1770_p4) }
  0x20   : > { %v718_v0 = vld [vmem:[%s2402_s3 + $0x30] sm:$0xff]  ;;  %v719_v1 = vld [vmem:[%s2402_s3 + $0x38] sm:$0xff]  ;;  %v716_v2 = vld [vmem:[%s2402_s3 + $0x20] sm:$0xff]  ;;  %vm729_vm0 = vcmask 523264   ;;  %vm749_vm1 = vcmask 253952   ;;  %vm751_vm2 = vcmask 257024  }
  0x21   : > { %v724_v3 = vpack.c.bf16 %v719_v1, %v718_v0  ;;  %v717_v4 = vld [vmem:[%s2402_s3 + $0x28] sm:$0xff]  ;;  %v714_v6 = vld [vmem:[%s2402_s3 + $0x10] sm:$0xff]  ;;  %v715_v7 = vld [vmem:[%s2402_s3 + $0x18] sm:$0xff]  ;;  %vm755_vm3 = vcmask 261124  }
  0x22   : > { %v723_v5 = vpack.c.bf16 %v717_v4, %v716_v2  ;;  %v722_v8 = vpack.c.bf16 %v715_v7, %v714_v6  ;;  %v712_v9 = vld [vmem:[%s2402_s3] sm:$0xff]  ;;  %v713_v10 = vld [vmem:[%s2402_s3 + $0x8] sm:$0xff] }
  0x23   : > { %737 = vmatpush.bf16.msra.mxu0 %v724_v3  ;;  %v721_v11 = vpack.c.bf16 %v713_v10, %v712_v9  ;;  %v711_v12 = vld [vmem:[%s2432_s4] sm:$0xff] }
  0x24   : > { %v720_v13 = vpack.c.bf16 %v711_v12, %v711_v12  ;;  %v748_v14 = vld [vmem:[%s2401_s2] sm:$0x1] }
  0x25   : > { %v753_v15 = vld [vmem:[%s2401_s2] sm:$0x1]  ;;  %750 = vst.msk [vmem:[%s2416_s17] sm:$0x1] %vm749_vm1, %v748_v14 }
  0x26   : > { %754 = vst.msk [vmem:[%s2416_s17 + $0x5] sm:$0x1] %vm749_vm1, %v753_v15  ;;  %v1896_v16 = vld [vmem:[%s2433_s28] ss:$0 sm:$0xff] }
  0x27   : > { %738 = vmatpush.bf16.msra.mxu0 %v723_v5  ;;  %v746_v18 = vld [vmem:[%s2434_s25] sm:$0xff] }
  0x2b   : > { %739 = vmatpush.bf16.msra.mxu0 %v722_v8 }
  0x2f   : > { %740 = vmatpush.bf16.msra.mxu0 %v721_v11 }
  0x32   : > { %1771 = vmatmul.msk.bf16.vlgmr.msra.gmra.mxu0 %vm729_vm0, %v720_v13 }
  0xaf   : > { %v742_v17 = vpop.f32.mrf.mxu0 }
  0xb0   : > { %v743_v19 = vadd.f32 %v1896_v16, %v742_v17 }
  0xb2   : > { %v747_v20 = vadd.f32 %v746_v18, %v743_v19 }
  0xb4   : > { %752 = vst.msk [vmem:[%s2416_s17 + $0x1] sm:$0xf] %vm751_vm2, %v747_v20 }
  0xb5   : > { %756 = vst.msk [vmem:[%s2416_s17 + $0x2] sm:$0xf0] %vm755_vm3, %v747_v20 }
  0xb7   : > { %v744_v21 = vpop.f32.mrf.mxu0 }
  0xb8 PF: > { %vm761_vm4 = vcmask 261120   ;;  %vm765_vm5 = vcmask 254976   ;;  %v1951_v26 = vmov 32.0   ;;  %v1853_v43 = vld [vmem:[%s2084_s27 + $0x8] sm:$0xff]  ;;  %v1852_v45 = vld [vmem:[%s2084_s27] sm:$0xff]  ;;  %s2435_s4 = sld [smem:[#allocation11_spill]]  ;;  %s2439_s19 = scalar_lea.vmem %s2407_s8, %s2066_s26 }
  0xb9   : > { %1905 = vrcp.f32 %v1951_v26  ;;  %854 = vmatpush.bf16.msra.mxu0 %v1853_v43  ;;  %s2437_s18 = sld [smem:[#allocation12_spill]]  ;;  %v1899_v10 = vld [vmem:[%s2439_s19] ss:$0 sm:$0xff]  ;;  %vm862_vm13 = vcmask 64512   ;;  %s1952_s23 = smov 80   ;;  %vm864_vm14 = vcmask 58368  }
  0xba   : > { %s1953_s24 = smov 72   ;;  %s1954_s27 = smov 96  }
  0xbb   : > { %s1955_s28 = smov 120   ;;  %s1958_s25 = smov 104  }
  0xbc   : > { %v2176_v22 = vld [vmem:[%s2416_s17] sm:$0xff]  ;;  %v2183_v24 = vld [vmem:[%s2416_s17 + $0x8] sm:$0x3]  ;;  %s1959_s29 = smov 48   ;;  %s1963_s20 = smov 64  }
  0xbd   : > { %v762_v23 = vsel %vm761_vm4, %v2176_v22, 0.0  ;;  %v766_v25 = vsel %vm765_vm5, %v2183_v24, 0.0  ;;  %855 = vmatpush.bf16.msra.mxu0 %v1852_v45  ;;  %s2440_s22 = sld [smem:[#allocation7_spill]]  ;;  %s1964_s19 = smov 8  }
  0xbe   : > { %763 = vadd.xlane.f32.xlu0 %v762_v23  ;;  %s2436_s5 = scalar_lea.vmem %s2435_s4, %s2066_s26  ;;  %s1956_s4 = smov 112  }
  0xbf   : > { %v1906_v27 = vpop.eup %1905  ;;  %v1897_v0 = vld [vmem:[%s2436_s5] ss:$0 sm:$0xff]  ;;  %s2438_s30 = scalar_lea.vmem %s2437_s18, %s2066_s26  ;;  %s1957_s5 = smov 88  }
  0xc0   : > { %v770_v28 = vmul.f32 32.0, %v1906_v27  ;;  %vm774_vm6 = vweird.f32 %v1906_v27  ;;  %v1898_v5 = vld [vmem:[%s2438_s30] ss:$0 sm:$0xff]  ;;  %s1960_s18 = smov 40   ;;  %s1962_s30 = smov 56  }
  0xc2   : > { %v771_v29 = vsub.f32 1.0, %v770_v28 }
  0xc4   : > { %v772_v30 = vmul.f32 %v1906_v27, %v771_v29 }
  0xc6   : > { %767 = vadd.xlane.f32.xlu0 %v766_v25  ;;  %v773_v31 = vadd.f32 %v1906_v27, %v772_v30 }
  0xc8   : > { %v2187_v32 = vsel %vm774_vm6, %v1906_v27, %v773_v31 }
 0x131   : > { %v764_v33 = vpop.xlane.xlu0 %763 }
 0x132   : > { %v776_v34 = vmul.f32 %v2187_v32, %v764_v33 }
 0x134   : > { %v778_v35 = vsub.f32 %v2176_v22, %v776_v34 }
 0x136   : > { %v780_v36 = vmul.f32 %v778_v35, %v778_v35 }
 0x138   : > { %v782_v37 = vsel %vm761_vm4, %v780_v36, 0.0 }
 0x139   : > { %783 = vadd.xlane.f32.xlu1 %v782_v37  ;;  %v768_v38 = vpop.xlane.xlu0 %767 }
 0x13a   : > { %v777_v39 = vmul.f32 %v2187_v32, %v768_v38 }
 0x13c   : > { %v779_v40 = vsub.f32 %v2183_v24, %v777_v39 }
 0x13e   : > { %v781_v41 = vmul.f32 %v779_v40, %v779_v40 }
 0x140   : > { %v785_v42 = vsel %vm765_vm5, %v781_v41, 0.0 }
 0x141   : > { %786 = vadd.xlane.f32.xlu1 %v785_v42 }
 0x1ac   : > { %v784_v44 = vpop.xlane.xlu1 %783 }
 0x1ad   : > { %v788_v46 = vmul.f32 %v784_v44, %v2187_v32 }
 0x1af   : > { %v790_v47 = vadd.f32 1e-06, %v788_v46 }
 0x1b1   : > { %1907 = vrsqrt.f32 %v790_v47  ;;  %vm798_vm8 = vweird.f32 %v790_v47 }
 0x1b4   : > { %v787_v48 = vpop.xlane.xlu1 %786 }
 0x1b5   : > { %v789_v49 = vmul.f32 %v787_v48, %v2187_v32  ;;  %v1038_v48 = vlaneseq }
 0x1b7   : > { %v1908_v50 = vpop.eup %1907  ;;  %v791_v51 = vadd.f32 1e-06, %v789_v49  ;;  %v1045_v49 = vand.u32 127, %v1038_v48 }
 0x1b8   : > { %v793_v52 = vmul.f32 %v1908_v50, %v790_v47  ;;  %vm799_vm7 = vweird.f32 %v1908_v50 }
 0x1b9   : > { %1909 = vrsqrt.f32 %v791_v51  ;;  %vm800_vm9 = vmor %vm798_vm8, %vm799_vm7  ;;  %vm808_vm11 = vweird.f32 %v791_v51  ;;  %vm1056_vm15 = vcmp.ge.s32.totalorder %v1045_v49, 5  ;;  %vm1073_vm0 = vcmp.ge.s32.totalorder %v1045_v49, 10 }
 0x1ba   : > { %v794_v53 = vmul.f32 %v1908_v50, %v793_v52  ;;  %vm1091_vm1 = vcmp.ge.s32.totalorder %v1045_v49, 15  ;;  %vm1109_vm2 = vcmp.ge.s32.totalorder %v1045_v49, 20  ;;  %vm1127_vm3 = vcmp.ge.s32.totalorder %v1045_v49, 25 }
 0x1bb   : > { %vm1145_vm7 = vcmp.ge.s32.totalorder %v1045_v49, 30 }
 0x1bc   : > { %v795_v54 = vmul.f32 0.5, %v794_v53 }
 0x1be   : > { %v796_v55 = vsub.f32 1.5, %v795_v54 }
 0x1bf   : > { %v1910_v56 = vpop.eup %1909 }
 0x1c0   : > { %v797_v57 = vmul.f32 %v1908_v50, %v796_v55  ;;  %v803_v58 = vmul.f32 %v1910_v56, %v791_v51  ;;  %vm809_vm10 = vweird.f32 %v1910_v56  ;;  %v1039_v55 = vshrl.u32 %v1038_v48, 7 }
 0x1c1   : > { %vm810_vm12 = vmor %vm808_vm11, %vm809_vm10 }
 0x1c2   : > { %v804_v59 = vmul.f32 %v1910_v56, %v803_v58  ;;  %v801_v60 = vsel %vm800_vm9, %v1908_v50, %v797_v57  ;;  %v1961_v50 = vmov 0   ;;  %v1040_v58 = vadd.s32 8, %v1039_v55 }
 0x1c3   : > { %v812_v63 = vmul.f32 %v801_v60, %v778_v35  ;;  %v1057_v51 = vsel %vm1056_vm15, 1, %v1961_v50  ;;  %v1074_v52 = vsel %vm1073_vm0, 1, %v1961_v50  ;;  %v1092_v54 = vsel %vm1091_vm1, 1, %v1961_v50 }
 0x1c4   : > { %v805_v61 = vmul.f32 0.5, %v804_v59  ;;  %v1075_v53 = vadd.s32 %v1074_v52, %v1057_v51  ;;  %v1110_v57 = vsel %vm1109_vm2, 1, %v1961_v50  ;;  %v1128_v60 = vsel %vm1127_vm3, 1, %v1961_v50 }
 0x1c5   : > { %v817_v4 = vmul.f32 %v1897_v0, %v812_v63  ;;  %vm1059_vm6 = vcmp.ge.s32.totalorder %v1040_v58, 10  ;;  %v1146_v63 = vsel %vm1145_vm7, 1, %v1961_v50  ;;  %vm1077_vm8 = vcmp.ge.s32.totalorder %v1040_v58, 15 }
 0x1c6   : > { %v806_v62 = vsub.f32 1.5, %v805_v61  ;;  %vm1163_vm9 = vcmp.ge.s32.totalorder %v1045_v49, 35  ;;  %vm1046_vm10 = vcmp.ge.s32.totalorder %v1039_v55, 5  ;;  %vm1176_vm0 = vcmask 326656  }
 0x1c7   : > { %v822_v7 = vadd.f32 %v1898_v5, %v817_v4  ;;  %v1041_v4 = vadd.s32 16, %v1039_v55 }
 0x1c8   : > { %v807_v1 = vmul.f32 %v1910_v56, %v806_v62  ;;  %v1064_v62 = vsel %vm1059_vm6, 1, %v1961_v50 }
 0x1c9   : > { %vm1096_vm11 = vcmp.ge.s32.totalorder %v1041_v4, 20 }
 0x1ca   : > { %v811_v2 = vsel %vm810_vm12, %v1910_v56, %v807_v1  ;;  %v1093_v56 = vadd.s32 %v1092_v54, %v1075_v53 }
 0x1cb   : > { %v813_v3 = vmul.f32 %v811_v2, %v779_v40  ;;  %v1082_v2 = vsel %vm1077_vm8, 1, %v1961_v50 }
 0x1cc   : > { %v1111_v59 = vadd.s32 %v1110_v57, %v1093_v56 }
 0x1cd   : > { %v818_v6 = vmul.f32 %v1897_v0, %v813_v3  ;;  %v1069_v0 = vadd.s32 1, %v1064_v62  ;;  %v1164_v3 = vsel %vm1163_vm9, 1, %v1961_v50  ;;  %vm1289_vm9 = vcmask 130114  }
 0x1ce   : > { %v1129_v61 = vadd.s32 %v1128_v60, %v1111_v59 }
 0x1cf   : > { %v823_v8 = vadd.f32 %v1898_v5, %v818_v6  ;;  %v1087_v5 = vadd.s32 %v1082_v2, %v1069_v0 }
 0x1d0   : > { %v1147_v1 = vadd.s32 %v1146_v63, %v1129_v61 }
 0x1d1   : > { %v828_v9 = vpack.c.bf16 %v823_v8, %v822_v7  ;;  %v1051_v7 = vsel %vm1046_vm10, 1, %v1961_v50  ;;  %v1042_v8 = vadd.s32 24, %v1039_v55  ;;  %vm1291_vm10 = vcmask 126016  }
 0x1d2   : > { %v1165_v6 = vadd.s32 %v1164_v3, %v1147_v1 }
 0x1d3   : > { %1780 = vmatmul.msk.bf16.vlgmr.msra.gmra.mxu0 %vm761_vm4, %v828_v9  ;;  %vm1115_vm1 = vcmp.ge.s32.totalorder %v1042_v8, 25  ;;  %vm1133_vm2 = vcmp.ge.s32.totalorder %v1042_v8, 30 }
 0x1d4   : > { %vm1167_vm12 = vcmp.eq.s32.totalorder %v1087_v5, %v1165_v6  ;;  %vm1166_vm15 = vcmp.eq.s32.totalorder %v1051_v7, %v1165_v6 }
 0x250   : > { %v857_v11 = vpop.f32.mrf.mxu0 }
 0x251   : > { %v2215_v12 = vadd.f32 %v1899_v10, %v857_v11 }
 0x253   : > { %908 = vrot.lane.b32.xlu0 %v2215_v12, %s1952_s23  ;;  %916 = vrot.lane.b32.xlu2 %v2215_v12, %s1953_s24  ;;  %863 = vst.msk [vmem:[#allocation2] sm:$0xff] %vm862_vm13, %v2215_v12 }
 0x258   : > { %v859_v13 = vpop.f32.mrf.mxu0 }
 0x259   : > { %v2221_v14 = vadd.f32 %v1899_v10, %v859_v13 }
 0x25a   : > { %v956_v38 = vld [vmem:[#allocation2] sm:$0xff] }
 0x25b   : > { %910 = vrot.lane.b32.xlu1 %v2221_v14, %s1952_s23  ;;  %892 = vrot.lane.b32.xlu0 %v2215_v12, %s1954_s27  ;;  %865 = vst.msk [vmem:[#allocation2 + $0x8] sm:$0x3] %vm864_vm14, %v2221_v14  ;;  %s1965_s23 = smov 16  }
 0x25c   : > { %918 = vrot.lane.b32.xlu2 %v2221_v14, %s1953_s24  ;;  %s1966_s24 = smov 24  }
 0x263   : > { %870 = vrot.lane.b32.xlu1 %v2221_v14, %s1955_s28  ;;  %876 = vrot.lane.b32.xlu0 %v2215_v12, %s1956_s4 }
 0x264   : > { %900 = vrot.lane.b32.xlu2 %v2215_v12, %s1957_s5 }
 0x26b   : > { %884 = vrot.lane.b32.xlu1 %v2215_v12, %s1958_s25  ;;  %886 = vrot.lane.b32.xlu0 %v2221_v14, %s1958_s25 }
 0x26c   : > { %902 = vrot.lane.b32.xlu2 %v2221_v14, %s1957_s5 }
 0x273   : > { %940 = vrot.lane.b32.xlu1 %v2215_v12, %s1959_s29  ;;  %948 = vrot.lane.b32.xlu0 %v2215_v12, %s1960_s18 }
 0x274   : > { %894 = vrot.lane.b32.xlu2 %v2221_v14, %s1954_s27 }
 0x27b   : > { %942 = vrot.lane.b32.xlu0 %v2221_v14, %s1959_s29 }
 0x27c   : > { %868 = vrot.lane.b32.xlu2 %v2215_v12, %s1955_s28 }
 0x284   : > { %878 = vrot.lane.b32.xlu2 %v2221_v14, %s1956_s4  ;;  %s2441_s4 = scalar_lea.vmem %s2409_s10, %s2066_s26 }
 0x28c   : > { %950 = vrot.lane.b32.xlu2 %v2221_v14, %s1960_s18 }
 0x2ad   : > { %v917_v15 = vpop.permute.xlu2 %916 }
 0x2ae   : > { %922 = vst.msk [vmem:[#allocation3 + $0x1e] sm:$0xff] %vm862_vm13, %v917_v15  ;;  %v1101_v15 = vsel %vm1096_vm11, 1, %v1961_v50  ;;  %vm1302_vm11 = vcmask 193664  }
 0x2b6   : > { %v919_v16 = vpop.permute.xlu2 %918 }
 0x2b7   : > { %923 = vst.msk [vmem:[#allocation3 + $0x26] sm:$0x3] %vm864_vm14, %v919_v16 }
 0x2be   : > { %v901_v17 = vpop.permute.xlu2 %900  ;;  %v965_v18 = vld [vmem:[#allocation3 + $0x20] sm:$0xff] }
 0x2bf   : > { %906 = vst.msk [vmem:[#allocation3 + $0xa] sm:$0xff] %vm862_vm13, %v901_v17  ;;  %1781 = vmatpush.xpose.msk.msrb.mxu0 %vm862_vm13, %v965_v18  ;;  %1866 = vmatpush.xpose.msk.msra.mxu1 %vm862_vm13, %v965_v18 }
 0x2c5   : > { %v909_v19 = vpop.permute.xlu0 %908 }
 0x2c6   : > { %914 = vst.msk [vmem:[#allocation3 + $0x14] sm:$0xff] %vm862_vm13, %v909_v19  ;;  %v903_v20 = vpop.permute.xlu2 %902 }
 0x2c7   : > { %907 = vst.msk [vmem:[#allocation3 + $0x12] sm:$0x3] %vm864_vm14, %v903_v20  ;;  %v1106_v20 = vadd.s32 3, %v1101_v15 }
 0x2c9   : > { %vm1168_vm3 = vcmp.eq.s32.totalorder %v1106_v20, %v1165_v6 }
 0x2cd   : > { %v911_v21 = vpop.permute.xlu1 %910  ;;  %v893_v23 = vpop.permute.xlu0 %892 }
 0x2ce   : > { %915 = vst.msk [vmem:[#allocation3 + $0x1c] sm:$0x3] %vm864_vm14, %v911_v21  ;;  %v895_v25 = vpop.permute.xlu2 %894  ;;  %v963_v30 = vld [vmem:[#allocation3 + $0x10] sm:$0xff]  ;;  %v1120_v21 = vsel %vm1115_vm1, 1, %v1961_v50 }
 0x2cf   : > { %898 = vst.msk [vmem:[#allocation3] sm:$0xff] %vm862_vm13, %v893_v23 }
 0x2d0   : > { %899 = vst.msk [vmem:[#allocation3 + $0x8] sm:$0x3] %vm864_vm14, %v895_v25  ;;  %v1125_v25 = vadd.s32 4, %v1120_v21 }
 0x2d5   : > { %v871_v26 = vpop.permute.xlu1 %870  ;;  %v877_v27 = vpop.permute.xlu0 %876  ;;  %v964_v28 = vld [vmem:[#allocation3 + $0x18] sm:$0xff] }
 0x2d6   : > { %875 = vst.msk [vmem:[#allocation2 + $0x12] sm:$0x3] %vm864_vm14, %v871_v26  ;;  %v869_v29 = vpop.permute.xlu2 %868  ;;  %1782 = vmatpush.xpose.msk.msrb.mxu0 %vm862_vm13, %v964_v28  ;;  %1867 = vmatpush.xpose.msk.msra.mxu1 %vm862_vm13, %v964_v28  ;;  %v961_v36 = vld [vmem:[#allocation3] sm:$0xff]  ;;  %v1043_v28 = vadd.s32 32, %v1039_v55 }
 0x2d7   : > { %882 = vst.msk [vmem:[#allocation2 + $0x14] sm:$0xff] %vm862_vm13, %v877_v27  ;;  %v962_v34 = vld [vmem:[#allocation3 + $0x8] sm:$0xff]  ;;  %v1138_v27 = vsel %vm1133_vm2, 1, %v1961_v50 }
 0x2d8   : > { %874 = vst.msk [vmem:[#allocation2 + $0xa] sm:$0xff] %vm862_vm13, %v869_v29  ;;  %vm1152_vm6 = vcmp.ge.s32.totalorder %v1043_v28, 35 }
 0x2da   : > { %1783 = vmatpush.xpose.msk.msrb.mxu0 %vm862_vm13, %v963_v30  ;;  %1868 = vmatpush.xpose.msk.msra.mxu1 %vm862_vm13, %v963_v30 }
 0x2dd   : > { %v885_v31 = vpop.permute.xlu1 %884  ;;  %v887_v33 = vpop.permute.xlu0 %886 }
 0x2de   : > { %890 = vst.msk [vmem:[#allocation2 + $0x1e] sm:$0xff] %vm862_vm13, %v885_v31  ;;  %v879_v35 = vpop.permute.xlu2 %878  ;;  %1784 = vmatpush.xpose.msk.msrb.mxu0 %vm862_vm13, %v962_v34  ;;  %1869 = vmatpush.xpose.msk.msra.mxu1 %vm862_vm13, %v962_v34  ;;  %v1143_v31 = vadd.s32 %v1138_v27, %v1125_v25 }
 0x2df   : > { %891 = vst.msk [vmem:[#allocation2 + $0x26] sm:$0x3] %vm864_vm14, %v887_v33  ;;  %v957_v37 = vld [vmem:[#allocation2 + $0x8] sm:$0xff]  ;;  %v958_v42 = vld [vmem:[#allocation2 + $0x10] sm:$0xff] }
 0x2e0   : > { %883 = vst.msk [vmem:[#allocation2 + $0x1c] sm:$0x3] %vm864_vm14, %v879_v35  ;;  %vm1169_vm7 = vcmp.eq.s32.totalorder %v1143_v31, %v1165_v6  ;;  %v1157_v35 = vsel %vm1152_vm6, 1, %v1961_v50 }
 0x2e2   : > { %1785 = vmatpush.xpose.msk.msrb.mxu0 %vm862_vm13, %v961_v36  ;;  %1870 = vmatpush.xpose.msk.msra.mxu1 %vm862_vm13, %v961_v36 }
 0x2e5   : > { %v941_v39 = vpop.permute.xlu1 %940  ;;  %v949_v40 = vpop.permute.xlu0 %948  ;;  %1787 = vmatmul.msk.f32.vlgmr.msra.gmra.mxu1 %vm862_vm13, %v957_v37  ;;  %1786 = vmatmul.msk.f32.vlgmr.msrb.gmra.mxu0 %vm862_vm13, %v956_v38  ;;  %v1162_v38 = vadd.s32 6, %v1157_v35  ;;  %v1855_v35 = vld [vmem:[%s2440_s22 + $0x8] sm:$0xff] }
 0x2e6   : > { %946 = vst.msk [vmem:[#allocation4 + $0x14] sm:$0xff] %vm862_vm13, %v941_v39  ;;  %v951_v41 = vpop.permute.xlu2 %950  ;;  %v960_v47 = vld [vmem:[#allocation2 + $0x20] sm:$0xff]  ;;  %1343 = vmatpush.bf16.msra.mxu3 %v1855_v35  ;;  %v1865_v35 = vld [vmem:[%s2116_s0 + $0x38] sm:$0xff] }
 0x2e7   : > { %954 = vst.msk [vmem:[#allocation4 + $0x1e] sm:$0xff] %vm862_vm13, %v949_v40  ;;  %v959_v45 = vld [vmem:[#allocation2 + $0x18] sm:$0xff]  ;;  %vm1170_vm8 = vcmp.eq.s32.totalorder %v1162_v38, %v1165_v6 }
 0x2e8   : > { %955 = vst.msk [vmem:[#allocation4 + $0x26] sm:$0x3] %vm864_vm14, %v951_v41 }
 0x2ed   : > { %v943_v43 = vpop.permute.xlu0 %942  ;;  %1788 = vmatmul.msk.f32.gmra.mxu1 %vm862_vm13, %v958_v42 }
 0x2ee   : > { %947 = vst.msk [vmem:[#allocation4 + $0x1c] sm:$0x3] %vm864_vm14, %v943_v43 }
 0x2ef   : > { %v970_v44 = vld [vmem:[#allocation4 + $0x20] sm:$0xff] }
 0x2f0   : > { %1258 = vmatpush.msra.mxu2 %v970_v44 }
 0x2f5   : > { %1789 = vmatmul.msk.f32.gmra.mxu1 %vm862_vm13, %v959_v45  ;;  %v969_v46 = vld [vmem:[#allocation4 + $0x18] sm:$0xff] }
 0x2f6   : > { %1259 = vmatpush.msra.mxu2 %v969_v46 }
 0x2fd   : > { %1790 = vmatmul.msk.f32.gmra.mxu1 %vm862_vm13, %v960_v47 }
 0x362   : > { %v1018_v9 = vpop.f32.mrf.mxu0  ;;  %v1021_v10 = vpop.f32.mrf.mxu1 }
 0x363   : > { %v1033_v11 = vmul.f32 0.35355338, %v1018_v9  ;;  %v1034_v13 = vmul.f32 0.35355338, %v1021_v10 }
 0x365   : > { %v1172_v16 = vsel %vm1167_vm12, %v1034_v13, -1e+30  ;;  %v1171_v17 = vsel %vm1166_vm15, %v1033_v11, -1e+30  ;;  %vm1313_vm12 = vcmask 261312  }
 0x366   : > { %v1180_v18 = vsel %vm1176_vm0, %v1172_v16, -inf  ;;  %v1177_v19 = vsel %vm1176_vm0, %v1171_v17, -inf }
 0x367   : > { %1181 = vmax.xlane.f32.xlu1 %v1180_v18  ;;  %1178 = vmax.xlane.f32.xlu2 %v1177_v19 }
 0x36a   : > { %v1024_v23 = vpop.f32.mrf.mxu1 }
 0x36b   : > { %v1035_v26 = vmul.f32 0.35355338, %v1024_v23 }
 0x36d   : > { %v1173_v29 = vsel %vm1168_vm3, %v1035_v26, -1e+30 }
 0x36e   : > { %v1183_v30 = vsel %vm1176_vm0, %v1173_v29, -inf }
 0x36f   : > { %1184 = vmax.xlane.f32.xlu0 %v1183_v30 }
 0x372   : > { %v1027_v33 = vpop.f32.mrf.mxu1 }
 0x373   : > { %v1036_v34 = vmul.f32 0.35355338, %v1027_v33 }
 0x375   : > { %v1174_v36 = vsel %vm1169_vm7, %v1036_v34, -1e+30 }
 0x376   : > { %v1186_v37 = vsel %vm1176_vm0, %v1174_v36, -inf }
 0x377   : > { %1187 = vmax.xlane.f32.xlu2 %v1186_v37 }
 0x37a   : > { %v1030_v39 = vpop.f32.mrf.mxu1 }
 0x37b   : > { %v1037_v40 = vmul.f32 0.35355338, %v1030_v39 }
 0x37d   : > { %v1175_v41 = vsel %vm1170_vm8, %v1037_v40, -1e+30 }
 0x37e   : > { %v1189_v42 = vsel %vm1176_vm0, %v1175_v41, -inf }
 0x37f   : > { %1190 = vmax.xlane.f32.xlu1 %v1189_v42 }
 0x383   : > { %934 = vrot.lane.b32.xlu0 %v2221_v14, %s1962_s30 }
 0x38b   : > { %924 = vrot.lane.b32.xlu0 %v2215_v12, %s1963_s20 }
 0x38f   : > { %932 = vrot.lane.b32.xlu2 %v2215_v12, %s1962_s30 }
 0x398   : > { %926 = vrot.lane.b32.xlu1 %v2221_v14, %s1963_s20 }
 0x3da   : > { %v1182_v43 = vpop.xlane.xlu1 %1181  ;;  %v1179_v44 = vpop.xlane.xlu2 %1178 }
 0x3db   : > { %v1193_v45 = vsub.f32 %v1172_v16, %v1182_v43  ;;  %v1192_v46 = vsub.f32 %v1171_v17, %v1179_v44 }
 0x3dd   : > { %v1199_v47 = vmul.f32 1.442695, %v1193_v45  ;;  %v1197_v48 = vmul.f32 1.442695, %v1192_v46  ;;  %v1900_v45 = vld [vmem:[%s2441_s4] ss:$0 sm:$0xff] }
 0x3df   : > { %1911 = vpow2.f32 %v1199_v47 }
 0x3e0   : > { %1913 = vpow2.f32 %v1197_v48 }
 0x3e2   : > { %v1185_v49 = vpop.xlane.xlu0 %1184 }
 0x3e3   : > { %v1194_v50 = vsub.f32 %v1173_v29, %v1185_v49 }
 0x3e5   : > { %v1912_v51 = vpop.eup %1911  ;;  %v1201_v52 = vmul.f32 1.442695, %v1194_v50 }
 0x3e6   : > { %v1914_v53 = vpop.eup %1913  ;;  %v1210_v54 = vsel %vm1176_vm0, %v1912_v51, 0.0 }
 0x3e7   : > { %1915 = vpow2.f32 %v1201_v52  ;;  %1211 = vadd.xlane.f32.xlu1 %v1210_v54  ;;  %v1207_v12 = vsel %vm1176_vm0, %v1914_v53, 0.0 }
 0x3e8   : > { %1208 = vadd.xlane.f32.xlu2 %v1207_v12 }
 0x3ea   : > { %v1188_v14 = vpop.xlane.xlu2 %1187 }
 0x3eb   : > { %v1195_v55 = vsub.f32 %v1174_v36, %v1188_v14  ;;  %v1854_v36 = vld [vmem:[%s2440_s22] sm:$0xff] }
 0x3ec   : > { %1344 = vmatpush.bf16.msra.mxu3 %v1854_v36 }
 0x3ed   : > { %v1916_v56 = vpop.eup %1915  ;;  %v1203_v57 = vmul.f32 1.442695, %v1195_v55 }
 0x3ee   : > { %v1213_v58 = vsel %vm1176_vm0, %v1916_v56, 0.0 }
 0x3ef   : > { %1917 = vpow2.f32 %v1203_v57  ;;  %1214 = vadd.xlane.f32.xlu0 %v1213_v58 }
 0x3f0   : > { %1598 = vmatpush.bf16.msrb.mxu3 %v1865_v35 }
 0x3f2   : > { %v1191_v59 = vpop.xlane.xlu1 %1190  ;;  %v933_v60 = vpop.permute.xlu2 %932 }
 0x3f3   : > { %v1196_v61 = vsub.f32 %v1175_v41, %v1191_v59  ;;  %938 = vst.msk [vmem:[#allocation4 + $0xa] sm:$0xff] %vm862_vm13, %v933_v60 }
 0x3f5   : > { %v1918_v62 = vpop.eup %1917  ;;  %v1205_v63 = vmul.f32 1.442695, %v1196_v61  ;;  %v935_v0 = vpop.permute.xlu0 %934  ;;  %v1857_v61 = vld [vmem:[%s2106_s7 + $0x8] sm:$0xff] }
 0x3f6   : > { %939 = vst.msk [vmem:[#allocation4 + $0x12] sm:$0x3] %vm864_vm14, %v935_v0  ;;  %v1216_v1 = vsel %vm1176_vm0, %v1918_v62, 0.0  ;;  %1445 = vmatpush.bf16.msra.mxu0 %v1857_v61  ;;  %v1856_v0 = vld [vmem:[%s2106_s7] sm:$0xff] }
 0x3f7   : > { %1919 = vpow2.f32 %v1205_v63  ;;  %1217 = vadd.xlane.f32.xlu2 %v1216_v1 }
 0x3fa   : > { %1446 = vmatpush.bf16.msra.mxu0 %v1856_v0 }
 0x3fd   : > { %v1920_v2 = vpop.eup %1919  ;;  %v925_v3 = vpop.permute.xlu0 %924  ;;  %v968_v4 = vld [vmem:[#allocation4 + $0x10] sm:$0xff] }
 0x3fe   : > { %930 = vst.msk [vmem:[#allocation4] sm:$0xff] %vm862_vm13, %v925_v3  ;;  %1260 = vmatpush.msra.mxu2 %v968_v4  ;;  %v1219_v5 = vsel %vm1176_vm0, %v1920_v2, 0.0 }
 0x3ff   : > { %1220 = vadd.xlane.f32.xlu1 %v1219_v5 }
 0x405   : > { %v966_v8 = vld [vmem:[#allocation4] sm:$0xff] }
 0x40a   : > { %v927_v6 = vpop.permute.xlu1 %926 }
 0x40b   : > { %931 = vst.msk [vmem:[#allocation4 + $0x8] sm:$0x3] %vm864_vm14, %v927_v6 }
 0x412   : > { %v967_v7 = vld [vmem:[#allocation4 + $0x8] sm:$0xff] }
 0x413   : > { %1261 = vmatpush.msra.mxu2 %v967_v7 }
 0x415   : > { %1262 = vmatpush.msra.mxu2 %v966_v8 }
 0x45a   : > { %v1212_v10 = vpop.xlane.xlu1 %1211 }
 0x45b   : > { %v1209_v9 = vpop.xlane.xlu2 %1208 }
 0x45c   : > { %1921 = vrcp.f32 %v1209_v9 }
 0x45d   : > { %1923 = vrcp.f32 %v1212_v10 }
 0x462   : > { %v1922_v11 = vpop.eup %1921  ;;  %v1215_v15 = vpop.xlane.xlu0 %1214 }
 0x463   : > { %v1227_v13 = vmul.f32 %v1922_v11, %v1914_v53  ;;  %v1924_v16 = vpop.eup %1923  ;;  %1925 = vrcp.f32 %v1215_v15 }
 0x464   : > { %v1228_v17 = vmul.f32 %v1924_v16, %v1912_v51 }
 0x465   : > { %1791 = vmatmul.msk.f32.vlgmr.msra.gmra.mxu2 %vm1176_vm0, %v1227_v13 }
 0x469   : > { %v1926_v19 = vpop.eup %1925 }
 0x46a   : > { %v1218_v18 = vpop.xlane.xlu2 %1217  ;;  %v1229_v20 = vmul.f32 %v1926_v19, %v1916_v56 }
 0x46b   : > { %1927 = vrcp.f32 %v1218_v18 }
 0x46d   : > { %1792 = vmatmul.msk.f32.gmra.mxu2 %vm1176_vm0, %v1228_v17 }
 0x471   : > { %v1928_v23 = vpop.eup %1927 }
 0x472   : > { %v1221_v21 = vpop.xlane.xlu1 %1220  ;;  %v1230_v25 = vmul.f32 %v1928_v23, %v1918_v62 }
 0x473   : > { %1929 = vrcp.f32 %v1221_v21  ;;  %v1902_v21 = vld [vmem:[%s689_s21] ss:$0 sm:$0xff] }
 0x475   : > { %1793 = vmatmul.msk.f32.gmra.mxu2 %vm1176_vm0, %v1229_v20 }
 0x479   : > { %v1930_v26 = vpop.eup %1929 }
 0x47a   : > { %v1231_v27 = vmul.f32 %v1930_v26, %v1920_v2 }
 0x47d   : > { %1794 = vmatmul.msk.f32.gmra.mxu2 %vm1176_vm0, %v1230_v25 }
 0x485   : > { %1795 = vmatmul.msk.f32.gmra.mxu2 %vm1176_vm0, %v1231_v27 }
 0x4e8   : > { %v1264_v28 = vpop.f32.mrf.mxu2 }
 0x4e9   : > { %1279 = vst.msk [vmem:[#allocation5] sm:$0xff] %vm862_vm13, %v1264_v28  ;;  %vm1300_vm13 = vcmask 195716  }
 0x4f0   : > { %v1267_v29 = vpop.f32.mrf.mxu2 }
 0x4f1   : > { %1280 = vst.msk [vmem:[#allocation5 + $0x8] sm:$0x3] %vm864_vm14, %v1267_v29  ;;  %1283 = vrot.lane.b32.xlu2 %v1267_v29, %s1964_s19  ;;  %vm1311_vm14 = vcmask 261318  }
 0x4f8   : > { %v1270_v30 = vpop.f32.mrf.mxu2 }
 0x4f9   : > { %1294 = vrot.lane.b32.xlu1 %v1270_v30, %s1965_s23  ;;  %1285 = vrot.lane.b32.xlu0 %v1270_v30, %s1964_s19  ;;  %v1903_v30 = vld [vmem:[%s697_s9] ss:$0 sm:$0xff] }
 0x500   : > { %v1273_v31 = vpop.f32.mrf.mxu2 }
 0x501   : > { %1305 = vrot.lane.b32.xlu2 %v1273_v31, %s1966_s24  ;;  %1296 = vrot.lane.b32.xlu0 %v1273_v31, %s1965_s23 }
 0x508   : > { %v1276_v33 = vpop.f32.mrf.mxu2 }
 0x509   : > { %1307 = vrot.lane.b32.xlu1 %v1276_v33, %s1966_s24 }
 0x54b   : > { %v1284_v34 = vpop.permute.xlu2 %1283 }
 0x54c   : > { %1290 = vst.msk [vmem:[#allocation5 - $0x2] sm:$0xfc] %vm1289_vm9, %v1284_v34 }
 0x55b   : > { %v1306_v39 = vpop.permute.xlu2 %1305 }
 0x56b   : > { %v1295_v37 = vpop.permute.xlu1 %1294  ;;  %v1286_v38 = vpop.permute.xlu0 %1285 }
 0x56c   : > { %1301 = vst.msk [vmem:[#allocation5 - $0x4] sm:$0xf0] %vm1300_vm13, %v1295_v37 }
 0x56d   : > { %1312 = vst.msk [vmem:[#allocation5 - $0x6] sm:$0xc0] %vm1311_vm14, %v1306_v39 }
 0x56e   : > { %1292 = vst.msk [vmem:[#allocation5 + $0x6] sm:$0xf] %vm1291_vm10, %v1286_v38  ;;  %v1864_v38 = vld [vmem:[%s2116_s0 + $0x30] sm:$0xff] }
 0x56f   : > { %1599 = vmatpush.bf16.msrb.mxu3 %v1864_v38 }
 0x573   : > { %v1297_v40 = vpop.permute.xlu0 %1296 }
 0x574   : > { %1303 = vst.msk [vmem:[#allocation5 + $0x4] sm:$0x3f] %vm1302_vm11, %v1297_v40 }
 0x57b   : > { %v1308_v41 = vpop.permute.xlu1 %1307 }
 0x57c   : > { %1314 = vst.msk [vmem:[#allocation5 + $0x2] sm:$0xff] %vm1313_vm12, %v1308_v41 }
 0x583   : > { %v1315_v42 = vld [vmem:[#allocation5] sm:$0xff]  ;;  %v1316_v43 = vld [vmem:[#allocation5 + $0x8] sm:$0x3] }
 0x584   : > { %v1321_v44 = vpack.c.bf16 %v1316_v43, %v1315_v42  ;;  %v1863_v42 = vld [vmem:[%s2116_s0 + $0x28] sm:$0xff] }
 0x585   : > { %1600 = vmatpush.bf16.msrb.mxu3 %v1863_v42 }
 0x586   : > { %1804 = vmatmul.msk.bf16.vlgmr.msra.gmra.mxu3 %vm761_vm4, %v1321_v44 }
 0x609   : > { %v1346_v46 = vpop.f32.mrf.mxu3 }
 0x60a   : > { %v1351_v47 = vadd.f32 %v1346_v46, %v2176_v22 }
 0x60c   : > { %v2322_v48 = vadd.f32 %v1900_v45, %v1351_v47 }
 0x60e   : > { %v1361_v49 = vsel %vm761_vm4, %v2322_v48, 0.0 }
 0x60f   : > { %1362 = vadd.xlane.f32.xlu0 %v1361_v49 }
 0x611   : > { %v1348_v50 = vpop.f32.mrf.mxu3 }
 0x612   : > { %v1352_v51 = vadd.f32 %v1348_v50, %v2183_v24 }
 0x614   : > { %v2327_v52 = vadd.f32 %v1900_v45, %v1352_v51  ;;  %v1862_v45 = vld [vmem:[%s2116_s0 + $0x20] sm:$0xff]  ;;  %v1861_v51 = vld [vmem:[%s2116_s0 + $0x18] sm:$0xff] }
 0x615   : > { %1601 = vmatpush.bf16.msrb.mxu3 %v1862_v45 }
 0x616   : > { %v1364_v53 = vsel %vm765_vm5, %v2327_v52, 0.0 }
 0x617   : > { %1365 = vadd.xlane.f32.xlu2 %v1364_v53 }
 0x619   : > { %1602 = vmatpush.bf16.msrb.mxu3 %v1861_v51 }
 0x682   : > { %v1363_v54 = vpop.xlane.xlu0 %1362 }
 0x683   : > { %v1367_v12 = vmul.f32 %v1363_v54, %v2187_v32 }
 0x685   : > { %v1369_v22 = vsub.f32 %v2322_v48, %v1367_v12 }
 0x687   : > { %v1371_v14 = vmul.f32 %v1369_v22, %v1369_v22 }
 0x689   : > { %v1373_v55 = vsel %vm761_vm4, %v1371_v14, 0.0  ;;  %v1860_v14 = vld [vmem:[%s2116_s0 + $0x10] sm:$0xff] }
 0x68a   : > { %1374 = vadd.xlane.f32.xlu1 %v1373_v55  ;;  %v1366_v56 = vpop.xlane.xlu2 %1365  ;;  %1603 = vmatpush.bf16.msrb.mxu3 %v1860_v14  ;;  %v1904_v14 = vld [vmem:[%s705_s1] ss:$0 sm:$0xff] }
 0x68b   : > { %v1368_v24 = vmul.f32 %v1366_v56, %v2187_v32 }
 0x68d   : > { %v1370_v57 = vsub.f32 %v2327_v52, %v1368_v24 }
 0x68f   : > { %v1372_v58 = vmul.f32 %v1370_v57, %v1370_v57 }
 0x691   : > { %v1376_v59 = vsel %vm765_vm5, %v1372_v58, 0.0 }
 0x692   : > { %1377 = vadd.xlane.f32.xlu0 %v1376_v59 }
 0x6fd   : > { %v1375_v60 = vpop.xlane.xlu1 %1374 }
 0x6fe   : > { %v1379_v62 = vmul.f32 %v1375_v60, %v2187_v32  ;;  %v1859_v60 = vld [vmem:[%s2116_s0 + $0x8] sm:$0xff] }
 0x6ff   : > { %1604 = vmatpush.bf16.msrb.mxu3 %v1859_v60 }
 0x700   : > { %v1381_v63 = vadd.f32 1e-06, %v1379_v62 }
 0x702   : > { %1931 = vrsqrt.f32 %v1381_v63  ;;  %vm1389_vm0 = vweird.f32 %v1381_v63 }
 0x705   : > { %v1378_v1 = vpop.xlane.xlu0 %1377 }
 0x706   : > { %v1380_v2 = vmul.f32 %v1378_v1, %v2187_v32  ;;  %v1901_v32 = vld [vmem:[%s686_s6] ss:$0 sm:$0xff] }
 0x708   : > { %v1932_v3 = vpop.eup %1931  ;;  %v1382_v4 = vadd.f32 1e-06, %v1380_v2 }
 0x709   : > { %v1384_v5 = vmul.f32 %v1932_v3, %v1381_v63  ;;  %vm1390_vm15 = vweird.f32 %v1932_v3 }
 0x70a   : > { %1933 = vrsqrt.f32 %v1382_v4  ;;  %vm1391_vm1 = vmor %vm1389_vm0, %vm1390_vm15  ;;  %vm1399_vm3 = vweird.f32 %v1382_v4 }
 0x70b   : > { %v1385_v6 = vmul.f32 %v1932_v3, %v1384_v5 }
 0x70d   : > { %v1386_v7 = vmul.f32 0.5, %v1385_v6 }
 0x70f   : > { %v1387_v8 = vsub.f32 1.5, %v1386_v7 }
 0x710   : > { %v1934_v9 = vpop.eup %1933 }
 0x711   : > { %v1388_v10 = vmul.f32 %v1932_v3, %v1387_v8  ;;  %v1394_v11 = vmul.f32 %v1934_v9, %v1382_v4  ;;  %vm1400_vm2 = vweird.f32 %v1934_v9  ;;  %v1858_v4 = vld [vmem:[%s2116_s0] sm:$0xff] }
 0x712   : > { %vm1401_vm6 = vmor %vm1399_vm3, %vm1400_vm2  ;;  %1605 = vmatpush.bf16.msrb.mxu3 %v1858_v4 }
 0x713   : > { %v1395_v13 = vmul.f32 %v1934_v9, %v1394_v11  ;;  %v1392_v15 = vsel %vm1391_vm1, %v1932_v3, %v1388_v10 }
 0x714   : > { %v1403_v18 = vmul.f32 %v1392_v15, %v1369_v22 }
 0x715   : > { %v1396_v16 = vmul.f32 0.5, %v1395_v13 }
 0x716   : > { %v1408_v23 = vmul.f32 %v1901_v32, %v1403_v18 }
 0x717   : > { %v1397_v17 = vsub.f32 1.5, %v1396_v16 }
 0x718   : > { %v1413_v27 = vadd.f32 %v1902_v21, %v1408_v23 }
 0x719   : > { %v1398_v19 = vmul.f32 %v1934_v9, %v1397_v17 }
 0x71b   : > { %v1402_v20 = vsel %vm1401_vm6, %v1934_v9, %v1398_v19 }
 0x71c   : > { %v1404_v25 = vmul.f32 %v1402_v20, %v1370_v57 }
 0x71e   : > { %v1409_v26 = vmul.f32 %v1901_v32, %v1404_v25 }
 0x720   : > { %v1414_v28 = vadd.f32 %v1902_v21, %v1409_v26 }
 0x722   : > { %v1419_v29 = vpack.c.bf16 %v1414_v28, %v1413_v27 }
 0x724   : > { %1813 = vmatmul.msk.bf16.vlgmr.msra.gmra.mxu0 %vm761_vm4, %v1419_v29 }
 0x7a1   : > { %v1448_v31 = vpop.f32.mrf.mxu0 }
 0x7a2   : > { %v2357_v33 = vadd.f32 %v1903_v30, %v1448_v31 }
 0x7a4   : > { %v2360_v34 = vmul.f32 0.70710677, %v2357_v33  ;;  %v1453_v51 = vmul.f32 0.5, %v2357_v33 }
 0x7a6   : > { %v1461_v36 = vand.u32 2147483647, %v2360_v34  ;;  %vm1457_vm15 = vcmp.lt.f32.partialorder %v2360_v34, 0.0 }
 0x7a8   : > { %v1463_v37 = vmul.f32 0.3275911, %v1461_v36  ;;  %v1515_v62 = vsub.f32 0.0, %v1461_v36 }
 0x7a9   : > { %v1450_v39 = vpop.f32.mrf.mxu0 }
 0x7aa   : > { %v1465_v40 = vadd.f32 1.0, %v1463_v37  ;;  %v2365_v41 = vadd.f32 %v1903_v30, %v1450_v39  ;;  %v1517_v6 = vmul.f32 %v1515_v62, %v1461_v36 }
 0x7ac   : > { %1935 = vrcp.f32 %v1465_v40  ;;  %v2369_v43 = vmul.f32 0.70710677, %v2365_v41  ;;  %v1478_v54 = vand.u32 2147483648, %v1465_v40  ;;  %v1476_v22 = vand.u32 2147483647, %v1465_v40 }
 0x7ad   : > { %vm1472_vm8 = vweird.f32 %v1465_v40  ;;  %v1519_v13 = vmul.f32 1.442695, %v1517_v6 }
 0x7ae   : > { %v1462_v44 = vand.u32 2147483647, %v2369_v43  ;;  %v1479_v56 = vor.u32 1.1754944e-38, %v1478_v54  ;;  %vm1477_vm13 = vcmp.eq.f32.partialorder %v1476_v22, 8.507059e+37  ;;  %vm1458_vm0 = vcmp.lt.f32.partialorder %v2369_v43, 0.0 }
 0x7b0   : > { %v1464_v46 = vmul.f32 0.3275911, %v1462_v44  ;;  %v1516_v16 = vsub.f32 0.0, %v1462_v44 }
 0x7b2   : > { %v1936_v47 = vpop.eup %1935  ;;  %v1466_v50 = vadd.f32 1.0, %v1464_v46  ;;  %v1518_v20 = vmul.f32 %v1516_v16, %v1462_v44 }
 0x7b3   : > { %v1468_v49 = vmul.f32 %v1936_v47, %v1465_v40  ;;  %vm1473_vm7 = vweird.f32 %v1936_v47  ;;  %v1967_v40 = vmov 1.0  }
 0x7b4   : > { %1937 = vrcp.f32 %v1466_v50  ;;  %vm1474_vm9 = vmor %vm1472_vm8, %vm1473_vm7  ;;  %v1493_v1 = vand.u32 2147483648, %v1466_v50  ;;  %v1491_v3 = vand.u32 2147483647, %v1466_v50  ;;  %vm1487_vm10 = vweird.f32 %v1466_v50 }
 0x7b5   : > { %v1469_v53 = vsub.f32 1.0, %v1468_v49  ;;  %1939 = vpow2.f32 %v1519_v13  ;;  %v1521_v27 = vmul.f32 1.442695, %v1518_v20  ;;  %v1459_v42 = vsel %vm1457_vm15, -1.0, %v1967_v40 }
 0x7b6   : > { %v1494_v9 = vor.u32 1.1754944e-38, %v1493_v1  ;;  %vm1492_vm12 = vcmp.eq.f32.partialorder %v1491_v3, 8.507059e+37 }
 0x7b7   : > { %v1470_v12 = vmul.f32 %v1936_v47, %v1469_v53  ;;  %1941 = vpow2.f32 %v1521_v27  ;;  %v1454_v53 = vmul.f32 0.5, %v2365_v41 }
 0x7b9   : > { %v1471_v55 = vadd.f32 %v1936_v47, %v1470_v12 }
 0x7ba   : > { %v1938_v24 = vpop.eup %1937 }
 0x7bb   : > { %v1475_v57 = vsel %vm1474_vm9, %v1936_v47, %v1471_v55  ;;  %v1483_v59 = vmul.f32 %v1938_v24, %v1466_v50  ;;  %vm1488_vm14 = vweird.f32 %v1938_v24  ;;  %v1940_v29 = vpop.eup %1939  ;;  %v1460_v47 = vsel %vm1458_vm0, -1.0, %v1967_v40 }
 0x7bc   : > { %v1480_v58 = vsel %vm1477_vm13, %v1479_v56, %v1475_v57  ;;  %vm1489_vm11 = vmor %vm1487_vm10, %vm1488_vm14 }
 0x7bd   : > { %v1497_v61 = vmul.f32 1.0614054, %v1480_v58  ;;  %v1484_v63 = vsub.f32 1.0, %v1483_v59  ;;  %v1942_v39 = vpop.eup %1941 }
 0x7bf   : > { %v1499_v0 = vadd.f32 -1.4531521, %v1497_v61  ;;  %v1485_v2 = vmul.f32 %v1938_v24, %v1484_v63 }
 0x7c1   : > { %v1501_v5 = vmul.f32 %v1499_v0, %v1480_v58  ;;  %v1486_v7 = vadd.f32 %v1938_v24, %v1485_v2 }
 0x7c3   : > { %v1503_v8 = vadd.f32 1.4214138, %v1501_v5  ;;  %v1490_v10 = vsel %vm1489_vm11, %v1938_v24, %v1486_v7 }
 0x7c4   : > { %v1495_v15 = vsel %vm1492_vm12, %v1494_v9, %v1490_v10 }
 0x7c5   : > { %v1505_v11 = vmul.f32 %v1503_v8, %v1480_v58  ;;  %v1498_v17 = vmul.f32 1.0614054, %v1495_v15 }
 0x7c7   : > { %v1507_v32 = vadd.f32 -0.28449672, %v1505_v11  ;;  %v1500_v18 = vadd.f32 -1.4531521, %v1498_v17 }
 0x7c9   : > { %v1509_v19 = vmul.f32 %v1507_v32, %v1480_v58  ;;  %v1502_v21 = vmul.f32 %v1500_v18, %v1495_v15 }
 0x7cb   : > { %v1511_v23 = vadd.f32 0.2548296, %v1509_v19  ;;  %v1504_v25 = vadd.f32 1.4214138, %v1502_v21 }
 0x7cd   : > { %v1513_v26 = vmul.f32 %v1511_v23, %v1480_v58  ;;  %v1506_v28 = vmul.f32 %v1504_v25, %v1495_v15 }
 0x7cf   : > { %v1523_v30 = vmul.f32 %v1940_v29, %v1513_v26  ;;  %v1508_v31 = vadd.f32 -0.28449672, %v1506_v28 }
 0x7d1   : > { %v1510_v35 = vmul.f32 %v1508_v31, %v1495_v15  ;;  %v1525_v36 = vsub.f32 1.0, %v1523_v30 }
 0x7d3   : > { %v1512_v37 = vadd.f32 0.2548296, %v1510_v35  ;;  %v1527_v44 = vmul.f32 %v1525_v36, %v1459_v42 }
 0x7d5   : > { %v1514_v38 = vmul.f32 %v1512_v37, %v1495_v15  ;;  %v1529_v49 = vadd.f32 1.0, %v1527_v44 }
 0x7d7   : > { %v1524_v45 = vmul.f32 %v1942_v39, %v1514_v38  ;;  %v1531_v54 = vmul.f32 %v1529_v49, %v1453_v51 }
 0x7d9   : > { %v1526_v46 = vsub.f32 1.0, %v1524_v45 }
 0x7db   : > { %v1528_v50 = vmul.f32 %v1526_v46, %v1460_v47 }
 0x7dd   : > { %v1530_v34 = vadd.f32 1.0, %v1528_v50 }
 0x7df   : > { %v1532_v12 = vmul.f32 %v1530_v34, %v1454_v53 }
 0x7e1   : > { %v1549_v22 = vpack.c.bf16 %v1532_v12, %v1531_v54 }
 0x7e3   : > { %1606 = vmatmul.bf16.vlgmr.msrb.gmra.mxu3 %v1549_v22 }
 0x866   : > { %v1607_v43 = vpop.f32.mrf.mxu3 }
 0x867   : > { %v1612_v55 = vadd.f32 %v1607_v43, %v2322_v48 }
 0x869   : > { %v1618_v56 = vadd.f32 %v1904_v14, %v1612_v55 }
 0x86b   : > { %1620 = vst.msk [vmem:[%s2416_s17] sm:$0xff] %vm761_vm4, %v1618_v56 }
 0x86e   : > { %v1609_v33 = vpop.f32.mrf.mxu3 }
 0x86f   : > { %v1613_v41 = vadd.f32 %v1609_v33, %v2327_v52 }
 0x871   : > { %v1619_v24 = vadd.f32 %v1904_v14, %v1613_v41 }
 0x873   : > { %1621 = vst.msk [vmem:[%s2416_s17 + $0x8] sm:$0x3] %vm765_vm5, %v1619_v24 }
 0x874 PF: > { %s2442_s26 = sld [smem:[#allocation6_spill]] }
 0x87a   : > { %s27_s24 = sadd.s32 1, %s2442_s26  }
 0x87b   : > { %p24_p5 = scmp.ge.s32.totalorder %s27_s24, 4  }
 0x87d   :  { %26 = sbr.rel (!%p24_p5) target bundleno = 8 (0x8), region = 151 }

// kernel: dofa_forward.7
= control target key start
LH: loop header
LB: loop body
LE: loop exit
PB: predicated region body
PF: predicated region fallthrough
CT: control target
= control target key end

     0   :  { %s1202_s13 = smov 0   ;;  %s1406_s0 = inlined_call_operand.vmem [shape: f32[2,4,32], index: 0, kind: input, shape index: {}]   ;;  %s1407_s1 = inlined_call_operand.vmem [shape: bf16[32,64], index: 1, kind: input, shape index: {}]   ;;  %s1408_s2 = inlined_call_operand.vmem [shape: f32[1,64], index: 2, kind: input, shape index: {}]   ;;  %s1409_s3 = inlined_call_operand.vmem [shape: f32[1,64], index: 3, kind: input, shape index: {}]   ;;  %s1410_s4 = inlined_call_operand.vmem [shape: bf16[144,16], index: 4, kind: input, shape index: {}]   ;;  %s1411_s5 = inlined_call_operand.vmem [shape: f32[1,16], index: 5, kind: input, shape index: {}]   ;;  %s1412_s6 = inlined_call_operand.vmem [shape: f32[1,16], index: 6, kind: input, shape index: {}]   ;;  %s1413_s7 = inlined_call_operand.vmem [shape: bf16[16,12], index: 7, kind: input, shape index: {}]   ;;  %s1414_s8 = inlined_call_operand.vmem [shape: f32[1,12], index: 8, kind: input, shape index: {}]   ;;  %s1415_s9 = inlined_call_operand.vmem [shape: f32[9,16,1], index: 9, kind: input, shape index: {}]   ;;  %s1416_s10 = inlined_call_operand.vmem [shape: f32[2,16,12], index: 10, kind: output, shape index: {}]  }
   0x1 LB: > { %s1001_s14 = sadd.s32 4294967295, %s1135_s13   ;;  %p1005_p0 = scmp.ge.s32.totalorder %s1135_s13, 1  ;;  %s1135_s13 = sphi %s1202_s13, %s20_s13  }
   0x2   : > { %p311_p1 = scmp.lt.s32.totalorder %s1135_s13, 3 }
   0x4   : > { %p312_p2 = pnand %p1005_p0, %p311_p1 }
   0x5   : > { %p348_p3 = scmp.lt.s32.totalorder (!%p312_p2), %s1001_s14, 1  ;;  %s1141_s20 = smov (!%p312_p2), 112  }
   0x6   : > { %315 = sbr.rel (%p312_p2) target bundleno = 827 (0x33b), region = 60  ;;  %s1142_s23 = smov (!%p312_p2), 96  }
   0x7   : > { %s1143_s12 = smov (!%p312_p2), 16   ;;  %s1144_s15 = smov (!%p312_p2), 32  }
   0x8   : > { %s1145_s16 = smov (!%p312_p2), 48   ;;  %s1146_s17 = smov (!%p312_p2), 64  }
   0xb   : > { %v1080_v0 = vld [vmem:[%s1407_s1 + $0x8] sm:$0xff]  ;;  %v1079_v1 = vld [vmem:[%s1407_s1] sm:$0xff]  ;;  %s1418_s14 = smov (!%p348_p3, %s1001_s14), 1  ;;  %vm376_vm0 = vcmask 261120   ;;  %v1137_v4 = vmov 0   ;;  %v1018_v5 = vld [vmem:[%s1415_s9 + $0x10] sm:$0xff] }
   0xc   : > { %386 = vmatpush.bf16.msra.mxu0 %v1080_v0  ;;  %s1006_s19 = sshll.u32 %s1418_s14, 2  ;;  %1109 = vset.pattern.permute.xlu1 %v1137_v4  ;;  %v1021_v6 = vld [vmem:[%s1415_s9 + $0x28] sm:$0xff]  ;;  %v1022_v7 = vld [vmem:[%s1415_s9 + $0x30] sm:$0xff]  ;;  %v1024_v9 = vld [vmem:[%s1415_s9 + $0x40] sm:$0xff]  ;;  %vm443_vm2 = vcmask 130048   ;;  %v1138_v32 = vmov 0.0  }
   0xd   : > { %s351_s22 = scalar_lea.vmem %s1406_s0, %s1006_s19  ;;  %1111 = vset.pattern.permute.xlu0 %v1137_v4  ;;  %504 = vperm.xlu1 %1109, %v1018_v5   ;;  %v1026_v8 = vld [vmem:[%s1415_s9 + $0x50] sm:$0xff]  ;;  %v1112_v10 = vld [vmem:[%s1408_s2] ss:$0 sm:$0xff]  ;;  %v1029_v14 = vld [vmem:[%s1415_s9 + $0x68] sm:$0xff]  ;;  %444 = vst.msk [vmem:[#allocation2] sm:$0xff] %vm443_vm2, %v1138_v32  ;;  %v1139_v54 = vmov 1.0  }
   0xe   : > { %v358_v2 = vld [vmem:[%s351_s22] sm:$0xf]  ;;  %1110 = vset.pattern.permute.xlu2 %v1137_v4  ;;  %537 = vperm.xlu0 %1111, %v1021_v6   ;;  %v1027_v16 = vld [vmem:[%s1415_s9 + $0x58] sm:$0xff]  ;;  %445 = vst.msk [vmem:[#allocation2 + $0x8] sm:$0xff] %vm443_vm2, %v1138_v32  ;;  %v1025_v39 = vld [vmem:[%s1415_s9 + $0x48] sm:$0xff]  ;;  %vm449_vm7 = vcmask 122880  }
   0xf   : > { %v363_v3 = vpack.c.bf16 %v358_v2, %v358_v2  ;;  %v1113_v11 = vld [vmem:[%s1409_s3] ss:$0 sm:$0xff]  ;;  %v1019_v21 = vld [vmem:[%s1415_s9 + $0x18] sm:$0xff]  ;;  %446 = vst.msk [vmem:[#allocation2 + $0x10] sm:$0xff] %vm443_vm2, %v1138_v32  ;;  %vm456_vm8 = vcmask 123905   ;;  %vm469_vm9 = vcmask 124930  }
  0x10   : > { %387 = vmatpush.bf16.msra.mxu0 %v1079_v1  ;;  %509 = vperm.xlu2 %1110, %v1019_v21   ;;  %v1020_v23 = vld [vmem:[%s1415_s9 + $0x20] sm:$0xff]  ;;  %v1023_v30 = vld [vmem:[%s1415_s9 + $0x38] sm:$0xff]  ;;  %s1140_s19 = smov 80   ;;  %vm472_vm10 = vcmask 125955   ;;  %v1030_v61 = vld [vmem:[%s1415_s9 + $0x70] sm:$0xff]  ;;  %vm447_vm11 = vcmask 123904  }
  0x11   : > { %v1028_v46 = vld [vmem:[%s1415_s9 + $0x60] sm:$0xff]  ;;  %v1031_v52 = vld [vmem:[%s1415_s9 + $0x78] sm:$0xff]  ;;  %v482_v62 = vld [vmem:[%s1415_s9 + $0x8] sm:$0xff]  ;;  %448 = vst.msk [vmem:[#allocation2 + $0x18] sm:$0x3] %vm447_vm11, %v1138_v32  ;;  %vm522_vm12 = vcmask 261248  }
  0x12   : > { %v1032_v60 = vld [vmem:[%s1415_s9 + $0x80] sm:$0xff]  ;;  %v1033_v0 = vld [vmem:[%s1415_s9 + $0x88] sm:$0xff]  ;;  %vm550_vm13 = vcmask 392448   ;;  %vm578_vm14 = vcmask 523648   ;;  %vm606_vm15 = vcmask 654848  }
  0x13   : > { %1017 = vmatmul.msk.bf16.vlgmr.msra.gmra.mxu0 %vm376_vm0, %v363_v3  ;;  %v481_v63 = vld [vmem:[%s1415_s9] sm:$0xff]  ;;  %vm634_vm0 = vcmask 786048  }
  0x15   : > { %560 = vperm.xlu1 %1109, %v1022_v7  }
  0x16   : > { %616 = vperm.xlu0 %1111, %v1026_v8  }
  0x18   : > { %532 = vperm.xlu2 %1110, %v1020_v23  }
  0x1d   : > { %588 = vperm.xlu1 %1109, %v1024_v9  }
  0x1e   : > { %649 = vperm.xlu0 %1111, %v1029_v14  }
  0x20   : > { %565 = vperm.xlu2 %1110, %v1023_v30  }
  0x25   : > { %621 = vperm.xlu1 %1109, %v1027_v16  }
  0x28   : > { %593 = vperm.xlu2 %1110, %v1025_v39  }
  0x30   : > { %644 = vperm.xlu2 %1110, %v1028_v46  }
  0x38   : > { %677 = vperm.xlu2 %1110, %v1031_v52  }
  0x40   : > { %700 = vperm.xlu2 %1110, %v1032_v60   ;;  %v1088_v60 = vld [vmem:[%s1410_s4 + $0x38] sm:$0xff] }
  0x41   : > { %793 = vmatpush.bf16.msra.mxu1 %v1088_v60 }
  0x6a   : > { %v510_v1 = vpop.permute.xlu2 %509 }
  0x72   : > { %v533_v3 = vpop.permute.xlu2 %532 }
  0x7a   : > { %v566_v6 = vpop.permute.xlu2 %565 }
  0x7f   : > { %v505_v2 = vpop.permute.xlu1 %504 }
  0x80   : > { %v538_v4 = vpop.permute.xlu0 %537 }
  0x82   : > { %v1299_v9 = vpop.permute.xlu2 %593 }
  0x87   : > { %v561_v5 = vpop.permute.xlu1 %560 }
  0x88   : > { %v1297_v7 = vpop.permute.xlu0 %616 }
  0x8f   : > { %v589_v8 = vpop.permute.xlu1 %588 }
  0x90   : > { %v389_v12 = vpop.f32.mrf.mxu0 }
  0x91   : > { %v397_v13 = vmul.f32 %v1112_v10, %v389_v12  ;;  %v1301_v10 = vpop.permute.xlu0 %649  ;;  %v1305_v12 = vpop.permute.xlu2 %644 }
  0x93   : > { %v402_v15 = vadd.f32 %v1113_v11, %v397_v13 }
  0x95   : > { %v404_v17 = vmul.f32 0.70710677, %v402_v15  ;;  %v403_v57 = vmul.f32 0.5, %v402_v15  ;;  %v1089_v15 = vld [vmem:[%s1410_s4 + $0x40] sm:$0xff] }
  0x96   : > { %814 = vmatpush.bf16.msra.mxu2 %v1089_v15 }
  0x97   : > { %v407_v18 = vand.u32 2147483647, %v404_v17  ;;  %vm405_vm6 = vcmp.lt.f32.partialorder %v404_v17, 0.0  ;;  %v1303_v11 = vpop.permute.xlu1 %621 }
  0x98   : > { %v391_v19 = vpop.f32.mrf.mxu0  ;;  %v406_v55 = vsel %vm405_vm6, -1.0, %v1139_v54 }
  0x99   : > { %v408_v20 = vmul.f32 0.3275911, %v407_v18  ;;  %v434_v36 = vsub.f32 0.0, %v407_v18  ;;  %v1316_v16 = vpop.permute.xlu2 %677 }
  0x9b   : > { %v409_v22 = vadd.f32 1.0, %v408_v20  ;;  %v435_v40 = vmul.f32 %v434_v36, %v407_v18 }
  0x9d   : > { %1117 = vrcp.f32 %v409_v22  ;;  %v421_v27 = vand.u32 2147483648, %v409_v22  ;;  %v419_v29 = vand.u32 2147483647, %v409_v22  ;;  %vm415_vm3 = vweird.f32 %v409_v22 }
  0x9e   : > { %v436_v43 = vmul.f32 1.442695, %v435_v40 }
  0x9f   : > { %v422_v33 = vor.u32 1.1754944e-38, %v421_v27  ;;  %vm420_vm5 = vcmp.eq.f32.partialorder %v419_v29, 8.507059e+37 }
  0xa0   : > { %1119 = vpow2.f32 %v436_v43 }
  0xa1   : > { %v701_v29 = vpop.permute.xlu2 %700 }
  0xa3   : > { %v1118_v24 = vpop.eup %1117 }
  0xa4   : > { %v411_v25 = vmul.f32 %v1118_v24, %v409_v22  ;;  %vm416_vm1 = vweird.f32 %v1118_v24 }
  0xa5   : > { %vm417_vm4 = vmor %vm415_vm3, %vm416_vm1  ;;  %vm662_vm1 = vcmask 917248   ;;  %vm690_vm3 = vcmask 1048448  }
  0xa6   : > { %v412_v26 = vsub.f32 1.0, %v411_v25  ;;  %v1120_v50 = vpop.eup %1119 }
  0xa8   : > { %v413_v28 = vmul.f32 %v1118_v24, %v412_v26 }
  0xaa   : > { %v414_v31 = vadd.f32 %v1118_v24, %v413_v28 }
  0xac   : > { %v418_v34 = vsel %vm417_vm4, %v1118_v24, %v414_v31 }
  0xad   : > { %v423_v35 = vsel %vm420_vm5, %v422_v33, %v418_v34 }
  0xae   : > { %v425_v37 = vmul.f32 1.0614054, %v423_v35 }
  0xb0   : > { %v426_v38 = vadd.f32 -1.4531521, %v425_v37 }
  0xb2   : > { %v427_v41 = vmul.f32 %v426_v38, %v423_v35 }
  0xb4   : > { %v428_v42 = vadd.f32 1.4214138, %v427_v41 }
  0xb6   : > { %v429_v44 = vmul.f32 %v428_v42, %v423_v35 }
  0xb8   : > { %v430_v45 = vadd.f32 -0.28449672, %v429_v44 }
  0xba   : > { %v431_v47 = vmul.f32 %v430_v45, %v423_v35 }
  0xbc   : > { %v432_v48 = vadd.f32 0.2548296, %v431_v47 }
  0xbe   : > { %v433_v49 = vmul.f32 %v432_v48, %v423_v35 }
  0xc0   : > { %v438_v51 = vmul.f32 %v1120_v50, %v433_v49 }
  0xc2   : > { %v439_v53 = vsub.f32 1.0, %v438_v51 }
  0xc4   : > { %v440_v56 = vmul.f32 %v439_v53, %v406_v55 }
  0xc6   : > { %v441_v58 = vadd.f32 1.0, %v440_v56 }
  0xc8   : > { %v442_v59 = vmul.f32 %v441_v58, %v403_v57 }
  0xca   : > { %463 = vrot.lane.b32.xlu1 %v442_v59, %s1140_s19  ;;  %452 = vrot.lane.b32.xlu0 %v442_v59, %s1141_s20  ;;  %450 = vst.msk [vmem:[#allocation2 + $0x5] sm:$0x1] %vm449_vm7, %v442_v59 }
  0xcb   : > { %457 = vst.msk [vmem:[#allocation2 + $0x6] sm:$0x2] %vm456_vm8, %v442_v59 }
  0xcc   : > { %470 = vst.msk [vmem:[#allocation2 + $0xb] sm:$0x4] %vm469_vm9, %v442_v59 }
  0xcd   : > { %473 = vst.msk [vmem:[#allocation2 + $0xc] sm:$0x8] %vm472_vm10, %v442_v59 }
  0xd2   : > { %672 = vperm.xlu1 %1109, %v1030_v61   ;;  %459 = vrot.lane.b32.xlu0 %v442_v59, %s1142_s23 }
  0xda   : > { %490 = vperm.xlu1 %1109, %v482_v62   ;;  %485 = vperm.xlu0 %1111, %v481_v63   ;;  %v1087_v62 = vld [vmem:[%s1410_s4 + $0x30] sm:$0xff]  ;;  %v1086_v63 = vld [vmem:[%s1410_s4 + $0x28] sm:$0xff] }
  0xdb   : > { %794 = vmatpush.bf16.msra.mxu1 %v1087_v62 }
  0xdf   : > { %795 = vmatpush.bf16.msra.mxu1 %v1086_v63 }
  0xe2   : > { %705 = vperm.xlu0 %1111, %v1033_v0   ;;  %v1085_v0 = vld [vmem:[%s1410_s4 + $0x20] sm:$0xff] }
  0xe3   : > { %796 = vmatpush.bf16.msra.mxu1 %v1085_v0 }
 0x13c   : > { %v464_v13 = vpop.permute.xlu1 %463  ;;  %v453_v14 = vpop.permute.xlu0 %452 }
 0x13d   : > { %466 = vst.msk [vmem:[#allocation2 + $0xa] sm:$0x1] %vm449_vm7, %v464_v13 }
 0x13e   : > { %468 = vst.msk [vmem:[#allocation2 + $0xb] sm:$0x2] %vm456_vm8, %v464_v13 }
 0x13f   : > { %476 = vst.msk [vmem:[#allocation2 + $0x10] sm:$0x4] %vm469_vm9, %v464_v13 }
 0x140   : > { %478 = vst.msk [vmem:[#allocation2 + $0x11] sm:$0x8] %vm472_vm10, %v464_v13 }
 0x141   : > { %455 = vst.msk [vmem:[#allocation2 + $0x6] sm:$0x1] %vm449_vm7, %v453_v14 }
 0x142   : > { %458 = vst.msk [vmem:[#allocation2 + $0x7] sm:$0x2] %vm456_vm8, %v453_v14 }
 0x143   : > { %471 = vst.msk [vmem:[#allocation2 + $0xc] sm:$0x4] %vm469_vm9, %v453_v14 }
 0x144   : > { %474 = vst.msk [vmem:[#allocation2 + $0xd] sm:$0x8] %vm472_vm10, %v453_v14  ;;  %v1320_v17 = vpop.permute.xlu1 %672  ;;  %v460_v18 = vpop.permute.xlu0 %459 }
 0x145   : > { %462 = vst.msk [vmem:[#allocation2 + $0x9] sm:$0x1] %vm449_vm7, %v460_v18 }
 0x146   : > { %467 = vst.msk [vmem:[#allocation2 + $0xa] sm:$0x2] %vm456_vm8, %v460_v18 }
 0x147   : > { %475 = vst.msk [vmem:[#allocation2 + $0xf] sm:$0x4] %vm469_vm9, %v460_v18 }
 0x148   : > { %477 = vst.msk [vmem:[#allocation2 + $0x10] sm:$0x8] %vm472_vm10, %v460_v18  ;;  %v479_v23 = vld [vmem:[#allocation2] sm:$0xff] }
 0x149   : > { %v497_v19 = vld [vmem:[#allocation2 + $0x1] sm:$0xff] }
 0x14a   : > { %v512_v20 = vmul.f32 %v505_v2, %v497_v19 }
 0x14c   : > { %516 = vrot.lane.b32.xlu1 %v512_v20, %s1143_s12  ;;  %v491_v21 = vpop.permute.xlu1 %490  ;;  %v486_v22 = vpop.permute.xlu0 %485  ;;  %v525_v24 = vld [vmem:[#allocation2 + $0x2] sm:$0xff] }
 0x14d   : > { %v480_v25 = vld [vmem:[#allocation2 + $0x8] sm:$0xff]  ;;  %v493_v26 = vmul.f32 %v486_v22, %v479_v23  ;;  %v540_v28 = vmul.f32 %v533_v3, %v525_v24  ;;  %v1114_v22 = vld [vmem:[%s1411_s5] ss:$0 sm:$0xff] }
 0x14e   : > { %v498_v27 = vld [vmem:[#allocation2 + $0x9] sm:$0xff]  ;;  %v494_v31 = vmul.f32 %v491_v21, %v480_v25  ;;  %v652_v56 = vmul.f32 %v1305_v12, %v480_v25  ;;  %v1090_v24 = vld [vmem:[%s1413_s7] sm:$0xff] }
 0x14f   : > { %v693_v30 = vld [vmem:[#allocation2 + $0xa] sm:$0xff]  ;;  %v513_v32 = vmul.f32 %v510_v1, %v498_v27  ;;  %495 = vst.msk [vmem:[#allocation3] sm:$0xff] %vm443_vm2, %v493_v26  ;;  %544 = vrot.lane.b32.xlu0 %v540_v28, %s1144_s15  ;;  %v694_v37 = vld [vmem:[#allocation2 + $0x12] sm:$0xff]  ;;  %v680_v57 = vmul.f32 %v1320_v17, %v498_v27  ;;  %v1115_v26 = vld [vmem:[%s1412_s6] ss:$0 sm:$0xff]  ;;  %936 = vmatpush.bf16.msra.mxu3 %v1090_v24 }
 0x150   : > { %v708_v33 = vmul.f32 %v701_v29, %v693_v30  ;;  %496 = vst.msk [vmem:[#allocation3 + $0x10] sm:$0xff] %vm443_vm2, %v494_v31  ;;  %v541_v34 = vmul.f32 %v693_v30, %v538_v4  ;;  %v554_v35 = vld [vmem:[#allocation2 + $0xc] sm:$0xff]  ;;  %v553_v36 = vld [vmem:[#allocation2 + $0x4] sm:$0xff]  ;;  %v1084_v1 = vld [vmem:[%s1410_s4 + $0x18] sm:$0xff] }
 0x151   : > { %518 = vrot.lane.b32.xlu2 %v513_v32, %s1143_s12  ;;  %v569_v40 = vmul.f32 %v566_v6, %v554_v35  ;;  %v568_v41 = vmul.f32 %v561_v5, %v553_v36  ;;  %v581_v42 = vld [vmem:[#allocation2 + $0x5] sm:$0xff]  ;;  %v582_v45 = vld [vmem:[#allocation2 + $0xd] sm:$0xff]  ;;  %797 = vmatpush.bf16.msra.mxu1 %v1084_v1 }
 0x152   : > { %710 = vst.msk [vmem:[#allocation3 + $0x8] sm:$0xff] %vm443_vm2, %v708_v33  ;;  %v596_v43 = vmul.f32 %v589_v8, %v581_v42  ;;  %v609_v44 = vld [vmem:[#allocation2 + $0x6] sm:$0xff]  ;;  %v597_v47 = vmul.f32 %v1299_v9, %v582_v45  ;;  %v610_v50 = vld [vmem:[#allocation2 + $0xe] sm:$0xff] }
 0x153   : > { %v624_v46 = vmul.f32 %v1297_v7, %v609_v44  ;;  %v625_v52 = vmul.f32 %v1303_v11, %v610_v50  ;;  %v638_v53 = vld [vmem:[#allocation2 + $0x10] sm:$0xff]  ;;  %v1082_v6 = vld [vmem:[%s1410_s4 + $0x8] sm:$0xff]  ;;  %v1081_v7 = vld [vmem:[%s1410_s4] sm:$0xff] }
 0x154   : > { %546 = vrot.lane.b32.xlu1 %v541_v34, %s1144_s15  ;;  %v706_v38 = vpop.permute.xlu0 %705  ;;  %v653_v55 = vmul.f32 %v1301_v10, %v638_v53  ;;  %v666_v58 = vld [vmem:[#allocation2 + $0x11] sm:$0xff] }
 0x155   : > { %v709_v39 = vmul.f32 %v706_v38, %v694_v37  ;;  %v681_v59 = vmul.f32 %v1316_v16, %v666_v58  ;;  %v1083_v4 = vld [vmem:[%s1410_s4 + $0x10] sm:$0xff] }
 0x156   : > { %798 = vmatpush.bf16.msra.mxu1 %v1083_v4 }
 0x157   : > { %711 = vst.msk [vmem:[#allocation3 + $0x18] sm:$0xff] %vm443_vm2, %v709_v39  ;;  %574 = vrot.lane.b32.xlu0 %v569_v40, %s1145_s16 }
 0x159   : > { %572 = vrot.lane.b32.xlu2 %v568_v41, %s1145_s16  ;;  %v713_v48 = vld [vmem:[#allocation3 + $0x8] sm:$0xff] }
 0x15a   : > { %799 = vmatpush.bf16.msra.mxu1 %v1082_v6 }
 0x15c   : > { %600 = vrot.lane.b32.xlu1 %v596_v43, %s1146_s17 }
 0x15e   : > { %v715_v49 = vld [vmem:[#allocation3 + $0x18] sm:$0xff]  ;;  %800 = vmatpush.bf16.msra.mxu1 %v1081_v7 }
 0x15f   : > { %628 = vrot.lane.b32.xlu0 %v624_v46, %s1140_s19  ;;  %v735_v51 = vpack.c.bf16 %v715_v49, %v713_v48 }
 0x161   : > { %602 = vrot.lane.b32.xlu2 %v597_v47, %s1146_s17  ;;  %1070 = vmatmul.msk.bf16.vlgmr.msra.gmra.mxu2 %vm443_vm2, %v735_v51 }
 0x164   : > { %630 = vrot.lane.b32.xlu1 %v625_v52, %s1140_s19 }
 0x167   : > { %658 = vrot.lane.b32.xlu0 %v653_v55, %s1142_s23 }
 0x169   : > { %656 = vrot.lane.b32.xlu2 %v652_v56, %s1142_s23  ;;  %s1078_s23 = sshll.u32 %s1418_s14, 4 }
 0x16a   : > { %s356_s27 = scalar_lea.vmem %s1416_s10, %s1078_s23 }
 0x16c   : > { %684 = vrot.lane.b32.xlu1 %v680_v57, %s1141_s20 }
 0x171   : > { %686 = vrot.lane.b32.xlu2 %v681_v59, %s1141_s20 }
 0x1ab   : > { %v519_v61 = vpop.permute.xlu2 %518 }
 0x1ac   : > { %524 = vst.msk [vmem:[#allocation3 + $0x10] sm:$0xff] %vm522_vm12, %v519_v61 }
 0x1b3   : > { %v573_v2 = vpop.permute.xlu2 %572 }
 0x1bb   : > { %v603_v8 = vpop.permute.xlu2 %602 }
 0x1be   : > { %v517_v3 = vpop.permute.xlu1 %516 }
 0x1bf   : > { %523 = vst.msk [vmem:[#allocation3] sm:$0xff] %vm522_vm12, %v517_v3 }
 0x1c1   : > { %v545_v5 = vpop.permute.xlu0 %544 }
 0x1c2   : > { %551 = vst.msk [vmem:[#allocation3] sm:$0xff] %vm550_vm13, %v545_v5 }
 0x1c3   : > { %579 = vst.msk [vmem:[#allocation3] sm:$0xff] %vm578_vm14, %v573_v2  ;;  %v657_v12 = vpop.permute.xlu2 %656 }
 0x1c6   : > { %v547_v9 = vpop.permute.xlu1 %546 }
 0x1c7   : > { %552 = vst.msk [vmem:[#allocation3 + $0x10] sm:$0xff] %vm550_vm13, %v547_v9 }
 0x1c9   : > { %v575_v10 = vpop.permute.xlu0 %574 }
 0x1ca   : > { %580 = vst.msk [vmem:[#allocation3 + $0x10] sm:$0xff] %vm578_vm14, %v575_v10  ;;  %vm943_vm14 = vcmask 97280  }
 0x1cb   : > { %608 = vst.msk [vmem:[#allocation3 + $0x10] sm:$0xff] %vm606_vm15, %v603_v8  ;;  %v687_v16 = vpop.permute.xlu2 %686 }
 0x1ce   : > { %v601_v11 = vpop.permute.xlu1 %600 }
 0x1cf   : > { %607 = vst.msk [vmem:[#allocation3] sm:$0xff] %vm606_vm15, %v601_v11 }
 0x1d1   : > { %v629_v13 = vpop.permute.xlu0 %628 }
 0x1d2   : > { %635 = vst.msk [vmem:[#allocation3] sm:$0xff] %vm634_vm0, %v629_v13 }
 0x1d3   : > { %663 = vst.msk [vmem:[#allocation3] sm:$0xff] %vm662_vm1, %v657_v12 }
 0x1d6   : > { %v631_v14 = vpop.permute.xlu1 %630 }
 0x1d7   : > { %636 = vst.msk [vmem:[#allocation3 + $0x10] sm:$0xff] %vm634_vm0, %v631_v14 }
 0x1d9   : > { %v659_v15 = vpop.permute.xlu0 %658 }
 0x1da   : > { %664 = vst.msk [vmem:[#allocation3 + $0x10] sm:$0xff] %vm662_vm1, %v659_v15 }
 0x1db   : > { %692 = vst.msk [vmem:[#allocation3 + $0x10] sm:$0xff] %vm690_vm3, %v687_v16 }
 0x1de   : > { %v685_v17 = vpop.permute.xlu1 %684 }
 0x1df   : > { %691 = vst.msk [vmem:[#allocation3] sm:$0xff] %vm690_vm3, %v685_v17 }
 0x1e2   : > { %v714_v18 = vld [vmem:[#allocation3 + $0x10] sm:$0xff] }
 0x1e4   : > { %v816_v21 = vpop.f32.mrf.mxu2 }
 0x1e6   : > { %v712_v19 = vld [vmem:[#allocation3] sm:$0xff] }
 0x1e7   : > { %v734_v20 = vpack.c.bf16 %v714_v18, %v712_v19 }
 0x1e9   : > { %801 = vmatmul.bf16.vlgmr.msra.gmra.mxu1 %v734_v20 }
 0x1ec   : > { %v818_v30 = vpop.f32.mrf.mxu2 }
 0x266   : > { %v802_v23 = vpop.f32.mrf.mxu1 }
 0x267   : > { %v817_v25 = vadd.f32 %v816_v21, %v802_v23 }
 0x269   : > { %v825_v27 = vmul.f32 %v1114_v22, %v817_v25 }
 0x26b   : > { %v1377_v28 = vadd.f32 %v1115_v26, %v825_v27 }
 0x26d   : > { %v1380_v29 = vmul.f32 0.70710677, %v1377_v28 }
 0x26e   : > { %v804_v31 = vpop.f32.mrf.mxu1 }
 0x26f   : > { %v841_v32 = vand.u32 2147483647, %v1380_v29  ;;  %v819_v33 = vadd.f32 %v818_v30, %v804_v31  ;;  %vm837_vm12 = vcmp.lt.f32.partialorder %v1380_v29, 0.0 }
 0x270   : > { %v839_v27 = vsel %vm837_vm12, -1.0, %v1139_v54 }
 0x271   : > { %v843_v34 = vmul.f32 0.3275911, %v841_v32  ;;  %v826_v35 = vmul.f32 %v1114_v22, %v819_v33  ;;  %v895_v53 = vsub.f32 0.0, %v841_v32 }
 0x273   : > { %v845_v36 = vadd.f32 1.0, %v843_v34  ;;  %v1383_v37 = vadd.f32 %v1115_v26, %v826_v35  ;;  %v897_v62 = vmul.f32 %v895_v53, %v841_v32 }
 0x275   : > { %1121 = vrcp.f32 %v845_v36  ;;  %v1386_v38 = vmul.f32 0.70710677, %v1383_v37  ;;  %v858_v45 = vand.u32 2147483648, %v845_v36  ;;  %v856_v47 = vand.u32 2147483647, %v845_v36 }
 0x276   : > { %vm852_vm5 = vweird.f32 %v845_v36  ;;  %v899_v4 = vmul.f32 1.442695, %v897_v62  ;;  %v834_v29 = vmul.f32 0.5, %v1383_v37 }
 0x277   : > { %v842_v39 = vand.u32 2147483647, %v1386_v38  ;;  %v859_v50 = vor.u32 1.1754944e-38, %v858_v45  ;;  %vm857_vm7 = vcmp.eq.f32.partialorder %v856_v47, 8.507059e+37  ;;  %vm838_vm13 = vcmp.lt.f32.partialorder %v1386_v38, 0.0 }
 0x278   : > { %v840_v33 = vsel %vm838_vm13, -1.0, %v1139_v54  ;;  %v1116_v38 = vld [vmem:[%s1414_s8] ss:$0 sm:$0xff] }
 0x279   : > { %v844_v40 = vmul.f32 0.3275911, %v842_v39  ;;  %v896_v5 = vsub.f32 0.0, %v842_v39 }
 0x27b   : > { %v1122_v41 = vpop.eup %1121  ;;  %v846_v42 = vadd.f32 1.0, %v844_v40  ;;  %v898_v11 = vmul.f32 %v896_v5, %v842_v39 }
 0x27c   : > { %v848_v43 = vmul.f32 %v1122_v41, %v845_v36  ;;  %vm853_vm4 = vweird.f32 %v1122_v41  ;;  %v833_v36 = vmul.f32 0.5, %v1377_v28 }
 0x27d   : > { %1123 = vrcp.f32 %v846_v42  ;;  %vm854_vm6 = vmor %vm852_vm5, %vm853_vm4  ;;  %v873_v58 = vand.u32 2147483648, %v846_v42  ;;  %v871_v60 = vand.u32 2147483647, %v846_v42  ;;  %vm867_vm9 = vweird.f32 %v846_v42 }
 0x27e   : > { %v849_v44 = vsub.f32 1.0, %v848_v43  ;;  %1125 = vpow2.f32 %v899_v4  ;;  %v901_v16 = vmul.f32 1.442695, %v898_v11 }
 0x27f   : > { %v874_v1 = vor.u32 1.1754944e-38, %v873_v58  ;;  %vm872_vm11 = vcmp.eq.f32.partialorder %v871_v60, 8.507059e+37 }
 0x280   : > { %v850_v46 = vmul.f32 %v1122_v41, %v849_v44  ;;  %1127 = vpow2.f32 %v901_v16 }
 0x282   : > { %v851_v48 = vadd.f32 %v1122_v41, %v850_v46 }
 0x283   : > { %v1124_v49 = vpop.eup %1123 }
 0x284   : > { %v863_v51 = vmul.f32 %v1124_v49, %v846_v42  ;;  %v855_v52 = vsel %vm854_vm6, %v1122_v41, %v851_v48  ;;  %vm868_vm8 = vweird.f32 %v1124_v49  ;;  %v1126_v19 = vpop.eup %1125 }
 0x285   : > { %v860_v55 = vsel %vm857_vm7, %v859_v50, %v855_v52  ;;  %vm869_vm10 = vmor %vm867_vm9, %vm868_vm8 }
 0x286   : > { %v864_v56 = vsub.f32 1.0, %v863_v51  ;;  %v877_v57 = vmul.f32 1.0614054, %v860_v55  ;;  %v1128_v26 = vpop.eup %1127 }
 0x288   : > { %v865_v59 = vmul.f32 %v1124_v49, %v864_v56  ;;  %v879_v61 = vadd.f32 -1.4531521, %v877_v57 }
 0x28a   : > { %v866_v63 = vadd.f32 %v1124_v49, %v865_v59  ;;  %v881_v0 = vmul.f32 %v879_v61, %v860_v55 }
 0x28c   : > { %v870_v2 = vsel %vm869_vm10, %v1124_v49, %v866_v63  ;;  %v883_v3 = vadd.f32 1.4214138, %v881_v0 }
 0x28d   : > { %v875_v6 = vsel %vm872_vm11, %v874_v1, %v870_v2 }
 0x28e   : > { %v878_v7 = vmul.f32 1.0614054, %v875_v6  ;;  %v885_v8 = vmul.f32 %v883_v3, %v860_v55 }
 0x290   : > { %v880_v9 = vadd.f32 -1.4531521, %v878_v7  ;;  %v887_v10 = vadd.f32 -0.28449672, %v885_v8 }
 0x292   : > { %v882_v12 = vmul.f32 %v880_v9, %v875_v6  ;;  %v889_v13 = vmul.f32 %v887_v10, %v860_v55 }
 0x294   : > { %v884_v14 = vadd.f32 1.4214138, %v882_v12  ;;  %v891_v15 = vadd.f32 0.2548296, %v889_v13 }
 0x296   : > { %v886_v17 = vmul.f32 %v884_v14, %v875_v6  ;;  %v893_v18 = vmul.f32 %v891_v15, %v860_v55 }
 0x298   : > { %v888_v20 = vadd.f32 -0.28449672, %v886_v17  ;;  %v903_v21 = vmul.f32 %v1126_v19, %v893_v18 }
 0x29a   : > { %v890_v22 = vmul.f32 %v888_v20, %v875_v6  ;;  %v905_v24 = vsub.f32 1.0, %v903_v21 }
 0x29c   : > { %v892_v23 = vadd.f32 0.2548296, %v890_v22  ;;  %v907_v31 = vmul.f32 %v905_v24, %v839_v27 }
 0x29e   : > { %v894_v25 = vmul.f32 %v892_v23, %v875_v6  ;;  %v909_v35 = vadd.f32 1.0, %v907_v31 }
 0x2a0   : > { %v904_v30 = vmul.f32 %v1128_v26, %v894_v25  ;;  %v911_v40 = vmul.f32 %v909_v35, %v833_v36 }
 0x2a2   : > { %v906_v32 = vsub.f32 1.0, %v904_v30 }
 0x2a4   : > { %v908_v34 = vmul.f32 %v906_v32, %v840_v33 }
 0x2a6   : > { %v910_v39 = vadd.f32 1.0, %v908_v34 }
 0x2a8   : > { %v912_v41 = vmul.f32 %v910_v39, %v834_v29 }
 0x2aa   : > { %v915_v42 = vpack.c.bf16 %v912_v41, %v911_v40 }
 0x2ac   : > { %1075 = vmatmul.msk.bf16.vlgmr.msra.gmra.mxu3 %vm443_vm2, %v915_v42 }
 0x32f   : > { %v938_v54 = vpop.f32.mrf.mxu3 }
 0x330   : > { %v939_v28 = vadd.f32 %v1116_v38, %v938_v54 }
 0x332   : > { %944 = vst.msk [vmem:[%s356_s27] sm:$0xff] %vm943_vm14, %v939_v28 }
 0x337   : > { %v940_v37 = vpop.f32.mrf.mxu3 }
 0x338   : > { %v941_v43 = vadd.f32 %v1116_v38, %v940_v37 }
 0x33a   : > { %945 = vst.msk [vmem:[%s356_s27 + $0x8] sm:$0xff] %vm943_vm14, %v941_v43 }
 0x33b PF: > { %s20_s13 = sadd.s32 1, %s1135_s13  }
 0x33c   : > { %p17_p4 = scmp.ge.s32.totalorder %s20_s13, 4  }
 0x33e   :  { %19 = sbr.rel (!%p17_p4) target bundleno = 1 (0x1), region = 98 }

</bundles_post_ra>
